<compile_context>
chip_gen: v5e
topology: v5e:2x2
jax: 0.10.0
libtpu: 0.0.40
codegen_flags: <defaults>
</compile_context>

<pallas_src>
import functools

import jax
import jax.numpy as jnp
from jax.experimental import pallas as pl
from jax.experimental.pallas import tpu as pltpu


def _upsample_conv2x_kernel(x_ref, w_ref, b_ref, o_ref, *, H, W, cout):
    """Fused nearest-2x upsample + 3x3 conv (padding=1), one batch image.

    x_ref: (1, nrows, Cin)  zero-padded image, channels-last, spatially
           flattened with row stride Wp = W + 2.
    w_ref: (16, Cin, Cout)  effective 2x2-tap weights per output parity,
           index = ((pi*2 + pj)*2 + ti)*2 + tj.
    b_ref: (1, Cout) bias.
    o_ref: (1, 4, M, Cout) with M = H*Wp; row q = i*Wp + j of parity
           p = 2*pi + pj holds output pixel (2i+pi, 2j+pj); columns j >= W
           are junk and dropped in the wrapper.
    """
    Wp = W + 2
    M = H * Wp
    # Hoisted bias broadcast (reused as the accumulator init for all parities).
    bias_full = jnp.broadcast_to(b_ref[...], (M, cout)).astype(jnp.float32)

    # Tap -> source-row/col offset map for each output parity.
    offs = ((-1, 0), (0, 1))  # offs[parity][tap]
    xs_cache = {}             # shifted input views, shared across parities
    for pi in range(2):
        for pj in range(2):
            acc = bias_full
            for ti in range(2):
                for tj in range(2):
                    base = (1 + offs[pi][ti]) * Wp + (1 + offs[pj][tj])
                    if base not in xs_cache:
                        xs_cache[base] = x_ref[0, pl.ds(base, M), :]
                    tidx = ((pi * 2 + pj) * 2 + ti) * 2 + tj
                    acc = acc + jnp.dot(xs_cache[base], w_ref[tidx],
                                        preferred_element_type=jnp.float32)
            o_ref[0, pi * 2 + pj] = acc.astype(o_ref.dtype)


def _upsample2x_kernel(x_ref, o_ref):
    """Pure nearest-2x upsample (use_conv=False): copy x to all 4 parities."""
    x = x_ref[0]                      # (H*W, C)
    for p in range(4):
        o_ref[0, p] = x


def _pixel_unshuffle(out, B, Cout, H, W):
    """(B, 2, 2, H, W, Cout) parity-blocked -> (B, Cout, 2H, 2W)."""
    out = jnp.transpose(out, (0, 5, 3, 1, 4, 2))
    return out.reshape(B, Cout, 2 * H, 2 * W)


def upsample_forward(x, weight=None, bias=None, *, use_conv=True, dims=2,
                     compute_dtype=None):
    """Forward pass of the PyTorch `Upsample` module (dims=2, padding=1).

    x: (B, C, H, W); weight: (Cout, C, 3, 3) (torch layout); bias: (Cout,).
    compute_dtype: optionally jnp.bfloat16 to feed bf16 into the MXU
    (f32 accumulation) on v6e/v7x.
    """
    assert dims == 2, "only the dims=2 path is implemented"
    # TODO(synk): dims=3 branch (D kept, H/W doubled, 3x3x3 Conv3d) and
    # padding != 1 are not implemented in Pallas.
    B, C, H, W = x.shape

    if not use_conv:
        x_flat = jnp.transpose(x, (0, 2, 3, 1)).reshape(B, H * W, C)
        out = pl.pallas_call(
            _upsample2x_kernel,
            out_shape=jax.ShapeDtypeStruct((B, 4, H * W, C), x.dtype),
            grid_spec=pltpu.PrefetchScalarGridSpec(
                num_scalar_prefetch=0,
                grid=(B,),
                in_specs=[pl.BlockSpec((1, H * W, C), lambda i: (i, 0, 0))],
                out_specs=pl.BlockSpec((1, 4, H * W, C),
                                       lambda i: (i, 0, 0, 0)),
            ),
            compiler_params=pltpu.CompilerParams(
                dimension_semantics=("parallel",)),
        )(x_flat)
        out = out.reshape(B, 2, 2, H, W, C)
        return _pixel_unshuffle(out, B, C, H, W)

    Cout = weight.shape[0]
    Wp, M = W + 2, H * (W + 2)

    # Channels-last, zero-pad H/W by 1 (the conv padding), flatten spatial dims
    # so that every conv tap is one contiguous row slice of length M.
    xt = jnp.transpose(x, (0, 2, 3, 1))
    xp = jnp.pad(xt, ((0, 0), (1, 1), (1, 1), (0, 0)))
    x_flat = xp.reshape(B, (H + 2) * Wp, C)
    max_base = 2 * Wp + 2
    nrows = -(-(max(x_flat.shape[1], max_base + M)) // 8) * 8
    x_flat = jnp.pad(x_flat, ((0, 0), (0, nrows - x_flat.shape[1]), (0, 0)))

    # Fold nearest-2x into the conv: for each output parity, 3x3 taps that read
    # the same source pixel are pre-summed into 2x2 effective taps.
    wt = jnp.transpose(weight, (2, 3, 1, 0)).astype(jnp.float32)  # (3,3,C,Cout)
    G = jnp.array([[[1., 0., 0.], [0., 1., 1.]],
                   [[1., 1., 0.], [0., 0., 1.]]], jnp.float32)    # (parity,tap,kpos)
    w_eff = jnp.einsum('pak,qbl,klio->pqabio', G, G, wt).reshape(16, C, Cout)
    b2 = bias.reshape(1, Cout).astype(jnp.float32)

    if compute_dtype is not None:   # bf16-fed MXU path (v6e / v7x)
        x_flat = x_flat.astype(compute_dtype)
        w_eff = w_eff.astype(compute_dtype)

    kernel = functools.partial(_upsample_conv2x_kernel, H=H, W=W, cout=Cout)
    out = pl.pallas_call(
        kernel,
        out_shape=jax.ShapeDtypeStruct((B, 4, M, Cout), x.dtype),
        grid_spec=pltpu.PrefetchScalarGridSpec(
            num_scalar_prefetch=0,
            grid=(B,),
            in_specs=[
                pl.BlockSpec((1, nrows, C), lambda i: (i, 0, 0)),
                pl.BlockSpec((16, C, Cout), lambda i: (0, 0, 0)),
                pl.BlockSpec((1, Cout), lambda i: (0, 0)),
            ],
            out_specs=pl.BlockSpec((1, 4, M, Cout), lambda i: (i, 0, 0, 0)),
        ),
        compiler_params=pltpu.CompilerParams(
            dimension_semantics=("parallel",)),
    )(x_flat, w_eff, b2)

    out = out.reshape(B, 2, 2, H, Wp, Cout)[:, :, :, :, :W, :]
    return _pixel_unshuffle(out, B, Cout, H, W)


def reference_forward(x, weight=None, bias=None, *, use_conv=True):
    """Pure-JAX mirror of the PyTorch forward (dims=2, padding=1)."""
    xu = jnp.repeat(jnp.repeat(x, 2, axis=2), 2, axis=3)   # nearest, scale 2
    if not use_conv:
        return xu
    B, C, H2, W2 = xu.shape
    Cout = weight.shape[0]
    xt = jnp.pad(jnp.transpose(xu, (0, 2, 3, 1)),
                 ((0, 0), (1, 1), (1, 1), (0, 0)))
    wt = jnp.transpose(weight, (2, 3, 1, 0))                # (3,3,C,Cout)
    out = jnp.broadcast_to(bias, (B, H2, W2, Cout)).astype(jnp.float32)
    for kh in range(3):
        for kw in range(3):
            out = out + jnp.einsum('bhwc,co->bhwo',
                                   xt[:, kh:kh + H2, kw:kw + W2, :],
                                   wt[kh, kw])
    return jnp.transpose(out, (0, 3, 1, 2)).astype(x.dtype)


if __name__ == "__main__":
    # Small but lane-dense shapes (channel dims multiples of 128).
    B, C, H, W = 2, 128, 16, 16
    Cout = 128

    key = jax.random.PRNGKey(0)
    kx, kw, kb = jax.random.split(key, 3)
    x = jax.random.normal(kx, (B, C, H, W), jnp.float32)
    weight = jax.random.normal(kw, (Cout, C, 3, 3), jnp.float32) * 0.02
    bias = jax.random.normal(kb, (Cout,), jnp.float32) * 0.02

    # use_conv=True: fused upsample + 3x3 conv, f32 MXU path.
    out = jax.block_until_ready(upsample_forward(x, weight, bias, use_conv=True))
    ref = reference_forward(x, weight, bias, use_conv=True)
    assert out.shape == (B, Cout, 2 * H, 2 * W)
    assert jnp.allclose(out, ref, atol=2e-2, rtol=2e-2), "conv path mismatch"

    # bf16-fed MXU path (v6e/v7x optimization), f32 accumulation.
    out_bf = jax.block_until_ready(
        upsample_forward(x, weight, bias, use_conv=True,
                         compute_dtype=jnp.bfloat16))
    assert jnp.allclose(out_bf, ref, atol=5e-2, rtol=5e-2), "bf16 path mismatch"

    # use_conv=False: pure nearest 2x upsample (bit-exact).
    out_up = jax.block_until_ready(upsample_forward(x, use_conv=False))
    ref_up = reference_forward(x, use_conv=False)
    assert out_up.shape == (B, C, 2 * H, 2 * W)
    assert jnp.allclose(out_up, ref_up), "upsample-only mismatch"

    print("KERNEL_OK")
</pallas_src>

<mosaic_0001>
module attributes {stable_mosaic.version = 11 : i64} {
  func.func @_upsample_conv2x_kernel(%arg0: i32, %arg1: memref<1x328x128xf32, #tpu.memory_space<vmem>>, %arg2: memref<16x128x128xf32, #tpu.memory_space<vmem>>, %arg3: memref<1x128xf32, #tpu.memory_space<vmem>>, %arg4: memref<1x4x288x128xf32, #tpu.memory_space<vmem>>) attributes {dimension_semantics = [#tpu.dimension_semantics<parallel>], iteration_bounds = array<i64: 2>, scalar_prefetch = 0 : i64, scratch_operands = 0 : i64, tpu.core_type = #tpu.core_type<tc>, window_params = [{transform_indices = @transform_0, window_bounds = array<i64: 1, 328, 128>}, {pipeline_mode = #tpu.pipeline_mode<synchronous>, transform_indices = @transform_1, window_bounds = array<i64: 16, 128, 128>}, {pipeline_mode = #tpu.pipeline_mode<synchronous>, transform_indices = @transform_2, window_bounds = array<i64: 1, 128>}, {transform_indices = @transform_3, window_bounds = array<i64: 1, 4, 288, 128>}]} {
    %c0 = arith.constant 0 : index
    %c0_0 = arith.constant 0 : index
    %0 = vector.load %arg3[%c0, %c0_0] : memref<1x128xf32, #tpu.memory_space<vmem>>, vector<1x128xf32>
    %1 = vector.shape_cast %0 : vector<1x128xf32> to vector<1x128xf32>
    %2 = vector.broadcast %1 : vector<1x128xf32> to vector<288x128xf32>
    %c0_1 = arith.constant 0 : index
    %c0_2 = arith.constant 0 : index
    %c0_3 = arith.constant 0 : index
    %3 = vector.load %arg1[%c0_1, %c0_2, %c0_3] : memref<1x328x128xf32, #tpu.memory_space<vmem>>, vector<1x288x128xf32>
    %4 = vector.shape_cast %3 : vector<1x288x128xf32> to vector<288x128xf32>
    %c0_4 = arith.constant 0 : index
    %c0_5 = arith.constant 0 : index
    %c0_6 = arith.constant 0 : index
    %5 = vector.load %arg2[%c0_4, %c0_5, %c0_6] : memref<16x128x128xf32, #tpu.memory_space<vmem>>, vector<1x128x128xf32>
    %6 = vector.shape_cast %5 : vector<1x128x128xf32> to vector<128x128xf32>
    %cst = arith.constant dense<0.000000e+00> : vector<288x128xf32>
    %7 = tpu.matmul %4, %6, %cst {dimension_numbers = #tpu.dot_dimension_numbers<[1], [0], [0], [1], [0, 0, 1, 1], [], []>} : vector<288x128xf32>, vector<128x128xf32>, vector<288x128xf32> -> vector<288x128xf32>
    %8 = arith.addf %2, %7 : vector<288x128xf32>
    %c0_7 = arith.constant 0 : index
    %c1 = arith.constant 1 : index
    %c0_8 = arith.constant 0 : index
    %9 = vector.load %arg1[%c0_7, %c1, %c0_8] : memref<1x328x128xf32, #tpu.memory_space<vmem>>, vector<1x288x128xf32>
    %10 = vector.shape_cast %9 : vector<1x288x128xf32> to vector<288x128xf32>
    %c1_9 = arith.constant 1 : index
    %c0_10 = arith.constant 0 : index
    %c0_11 = arith.constant 0 : index
    %11 = vector.load %arg2[%c1_9, %c0_10, %c0_11] : memref<16x128x128xf32, #tpu.memory_space<vmem>>, vector<1x128x128xf32>
    %12 = vector.shape_cast %11 : vector<1x128x128xf32> to vector<128x128xf32>
    %cst_12 = arith.constant dense<0.000000e+00> : vector<288x128xf32>
    %13 = tpu.matmul %10, %12, %cst_12 {dimension_numbers = #tpu.dot_dimension_numbers<[1], [0], [0], [1], [0, 0, 1, 1], [], []>} : vector<288x128xf32>, vector<128x128xf32>, vector<288x128xf32> -> vector<288x128xf32>
    %14 = arith.addf %8, %13 : vector<288x128xf32>
    %c0_13 = arith.constant 0 : index
    %c18 = arith.constant 18 : index
    %c0_14 = arith.constant 0 : index
    %15 = vector.load %arg1[%c0_13, %c18, %c0_14] : memref<1x328x128xf32, #tpu.memory_space<vmem>>, vector<1x288x128xf32>
    %16 = vector.shape_cast %15 : vector<1x288x128xf32> to vector<288x128xf32>
    %c2 = arith.constant 2 : index
    %c0_15 = arith.constant 0 : index
    %c0_16 = arith.constant 0 : index
    %17 = vector.load %arg2[%c2, %c0_15, %c0_16] : memref<16x128x128xf32, #tpu.memory_space<vmem>>, vector<1x128x128xf32>
    %18 = vector.shape_cast %17 : vector<1x128x128xf32> to vector<128x128xf32>
    %cst_17 = arith.constant dense<0.000000e+00> : vector<288x128xf32>
    %19 = tpu.matmul %16, %18, %cst_17 {dimension_numbers = #tpu.dot_dimension_numbers<[1], [0], [0], [1], [0, 0, 1, 1], [], []>} : vector<288x128xf32>, vector<128x128xf32>, vector<288x128xf32> -> vector<288x128xf32>
    %20 = arith.addf %14, %19 : vector<288x128xf32>
    %c0_18 = arith.constant 0 : index
    %c19 = arith.constant 19 : index
    %c0_19 = arith.constant 0 : index
    %21 = vector.load %arg1[%c0_18, %c19, %c0_19] : memref<1x328x128xf32, #tpu.memory_space<vmem>>, vector<1x288x128xf32>
    %22 = vector.shape_cast %21 : vector<1x288x128xf32> to vector<288x128xf32>
    %c3 = arith.constant 3 : index
    %c0_20 = arith.constant 0 : index
    %c0_21 = arith.constant 0 : index
    %23 = vector.load %arg2[%c3, %c0_20, %c0_21] : memref<16x128x128xf32, #tpu.memory_space<vmem>>, vector<1x128x128xf32>
    %24 = vector.shape_cast %23 : vector<1x128x128xf32> to vector<128x128xf32>
    %cst_22 = arith.constant dense<0.000000e+00> : vector<288x128xf32>
    %25 = tpu.matmul %22, %24, %cst_22 {dimension_numbers = #tpu.dot_dimension_numbers<[1], [0], [0], [1], [0, 0, 1, 1], [], []>} : vector<288x128xf32>, vector<128x128xf32>, vector<288x128xf32> -> vector<288x128xf32>
    %26 = arith.addf %20, %25 : vector<288x128xf32>
    %c0_23 = arith.constant 0 : index
    %c0_24 = arith.constant 0 : index
    %c0_25 = arith.constant 0 : index
    %c0_26 = arith.constant 0 : index
    %27 = vector.load %arg4[%c0_23, %c0_24, %c0_25, %c0_26] : memref<1x4x288x128xf32, #tpu.memory_space<vmem>>, vector<1x1x288x128xf32>
    %28 = vector.shape_cast %27 : vector<1x1x288x128xf32> to vector<288x128xf32>
    %29 = vector.shape_cast %26 : vector<288x128xf32> to vector<1x1x288x128xf32>
    tpu.vector_store %arg4[%c0_23, %c0_24, %c0_25, %c0_26], %29 {strides = array<i32>} : memref<1x4x288x128xf32, #tpu.memory_space<vmem>>, vector<1x1x288x128xf32>,
    %c4 = arith.constant 4 : index
    %c0_27 = arith.constant 0 : index
    %c0_28 = arith.constant 0 : index
    %30 = vector.load %arg2[%c4, %c0_27, %c0_28] : memref<16x128x128xf32, #tpu.memory_space<vmem>>, vector<1x128x128xf32>
    %31 = vector.shape_cast %30 : vector<1x128x128xf32> to vector<128x128xf32>
    %cst_29 = arith.constant dense<0.000000e+00> : vector<288x128xf32>
    %32 = tpu.matmul %10, %31, %cst_29 {dimension_numbers = #tpu.dot_dimension_numbers<[1], [0], [0], [1], [0, 0, 1, 1], [], []>} : vector<288x128xf32>, vector<128x128xf32>, vector<288x128xf32> -> vector<288x128xf32>
    %33 = arith.addf %2, %32 : vector<288x128xf32>
    %c0_30 = arith.constant 0 : index
    %c2_31 = arith.constant 2 : index
    %c0_32 = arith.constant 0 : index
    %34 = vector.load %arg1[%c0_30, %c2_31, %c0_32] : memref<1x328x128xf32, #tpu.memory_space<vmem>>, vector<1x288x128xf32>
    %35 = vector.shape_cast %34 : vector<1x288x128xf32> to vector<288x128xf32>
    %c5 = arith.constant 5 : index
    %c0_33 = arith.constant 0 : index
    %c0_34 = arith.constant 0 : index
    %36 = vector.load %arg2[%c5, %c0_33, %c0_34] : memref<16x128x128xf32, #tpu.memory_space<vmem>>, vector<1x128x128xf32>
    %37 = vector.shape_cast %36 : vector<1x128x128xf32> to vector<128x128xf32>
    %cst_35 = arith.constant dense<0.000000e+00> : vector<288x128xf32>
    %38 = tpu.matmul %35, %37, %cst_35 {dimension_numbers = #tpu.dot_dimension_numbers<[1], [0], [0], [1], [0, 0, 1, 1], [], []>} : vector<288x128xf32>, vector<128x128xf32>, vector<288x128xf32> -> vector<288x128xf32>
    %39 = arith.addf %33, %38 : vector<288x128xf32>
    %c6 = arith.constant 6 : index
    %c0_36 = arith.constant 0 : index
    %c0_37 = arith.constant 0 : index
    %40 = vector.load %arg2[%c6, %c0_36, %c0_37] : memref<16x128x128xf32, #tpu.memory_space<vmem>>, vector<1x128x128xf32>
    %41 = vector.shape_cast %40 : vector<1x128x128xf32> to vector<128x128xf32>
    %cst_38 = arith.constant dense<0.000000e+00> : vector<288x128xf32>
    %42 = tpu.matmul %22, %41, %cst_38 {dimension_numbers = #tpu.dot_dimension_numbers<[1], [0], [0], [1], [0, 0, 1, 1], [], []>} : vector<288x128xf32>, vector<128x128xf32>, vector<288x128xf32> -> vector<288x128xf32>
    %43 = arith.addf %39, %42 : vector<288x128xf32>
    %c0_39 = arith.constant 0 : index
    %c20 = arith.constant 20 : index
    %c0_40 = arith.constant 0 : index
    %44 = vector.load %arg1[%c0_39, %c20, %c0_40] : memref<1x328x128xf32, #tpu.memory_space<vmem>>, vector<1x288x128xf32>
    %45 = vector.shape_cast %44 : vector<1x288x128xf32> to vector<288x128xf32>
    %c7 = arith.constant 7 : index
    %c0_41 = arith.constant 0 : index
    %c0_42 = arith.constant 0 : index
    %46 = vector.load %arg2[%c7, %c0_41, %c0_42] : memref<16x128x128xf32, #tpu.memory_space<vmem>>, vector<1x128x128xf32>
    %47 = vector.shape_cast %46 : vector<1x128x128xf32> to vector<128x128xf32>
    %cst_43 = arith.constant dense<0.000000e+00> : vector<288x128xf32>
    %48 = tpu.matmul %45, %47, %cst_43 {dimension_numbers = #tpu.dot_dimension_numbers<[1], [0], [0], [1], [0, 0, 1, 1], [], []>} : vector<288x128xf32>, vector<128x128xf32>, vector<288x128xf32> -> vector<288x128xf32>
    %49 = arith.addf %43, %48 : vector<288x128xf32>
    %c0_44 = arith.constant 0 : index
    %c1_45 = arith.constant 1 : index
    %c0_46 = arith.constant 0 : index
    %c0_47 = arith.constant 0 : index
    %50 = vector.load %arg4[%c0_44, %c1_45, %c0_46, %c0_47] : memref<1x4x288x128xf32, #tpu.memory_space<vmem>>, vector<1x1x288x128xf32>
    %51 = vector.shape_cast %50 : vector<1x1x288x128xf32> to vector<288x128xf32>
    %52 = vector.shape_cast %49 : vector<288x128xf32> to vector<1x1x288x128xf32>
    tpu.vector_store %arg4[%c0_44, %c1_45, %c0_46, %c0_47], %52 {strides = array<i32>} : memref<1x4x288x128xf32, #tpu.memory_space<vmem>>, vector<1x1x288x128xf32>,
    %c8 = arith.constant 8 : index
    %c0_48 = arith.constant 0 : index
    %c0_49 = arith.constant 0 : index
    %53 = vector.load %arg2[%c8, %c0_48, %c0_49] : memref<16x128x128xf32, #tpu.memory_space<vmem>>, vector<1x128x128xf32>
    %54 = vector.shape_cast %53 : vector<1x128x128xf32> to vector<128x128xf32>
    %cst_50 = arith.constant dense<0.000000e+00> : vector<288x128xf32>
    %55 = tpu.matmul %16, %54, %cst_50 {dimension_numbers = #tpu.dot_dimension_numbers<[1], [0], [0], [1], [0, 0, 1, 1], [], []>} : vector<288x128xf32>, vector<128x128xf32>, vector<288x128xf32> -> vector<288x128xf32>
    %56 = arith.addf %2, %55 : vector<288x128xf32>
    %c9 = arith.constant 9 : index
    %c0_51 = arith.constant 0 : index
    %c0_52 = arith.constant 0 : index
    %57 = vector.load %arg2[%c9, %c0_51, %c0_52] : memref<16x128x128xf32, #tpu.memory_space<vmem>>, vector<1x128x128xf32>
    %58 = vector.shape_cast %57 : vector<1x128x128xf32> to vector<128x128xf32>
    %cst_53 = arith.constant dense<0.000000e+00> : vector<288x128xf32>
    %59 = tpu.matmul %22, %58, %cst_53 {dimension_numbers = #tpu.dot_dimension_numbers<[1], [0], [0], [1], [0, 0, 1, 1], [], []>} : vector<288x128xf32>, vector<128x128xf32>, vector<288x128xf32> -> vector<288x128xf32>
    %60 = arith.addf %56, %59 : vector<288x128xf32>
    %c0_54 = arith.constant 0 : index
    %c36 = arith.constant 36 : index
    %c0_55 = arith.constant 0 : index
    %61 = vector.load %arg1[%c0_54, %c36, %c0_55] : memref<1x328x128xf32, #tpu.memory_space<vmem>>, vector<1x288x128xf32>
    %62 = vector.shape_cast %61 : vector<1x288x128xf32> to vector<288x128xf32>
    %c10 = arith.constant 10 : index
    %c0_56 = arith.constant 0 : index
    %c0_57 = arith.constant 0 : index
    %63 = vector.load %arg2[%c10, %c0_56, %c0_57] : memref<16x128x128xf32, #tpu.memory_space<vmem>>, vector<1x128x128xf32>
    %64 = vector.shape_cast %63 : vector<1x128x128xf32> to vector<128x128xf32>
    %cst_58 = arith.constant dense<0.000000e+00> : vector<288x128xf32>
    %65 = tpu.matmul %62, %64, %cst_58 {dimension_numbers = #tpu.dot_dimension_numbers<[1], [0], [0], [1], [0, 0, 1, 1], [], []>} : vector<288x128xf32>, vector<128x128xf32>, vector<288x128xf32> -> vector<288x128xf32>
    %66 = arith.addf %60, %65 : vector<288x128xf32>
    %c0_59 = arith.constant 0 : index
    %c37 = arith.constant 37 : index
    %c0_60 = arith.constant 0 : index
    %67 = vector.load %arg1[%c0_59, %c37, %c0_60] : memref<1x328x128xf32, #tpu.memory_space<vmem>>, vector<1x288x128xf32>
    %68 = vector.shape_cast %67 : vector<1x288x128xf32> to vector<288x128xf32>
    %c11 = arith.constant 11 : index
    %c0_61 = arith.constant 0 : index
    %c0_62 = arith.constant 0 : index
    %69 = vector.load %arg2[%c11, %c0_61, %c0_62] : memref<16x128x128xf32, #tpu.memory_space<vmem>>, vector<1x128x128xf32>
    %70 = vector.shape_cast %69 : vector<1x128x128xf32> to vector<128x128xf32>
    %cst_63 = arith.constant dense<0.000000e+00> : vector<288x128xf32>
    %71 = tpu.matmul %68, %70, %cst_63 {dimension_numbers = #tpu.dot_dimension_numbers<[1], [0], [0], [1], [0, 0, 1, 1], [], []>} : vector<288x128xf32>, vector<128x128xf32>, vector<288x128xf32> -> vector<288x128xf32>
    %72 = arith.addf %66, %71 : vector<288x128xf32>
    %c0_64 = arith.constant 0 : index
    %c2_65 = arith.constant 2 : index
    %c0_66 = arith.constant 0 : index
    %c0_67 = arith.constant 0 : index
    %73 = vector.load %arg4[%c0_64, %c2_65, %c0_66, %c0_67] : memref<1x4x288x128xf32, #tpu.memory_space<vmem>>, vector<1x1x288x128xf32>
    %74 = vector.shape_cast %73 : vector<1x1x288x128xf32> to vector<288x128xf32>
    %75 = vector.shape_cast %72 : vector<288x128xf32> to vector<1x1x288x128xf32>
    tpu.vector_store %arg4[%c0_64, %c2_65, %c0_66, %c0_67], %75 {strides = array<i32>} : memref<1x4x288x128xf32, #tpu.memory_space<vmem>>, vector<1x1x288x128xf32>,
    %c12 = arith.constant 12 : index
    %c0_68 = arith.constant 0 : index
    %c0_69 = arith.constant 0 : index
    %76 = vector.load %arg2[%c12, %c0_68, %c0_69] : memref<16x128x128xf32, #tpu.memory_space<vmem>>, vector<1x128x128xf32>
    %77 = vector.shape_cast %76 : vector<1x128x128xf32> to vector<128x128xf32>
    %cst_70 = arith.constant dense<0.000000e+00> : vector<288x128xf32>
    %78 = tpu.matmul %22, %77, %cst_70 {dimension_numbers = #tpu.dot_dimension_numbers<[1], [0], [0], [1], [0, 0, 1, 1], [], []>} : vector<288x128xf32>, vector<128x128xf32>, vector<288x128xf32> -> vector<288x128xf32>
    %79 = arith.addf %2, %78 : vector<288x128xf32>
    %c13 = arith.constant 13 : index
    %c0_71 = arith.constant 0 : index
    %c0_72 = arith.constant 0 : index
    %80 = vector.load %arg2[%c13, %c0_71, %c0_72] : memref<16x128x128xf32, #tpu.memory_space<vmem>>, vector<1x128x128xf32>
    %81 = vector.shape_cast %80 : vector<1x128x128xf32> to vector<128x128xf32>
    %cst_73 = arith.constant dense<0.000000e+00> : vector<288x128xf32>
    %82 = tpu.matmul %45, %81, %cst_73 {dimension_numbers = #tpu.dot_dimension_numbers<[1], [0], [0], [1], [0, 0, 1, 1], [], []>} : vector<288x128xf32>, vector<128x128xf32>, vector<288x128xf32> -> vector<288x128xf32>
    %83 = arith.addf %79, %82 : vector<288x128xf32>
    %c14 = arith.constant 14 : index
    %c0_74 = arith.constant 0 : index
    %c0_75 = arith.constant 0 : index
    %84 = vector.load %arg2[%c14, %c0_74, %c0_75] : memref<16x128x128xf32, #tpu.memory_space<vmem>>, vector<1x128x128xf32>
    %85 = vector.shape_cast %84 : vector<1x128x128xf32> to vector<128x128xf32>
    %cst_76 = arith.constant dense<0.000000e+00> : vector<288x128xf32>
    %86 = tpu.matmul %68, %85, %cst_76 {dimension_numbers = #tpu.dot_dimension_numbers<[1], [0], [0], [1], [0, 0, 1, 1], [], []>} : vector<288x128xf32>, vector<128x128xf32>, vector<288x128xf32> -> vector<288x128xf32>
    %87 = arith.addf %83, %86 : vector<288x128xf32>
    %c0_77 = arith.constant 0 : index
    %c38 = arith.constant 38 : index
    %c0_78 = arith.constant 0 : index
    %88 = vector.load %arg1[%c0_77, %c38, %c0_78] : memref<1x328x128xf32, #tpu.memory_space<vmem>>, vector<1x288x128xf32>
    %89 = vector.shape_cast %88 : vector<1x288x128xf32> to vector<288x128xf32>
    %c15 = arith.constant 15 : index
    %c0_79 = arith.constant 0 : index
    %c0_80 = arith.constant 0 : index
    %90 = vector.load %arg2[%c15, %c0_79, %c0_80] : memref<16x128x128xf32, #tpu.memory_space<vmem>>, vector<1x128x128xf32>
    %91 = vector.shape_cast %90 : vector<1x128x128xf32> to vector<128x128xf32>
    %cst_81 = arith.constant dense<0.000000e+00> : vector<288x128xf32>
    %92 = tpu.matmul %89, %91, %cst_81 {dimension_numbers = #tpu.dot_dimension_numbers<[1], [0], [0], [1], [0, 0, 1, 1], [], []>} : vector<288x128xf32>, vector<128x128xf32>, vector<288x128xf32> -> vector<288x128xf32>
    %93 = arith.addf %87, %92 : vector<288x128xf32>
    %c0_82 = arith.constant 0 : index
    %c3_83 = arith.constant 3 : index
    %c0_84 = arith.constant 0 : index
    %c0_85 = arith.constant 0 : index
    %94 = vector.load %arg4[%c0_82, %c3_83, %c0_84, %c0_85] : memref<1x4x288x128xf32, #tpu.memory_space<vmem>>, vector<1x1x288x128xf32>
    %95 = vector.shape_cast %94 : vector<1x1x288x128xf32> to vector<288x128xf32>
    %96 = vector.shape_cast %93 : vector<288x128xf32> to vector<1x1x288x128xf32>
    tpu.vector_store %arg4[%c0_82, %c3_83, %c0_84, %c0_85], %96 {strides = array<i32>} : memref<1x4x288x128xf32, #tpu.memory_space<vmem>>, vector<1x1x288x128xf32>,
    return
  }
  func.func @transform_0(%arg0: i32) -> (i32, i32, i32) {
    %c0_i32 = arith.constant 0 : i32
    %c0_i32_0 = arith.constant 0 : i32
    %c0_i32_1 = arith.constant 0 : i32
    return %arg0, %c0_i32, %c0_i32_0 : i32, i32, i32
  }
  func.func @transform_1(%arg0: i32) -> (i32, i32, i32) {
    %c0_i32 = arith.constant 0 : i32
    %c0_i32_0 = arith.constant 0 : i32
    %c0_i32_1 = arith.constant 0 : i32
    %c0_i32_2 = arith.constant 0 : i32
    return %c0_i32, %c0_i32_0, %c0_i32_1 : i32, i32, i32
  }
  func.func @transform_2(%arg0: i32) -> (i32, i32) {
    %c0_i32 = arith.constant 0 : i32
    %c0_i32_0 = arith.constant 0 : i32
    %c0_i32_1 = arith.constant 0 : i32
    return %c0_i32, %c0_i32_0 : i32, i32
  }
  func.func @transform_3(%arg0: i32) -> (i32, i32, i32, i32) {
    %c0_i32 = arith.constant 0 : i32
    %c0_i32_0 = arith.constant 0 : i32
    %c0_i32_1 = arith.constant 0 : i32
    %c0_i32_2 = arith.constant 0 : i32
    return %arg0, %c0_i32, %c0_i32_0, %c0_i32_1 : i32, i32, i32, i32
  }
}

</mosaic_0001>

<bundles_post_ra>
// kernel: tpu_custom_call.1
= control target key start
LH: loop header
LB: loop body
LE: loop exit
PB: predicated region body
PF: predicated region fallthrough
CT: control target
= control target key end

     0   :  { %8 = vsyncpa [#allocation3], 0  ;;  %s5342_s0 = inlined_call_operand.hbm [shape: f32[2,328,128], index: 0, kind: input, shape index: {}]   ;;  %s5343_s1 = inlined_call_operand.hbm [shape: f32[16,128,128], index: 1, kind: input, shape index: {}]   ;;  %s5344_s2 = inlined_call_operand.hbm [shape: f32[1,128], index: 2, kind: input, shape index: {}]   ;;  %s5345_s3 = inlined_call_operand.hbm [shape: f32[2,4,288,128], index: 3, kind: output, shape index: {}]  }
   0x1   :  { %10 = vsyncpa [#allocation3 + $0x1], 0 }
   0x2   :  { %11 = vsyncpa [#allocation6], 0 }
   0x3   :  { %12 = vsyncpa [#allocation4], 0 }
   0x4   :  { %14 = vsyncpa [#allocation4 + $0x1], 0  ;;  %s4282_s12 = smov 0   ;;  %s4284_s13 = smov 0  }
   0x5   :  { %s4286_s14 = smov 0   ;;  %s4288_s15 = smov 0  }
   0x6 LB: > { %s4303_s16 = sadd.s32 4294967295, %s4254_s15   ;;  %s3652_s17 = sadd.s32 4294967294, %s4254_s15   ;;  %s4254_s15 = sphi %s4288_s15, %s5357_s15   ;;  %s4250_s14 = sphi %s4286_s14, %s5356_s14   ;;  %s4246_s13 = sphi %s4284_s13, %s5355_s13   ;;  %s4242_s12 = sphi %s4282_s12, %s5354_s12  }
   0x7   : > { %p40_p0 = scmp.ne.s32.totalorder %s4246_s13, %s4242_s12  ;;  %p41_p1 = scmp.eq.s32.totalorder %s4303_s16, 0 }
   0x8   : > { %p106_p2 = scmp.eq.s32.totalorder %s4303_s16, 1  ;;  %p112_p3 = scmp.eq.s32.totalorder %s3652_s17, 1 }
   0x9   : > { %p4312_p4 = por %p41_p1, %p40_p0  ;;  %p3653_p5 = scmp.ge.s32.totalorder %s4254_s15, 1 }
   0xa   : > { %p4317_p6 = por %p112_p3, %p40_p0  ;;  %p119_p7 = scmp.lt.s32.totalorder %s4254_s15, 3 }
   0xb   : > { %s130_s22 = sshll.u32 %s5343_s1, 4  ;;  %s4256_s24 = smov [#allocation5]   ;;  %s131_s22 = int_to_ptr.hbm [resolvable:$true] %s130_s22 }
   0xc   : > { %p4325_p8 = pnand %p3653_p5, %p119_p7  ;;  %s132_s25 = sshll.u32 %s4256_s24, 4  ;;  %s133_s25 = int_to_ptr.vmem [resolvable:$true] %s132_s25 }
   0xd   : > { %s145_s28 = sshll.u32 %s5344_s2, 4  ;;  %s5346_s29 = smov 128   ;;  %s146_s28 = int_to_ptr.hbm [resolvable:$true] %s145_s28 }
   0xe   : > { %p3789_p9 = pneg %p4325_p8  ;;  %s4258_s30 = smov 8  }
   0xf   : > { %s4259_s4 = smov [#allocation7]   ;;  %s4341_s6 = sadd.s32 1, %s4254_s15  }
  0x10   : > { %p3790_p10 = pnand %p3789_p9, %p41_p1  ;;  %s147_s5 = sshll.u32 %s4259_s4, 4  ;;  %s148_s5 = int_to_ptr.vmem [resolvable:$true] %s147_s5 }
  0x11   : > { %s27_s7 = sadd.s32 1, %s4250_s14  ;;  %s24_s8 = ssub.s32 %s4254_s15, %s4341_s6 }
  0x12   : > { %3792 = dma.hbm_to_vmem [thread:$0]  (!%p3790_p10), %s131_s22, 32768, %s133_s25, [#allocation6], %s5346_s29, %s5346_s29, %s4258_s30  }
  0x13   : > { %3795 = dma.hbm_to_vmem [thread:$0]  (!%p3790_p10), %s146_s28, 16, %s148_s5, [#allocation6]  }
  0x14   : > { %p34_p12 = scmp.ne.s32.totalorder %s4250_s14, %s4246_s13  ;;  %p25_p13 = scmp.eq.s32.totalorder %s24_s8, 0 }
  0x15   : > { %p35_p0 = scmp.eq.s32.totalorder %s4254_s15, 0  ;;  %p3806_p5 = scmp.lt.s32.totalorder %s4254_s15, 2 }
  0x16   : > { %p4351_p3 = por %p106_p2, %p34_p12  ;;  %s158_s11 = sand.u32 1, %s4250_s14  }
  0x17   : > { %s4357_s10 = scalar_select %p25_p13, %s4250_s14, %s27_s7  }
  0x18   : > { %p36_p7 = por %p35_p0, %p34_p12  ;;  %s3772_s17 = smul.u32 328, %s158_s11 }
  0x19   : > { %s3773_s20 = smul.u32 328, %s4254_s15  ;;  %s159_s4 = scalar_lea.sflag [#allocation3], %s158_s11 }
  0x1a   : > { %p4361_p9 = pnand %p3806_p5, %p36_p7  ;;  %s162_s26 = scalar_lea.vmem [#allocation2], %s3772_s17 }
  0x1b   : > { %s167_s25 = scalar_lea.hbm %s5342_s0, %s3773_s20  ;;  %s170_s27 = sshll.u32 %s162_s26, 4  ;;  %s171_s27 = int_to_ptr.vmem [resolvable:$true] %s170_s27 }
  0x1c   : > { %s168_s28 = sshll.u32 %s167_s25, 4  ;;  %p4158_p10 = pneg %p4361_p9  ;;  %s169_s28 = int_to_ptr.hbm [resolvable:$true] %s168_s28 }
  0x1d   : > { %s4154_s5 = sshra.s32 %s169_s28, 4  ;;  %s4161_s22 = scalar_lea.hbm %s5342_s0, 656  ;;  %s4155_s5 = int_to_ptr.hbm [resolvable:$true] %s4154_s5 }
  0x1e   : > { %s4156_s7 = scalar_lea.hbm %s4155_s5, 328  ;;  %p4162_p0 = scmp.lt.s32.totalorder %s4155_s5, %s5342_s0 }
  0x1f   : > { %p4157_p2 = scmp.ne.s32.totalorder %s4155_s5, %s4156_s7  ;;  %p4163_p5 = scmp.lt.s32.totalorder %s4161_s22, %s4156_s7 }
  0x21   : > { %p4159_p12 = pnand %p4158_p10, %p4157_p2  ;;  %p4164_p7 = por %p4163_p5, %p4162_p0 }
  0x23   : > { %p4160_p13 = pneg %p4159_p12 }
  0x25   : > { %p4165_p11 = pnand %p4164_p7, %p4160_p13 }
  0x27   : > { %4168 = shalt.err (!%p4165_p11)
}
  0x28   : > { %s5352_s11 = smov 128   ;;  %182 = sbr.rel (%p4325_p8) target bundleno = 1366 (0x556), region = 32 }
  0x29   : > { %3799 = dma.hbm_to_vmem [thread:$0]  (!%p4361_p9), %s169_s28, 5248, %s171_s27, %s159_s4, %s5352_s11, %s5352_s11, %s4258_s30  }
  0x2a   : > { %s4384_s29 = sand.u32 (!%p4325_p8), 1, %s4246_s13  }
  0x2b   : > { %s3774_s17 = smul.u32 (!%p4325_p8), 328, %s4384_s29  ;;  %s185_s25 = scalar_lea.sflag (!%p4325_p8), [#allocation3], %s4384_s29 }
  0x2d   : > { %s4388_s26 = scalar_lea.vmem [#allocation2], %s3774_s17 }
  0x2e   : > { %4229 = dma.done.wait (%p4312_p4), %s185_s25, 5248  }
  0x2f   : > { %4231 = vsyncadd (%p4312_p4), %s185_s25, 4294962048 }
  0x30   : > { %4233 = dma.done.wait (%p41_p1), [#allocation6], 32784  }
  0x31   : > { %4235 = vsyncadd (%p41_p1), [#allocation6], 4294934512  ;;  %v705_v0 = vld [vmem:[#allocation5 + $0x178] sm:$0xff]  ;;  %v704_v2 = vld [vmem:[#allocation5 + $0x170] sm:$0xff]  ;;  %s3775_s18 = smul.u32 1152, %s4384_s29  ;;  %s4204_s20 = scalar_lea.hbm %s5345_s3, 2304 }
  0x32   : > { %v277_v1 = vld [vmem:[#allocation5 + $0x78] sm:$0xff]  ;;  %706 = vmatpush.msra.mxu2 %v705_v0  ;;  %v276_v4 = vld [vmem:[#allocation5 + $0x70] sm:$0xff]  ;;  %v703_v6 = vld [vmem:[#allocation5 + $0x168] sm:$0xff]  ;;  %s3776_s30 = smul.u32 1152, %s4303_s16  ;;  %s3545_s16 = scalar_lea.sflag [#allocation4], %s4384_s29 }
  0x33   : > { %278 = vmatpush.msra.mxu0 %v277_v1  ;;  %v919_v3 = vld [vmem:[#allocation5 + $0x1f8] sm:$0xff]  ;;  %v918_v7 = vld [vmem:[#allocation5 + $0x1f0] sm:$0xff]  ;;  %v275_v8 = vld [vmem:[#allocation5 + $0x68] sm:$0xff]  ;;  %s4474_s23 = scalar_lea.vmem [#allocation8], %s3775_s18 }
  0x34   : > { %v491_v5 = vld [vmem:[#allocation5 + $0xf8] sm:$0xff]  ;;  %920 = vmatpush.msra.mxu3 %v919_v3  ;;  %707 = vmatpush.msra.mxu2 %v704_v2  ;;  %v490_v9 = vld [vmem:[#allocation5 + $0xf0] sm:$0xff]  ;;  %v917_v10 = vld [vmem:[#allocation5 + $0x1e8] sm:$0xff]  ;;  %s3556_s28 = scalar_lea.hbm %s5345_s3, %s3776_s30  ;;  %s3557_s4 = sshll.u32 %s4474_s23, 4  ;;  %s3558_s4 = int_to_ptr.vmem [resolvable:$true] %s3557_s4 }
  0x35   : > { %492 = vmatpush.msra.mxu1 %v491_v5  ;;  %279 = vmatpush.msra.mxu0 %v276_v4  ;;  %v702_v11 = vld [vmem:[#allocation5 + $0x160] sm:$0xff]  ;;  %v489_v13 = vld [vmem:[#allocation5 + $0xe8] sm:$0xff]  ;;  %v701_v16 = vld [vmem:[#allocation5 + $0x158] sm:$0xff]  ;;  %s3559_s5 = sshll.u32 %s3556_s28, 4  ;;  %s3560_s5 = int_to_ptr.hbm [resolvable:$true] %s3559_s5 }
  0x36   : > { %921 = vmatpush.msra.mxu3 %v918_v7  ;;  %v274_v12 = vld [vmem:[#allocation5 + $0x60] sm:$0xff]  ;;  %708 = vmatpush.msra.mxu2 %v703_v6  ;;  %v273_v17 = vld [vmem:[#allocation5 + $0x58] sm:$0xff]  ;;  %v700_v20 = vld [vmem:[#allocation5 + $0x150] sm:$0xff]  ;;  %s4198_s7 = sshra.s32 %s3560_s5, 4  ;;  %s4199_s7 = int_to_ptr.hbm [resolvable:$true] %s4198_s7 }
  0x37   : > { %493 = vmatpush.msra.mxu1 %v490_v9  ;;  %280 = vmatpush.msra.mxu0 %v275_v8  ;;  %v916_v14 = vld [vmem:[#allocation5 + $0x1e0] sm:$0xff]  ;;  %v915_v18 = vld [vmem:[#allocation5 + $0x1d8] sm:$0xff]  ;;  %v272_v21 = vld [vmem:[#allocation5 + $0x50] sm:$0xff]  ;;  %s4200_s8 = scalar_lea.hbm %s4199_s7, 1152  ;;  %p4205_p11 = scmp.lt.s32.totalorder %s4199_s7, %s5345_s3 }
  0x38   : > { %v488_v15 = vld [vmem:[#allocation5 + $0xe0] sm:$0xff]  ;;  %922 = vmatpush.msra.mxu3 %v917_v10  ;;  %709 = vmatpush.msra.mxu2 %v702_v11  ;;  %v487_v19 = vld [vmem:[#allocation5 + $0xd8] sm:$0xff]  ;;  %v914_v22 = vld [vmem:[#allocation5 + $0x1d0] sm:$0xff]  ;;  %p4201_p1 = scmp.ne.s32.totalorder %s4199_s7, %s4200_s8  ;;  %p4206_p9 = scmp.lt.s32.totalorder %s4204_s20, %s4200_s8 }
  0x39   : > { %494 = vmatpush.msra.mxu1 %v489_v13  ;;  %281 = vmatpush.msra.mxu0 %v274_v12  ;;  %v486_v23 = vld [vmem:[#allocation5 + $0xd0] sm:$0xff]  ;;  %v699_v24 = vld [vmem:[#allocation5 + $0x148] sm:$0xff]  ;;  %v698_v28 = vld [vmem:[#allocation5 + $0x140] sm:$0xff] }
  0x3a   : > { %923 = vmatpush.msra.mxu3 %v916_v14  ;;  %710 = vmatpush.msra.mxu2 %v701_v16  ;;  %v271_v25 = vld [vmem:[#allocation5 + $0x48] sm:$0xff]  ;;  %v270_v29 = vld [vmem:[#allocation5 + $0x40] sm:$0xff]  ;;  %v697_v32 = vld [vmem:[#allocation5 + $0x138] sm:$0xff]  ;;  %p4202_p4 = pnand %p4201_p1, %p4351_p3  ;;  %p4207_p2 = por %p4206_p9, %p4205_p11 }
  0x3b   : > { %495 = vmatpush.msra.mxu1 %v488_v15  ;;  %282 = vmatpush.msra.mxu0 %v273_v17  ;;  %v913_v26 = vld [vmem:[#allocation5 + $0x1c8] sm:$0xff]  ;;  %v912_v30 = vld [vmem:[#allocation5 + $0x1c0] sm:$0xff]  ;;  %v269_v33 = vld [vmem:[#allocation5 + $0x38] sm:$0xff] }
  0x3c   : > { %924 = vmatpush.msra.mxu3 %v915_v18  ;;  %711 = vmatpush.msra.mxu2 %v700_v20  ;;  %v485_v27 = vld [vmem:[#allocation5 + $0xc8] sm:$0xff]  ;;  %v484_v31 = vld [vmem:[#allocation5 + $0xc0] sm:$0xff]  ;;  %v911_v34 = vld [vmem:[#allocation5 + $0x1b8] sm:$0xff]  ;;  %p4203_p8 = pneg %p4202_p4 }
  0x3d   : > { %496 = vmatpush.msra.mxu1 %v487_v19  ;;  %283 = vmatpush.msra.mxu0 %v272_v21  ;;  %v483_v35 = vld [vmem:[#allocation5 + $0xb8] sm:$0xff]  ;;  %v696_v36 = vld [vmem:[#allocation5 + $0x130] sm:$0xff]  ;;  %v695_v40 = vld [vmem:[#allocation5 + $0x128] sm:$0xff] }
  0x3e   : > { %925 = vmatpush.msra.mxu3 %v914_v22  ;;  %712 = vmatpush.msra.mxu2 %v699_v24  ;;  %v268_v37 = vld [vmem:[#allocation5 + $0x30] sm:$0xff]  ;;  %v267_v41 = vld [vmem:[#allocation5 + $0x28] sm:$0xff]  ;;  %v694_v44 = vld [vmem:[#allocation5 + $0x120] sm:$0xff]  ;;  %p4208_p10 = pnand %p4207_p2, %p4203_p8 }
  0x3f   : > { %497 = vmatpush.msra.mxu1 %v486_v23  ;;  %284 = vmatpush.msra.mxu0 %v271_v25  ;;  %v910_v38 = vld [vmem:[#allocation5 + $0x1b0] sm:$0xff]  ;;  %v909_v42 = vld [vmem:[#allocation5 + $0x1a8] sm:$0xff]  ;;  %v266_v45 = vld [vmem:[#allocation5 + $0x20] sm:$0xff] }
  0x40   : > { %926 = vmatpush.msra.mxu3 %v913_v26  ;;  %713 = vmatpush.msra.mxu2 %v698_v28  ;;  %v482_v39 = vld [vmem:[#allocation5 + $0xb0] sm:$0xff]  ;;  %v481_v43 = vld [vmem:[#allocation5 + $0xa8] sm:$0xff]  ;;  %v908_v46 = vld [vmem:[#allocation5 + $0x1a0] sm:$0xff] }
  0x41   : > { %498 = vmatpush.msra.mxu1 %v485_v27  ;;  %285 = vmatpush.msra.mxu0 %v270_v29  ;;  %v480_v47 = vld [vmem:[#allocation5 + $0xa0] sm:$0xff]  ;;  %v693_v48 = vld [vmem:[#allocation5 + $0x118] sm:$0xff]  ;;  %v692_v52 = vld [vmem:[#allocation5 + $0x110] sm:$0xff] }
  0x42   : > { %927 = vmatpush.msra.mxu3 %v912_v30  ;;  %714 = vmatpush.msra.mxu2 %v697_v32  ;;  %v265_v49 = vld [vmem:[#allocation5 + $0x18] sm:$0xff]  ;;  %v264_v53 = vld [vmem:[#allocation5 + $0x10] sm:$0xff]  ;;  %v691_v56 = vld [vmem:[#allocation5 + $0x108] sm:$0xff] }
  0x43   : > { %499 = vmatpush.msra.mxu1 %v484_v31  ;;  %286 = vmatpush.msra.mxu0 %v269_v33  ;;  %v907_v50 = vld [vmem:[#allocation5 + $0x198] sm:$0xff]  ;;  %v906_v54 = vld [vmem:[#allocation5 + $0x190] sm:$0xff]  ;;  %v263_v57 = vld [vmem:[#allocation5 + $0x8] sm:$0xff] }
  0x44   : > { %928 = vmatpush.msra.mxu3 %v911_v34  ;;  %715 = vmatpush.msra.mxu2 %v696_v36  ;;  %v479_v51 = vld [vmem:[#allocation5 + $0x98] sm:$0xff]  ;;  %v478_v55 = vld [vmem:[#allocation5 + $0x90] sm:$0xff]  ;;  %v905_v58 = vld [vmem:[#allocation5 + $0x188] sm:$0xff] }
  0x45   : > { %500 = vmatpush.msra.mxu1 %v483_v35  ;;  %287 = vmatpush.msra.mxu0 %v268_v37  ;;  %v477_v59 = vld [vmem:[#allocation5 + $0x88] sm:$0xff]  ;;  %v690_v60 = vld [vmem:[#allocation5 + $0x100] sm:$0xff]  ;;  %v1525_v0 = vld [vmem:[#allocation5 + $0x378] sm:$0xff] }
  0x46   : > { %929 = vmatpush.msra.mxu3 %v910_v38  ;;  %716 = vmatpush.msra.mxu2 %v695_v40  ;;  %v262_v61 = vld [vmem:[#allocation5] sm:$0xff]  ;;  %v226_v1 = vld [vmem:[%s4388_s26] sm:$0xff]  ;;  %v1523_v12 = vld [vmem:[#allocation5 + $0x368] sm:$0xff] }
  0x47   : > { %501 = vmatpush.msra.mxu1 %v482_v39  ;;  %288 = vmatpush.msra.mxu0 %v267_v41  ;;  %v653_v62 = vld [vmem:[%s4388_s26 + $0x12] sm:$0xff]  ;;  %v1133_v3 = vld [vmem:[#allocation5 + $0x278] sm:$0xff] }
  0x48   : > { %930 = vmatpush.msra.mxu3 %v909_v42  ;;  %717 = vmatpush.msra.mxu2 %v694_v44  ;;  %v904_v63 = vld [vmem:[#allocation5 + $0x180] sm:$0xff]  ;;  %v1739_v4 = vld [vmem:[#allocation5 + $0x3f8] sm:$0xff]  ;;  %v1524_v7 = vld [vmem:[#allocation5 + $0x370] sm:$0xff] }
  0x49   : > { %502 = vmatpush.msra.mxu1 %v481_v43  ;;  %289 = vmatpush.msra.mxu0 %v266_v45  ;;  %v867_v2 = vld [vmem:[%s4388_s26 + $0x13] sm:$0xff]  ;;  %v439_v6 = vld [vmem:[%s4388_s26 + $0x1] sm:$0xff]  ;;  %v440_v19 = vld [vmem:[%s4388_s26 + $0x9] sm:$0xff] }
  0x4a   : > { %931 = vmatpush.msra.mxu3 %v908_v46  ;;  %718 = vmatpush.msra.mxu2 %v693_v48  ;;  %v476_v5 = vld [vmem:[#allocation5 + $0x80] sm:$0xff]  ;;  %v1347_v8 = vld [vmem:[#allocation5 + $0x2f8] sm:$0xff]  ;;  %v1132_v9 = vld [vmem:[#allocation5 + $0x270] sm:$0xff] }
  0x4b   : > { %503 = vmatpush.msra.mxu1 %v480_v47  ;;  %290 = vmatpush.msra.mxu0 %v265_v49  ;;  %v1738_v10 = vld [vmem:[#allocation5 + $0x3f0] sm:$0xff]  ;;  %v1131_v13 = vld [vmem:[#allocation5 + $0x268] sm:$0xff]  ;;  %v227_v16 = vld [vmem:[%s4388_s26 + $0x8] sm:$0xff] }
  0x4c   : > { %932 = vmatpush.msra.mxu3 %v907_v50  ;;  %719 = vmatpush.msra.mxu2 %v692_v52  ;;  %v1346_v11 = vld [vmem:[#allocation5 + $0x2f0] sm:$0xff]  ;;  %v1737_v15 = vld [vmem:[#allocation5 + $0x3e8] sm:$0xff]  ;;  %v1522_v24 = vld [vmem:[#allocation5 + $0x360] sm:$0xff] }
  0x4d   : > { %504 = vmatpush.msra.mxu1 %v479_v51  ;;  %291 = vmatpush.msra.mxu0 %v264_v53  ;;  %v654_v14 = vld [vmem:[%s4388_s26 + $0x1a] sm:$0xff]  ;;  %v655_v20 = vld [vmem:[%s4388_s26 + $0x22] sm:$0xff]  ;;  %v228_v21 = vld [vmem:[%s4388_s26 + $0x10] sm:$0xff] }
  0x4e   : > { %933 = vmatpush.msra.mxu3 %v906_v54  ;;  %720 = vmatpush.msra.mxu2 %v691_v56  ;;  %v868_v17 = vld [vmem:[%s4388_s26 + $0x1b] sm:$0xff]  ;;  %v869_v22 = vld [vmem:[%s4388_s26 + $0x23] sm:$0xff]  ;;  %v441_v23 = vld [vmem:[%s4388_s26 + $0x11] sm:$0xff] }
  0x4f   : > { %505 = vmatpush.msra.mxu1 %v478_v55  ;;  %292 = vmatpush.msra.mxu0 %v263_v57  ;;  %v1345_v18 = vld [vmem:[#allocation5 + $0x2e8] sm:$0xff]  ;;  %v1130_v28 = vld [vmem:[#allocation5 + $0x260] sm:$0xff]  ;;  %v230_v33 = vld [vmem:[%s4388_s26 + $0x20] sm:$0xff] }
  0x50   : > { %934 = vmatpush.msra.mxu3 %v905_v58  ;;  %721 = vmatpush.msra.mxu2 %v690_v60  ;;  %v656_v25 = vld [vmem:[%s4388_s26 + $0x2a] sm:$0xff]  ;;  %v229_v26 = vld [vmem:[%s4388_s26 + $0x18] sm:$0xff]  ;;  %v443_v35 = vld [vmem:[%s4388_s26 + $0x21] sm:$0xff] }
  0x51   : > { %506 = vmatpush.msra.mxu1 %v477_v59  ;;  %293 = vmatpush.msra.mxu0 %v262_v61  ;;  %v870_v27 = vld [vmem:[%s4388_s26 + $0x2b] sm:$0xff]  ;;  %v442_v30 = vld [vmem:[%s4388_s26 + $0x19] sm:$0xff]  ;;  %v659_v44 = vld [vmem:[%s4388_s26 + $0x42] sm:$0xff] }
  0x52   : > { %722 = vmatmul.f32.vlgmr.msra.gmra.mxu2 %v653_v62  ;;  %935 = vmatpush.msra.mxu3 %v904_v63  ;;  %v1736_v29 = vld [vmem:[#allocation5 + $0x3e0] sm:$0xff]  ;;  %v658_v36 = vld [vmem:[%s4388_s26 + $0x3a] sm:$0xff] }
  0x53   : > { %1526 = vmatpush.msrb.mxu2 %v1525_v0  ;;  %294 = vmatmul.f32.vlgmr.msra.gmra.mxu0 %v226_v1  ;;  %v1344_v31 = vld [vmem:[#allocation5 + $0x2e0] sm:$0xff]  ;;  %v872_v38 = vld [vmem:[%s4388_s26 + $0x3b] sm:$0xff] }
  0x54   : > { %936 = vmatmul.f32.vlgmr.msra.gmra.mxu3 %v867_v2  ;;  %1134 = vmatpush.msrb.mxu0 %v1133_v3  ;;  %v657_v32 = vld [vmem:[%s4388_s26 + $0x32] sm:$0xff]  ;;  %v231_v37 = vld [vmem:[%s4388_s26 + $0x28] sm:$0xff]  ;;  %v234_v57 = vld [vmem:[%s4388_s26 + $0x40] sm:$0xff] }
  0x55   : > { %1740 = vmatpush.msrb.mxu3 %v1739_v4  ;;  %507 = vmatpush.msra.mxu1 %v476_v5  ;;  %v871_v34 = vld [vmem:[%s4388_s26 + $0x33] sm:$0xff]  ;;  %v1521_v39 = vld [vmem:[#allocation5 + $0x358] sm:$0xff] }
  0x56   : > { %508 = vmatmul.f32.vlgmr.msra.gmra.mxu1 %v439_v6  ;;  %1527 = vmatpush.msrb.mxu2 %v1524_v7  ;;  %v444_v40 = vld [vmem:[%s4388_s26 + $0x29] sm:$0xff]  ;;  %v445_v47 = vld [vmem:[%s4388_s26 + $0x31] sm:$0xff]  ;;  %v446_v51 = vld [vmem:[%s4388_s26 + $0x39] sm:$0xff] }
  0x57   : > { %1348 = vmatpush.msrb.mxu1 %v1347_v8  ;;  %1135 = vmatpush.msrb.mxu0 %v1132_v9  ;;  %v1129_v41 = vld [vmem:[#allocation5 + $0x258] sm:$0xff]  ;;  %v232_v45 = vld [vmem:[%s4388_s26 + $0x30] sm:$0xff]  ;;  %v233_v49 = vld [vmem:[%s4388_s26 + $0x38] sm:$0xff] }
  0x58   : > { %1741 = vmatpush.msrb.mxu3 %v1738_v10  ;;  %1528 = vmatpush.msrb.mxu2 %v1523_v12  ;;  %v1735_v42 = vld [vmem:[#allocation5 + $0x3d8] sm:$0xff]  ;;  %v1520_v52 = vld [vmem:[#allocation5 + $0x350] sm:$0xff]  ;;  %v1519_v0 = vld [vmem:[#allocation5 + $0x348] sm:$0xff] }
  0x59   : > { %1349 = vmatpush.msrb.mxu1 %v1346_v11  ;;  %1136 = vmatpush.msrb.mxu0 %v1131_v13  ;;  %v1343_v43 = vld [vmem:[#allocation5 + $0x2d8] sm:$0xff]  ;;  %v1128_v53 = vld [vmem:[#allocation5 + $0x250] sm:$0xff]  ;;  %v1127_v1 = vld [vmem:[#allocation5 + $0x248] sm:$0xff] }
  0x5a   : > { %725 = vmatmul.f32.gmra.mxu2 %v654_v14  ;;  %1742 = vmatpush.msrb.mxu3 %v1737_v15  ;;  %v873_v46 = vld [vmem:[%s4388_s26 + $0x43] sm:$0xff]  ;;  %v874_v50 = vld [vmem:[%s4388_s26 + $0x4b] sm:$0xff]  ;;  %v875_v58 = vld [vmem:[%s4388_s26 + $0x53] sm:$0xff] }
  0x5b   : > { %297 = vmatmul.f32.gmra.mxu0 %v227_v16  ;;  %1350 = vmatpush.msrb.mxu1 %v1345_v18  ;;  %v660_v48 = vld [vmem:[%s4388_s26 + $0x4a] sm:$0xff]  ;;  %v1734_v54 = vld [vmem:[#allocation5 + $0x3d0] sm:$0xff] }
  0x5c   : > { %939 = vmatmul.f32.gmra.mxu3 %v868_v17  ;;  %1529 = vmatpush.msrb.mxu2 %v1522_v24  ;;  %v1342_v55 = vld [vmem:[#allocation5 + $0x2d0] sm:$0xff]  ;;  %v235_v61 = vld [vmem:[%s4388_s26 + $0x48] sm:$0xff]  ;;  %v1733_v2 = vld [vmem:[#allocation5 + $0x3c8] sm:$0xff] }
  0x5d   : > { %1743 = vmatpush.msrb.mxu3 %v1736_v29  ;;  %1137 = vmatpush.msrb.mxu0 %v1130_v28  ;;  %v661_v56 = vld [vmem:[%s4388_s26 + $0x52] sm:$0xff]  ;;  %v447_v59 = vld [vmem:[%s4388_s26 + $0x41] sm:$0xff]  ;;  %v448_v63 = vld [vmem:[%s4388_s26 + $0x49] sm:$0xff] }
  0x5e   : > { %511 = vmatmul.f32.gmra.mxu1 %v440_v19  ;;  %1530 = vmatpush.msrb.mxu2 %v1521_v39  ;;  %v662_v60 = vld [vmem:[%s4388_s26 + $0x5a] sm:$0xff]  ;;  %v663_v3 = vld [vmem:[%s4388_s26 + $0x62] sm:$0xff]  ;;  %v236_v4 = vld [vmem:[%s4388_s26 + $0x50] sm:$0xff] }
  0x5f   : > { %1351 = vmatpush.msrb.mxu1 %v1344_v31  ;;  %1138 = vmatpush.msrb.mxu0 %v1129_v41  ;;  %v876_v62 = vld [vmem:[%s4388_s26 + $0x5b] sm:$0xff]  ;;  %v877_v5 = vld [vmem:[%s4388_s26 + $0x63] sm:$0xff]  ;;  %v449_v7 = vld [vmem:[%s4388_s26 + $0x51] sm:$0xff] }
  0x60   : > { %1744 = vmatpush.msrb.mxu3 %v1735_v42  ;;  %1531 = vmatpush.msrb.mxu2 %v1520_v52  ;;  %v1341_v6 = vld [vmem:[#allocation5 + $0x2c8] sm:$0xff]  ;;  %v1518_v12 = vld [vmem:[#allocation5 + $0x340] sm:$0xff]  ;;  %v238_v14 = vld [vmem:[%s4388_s26 + $0x60] sm:$0xff] }
  0x61   : > { %1352 = vmatpush.msrb.mxu1 %v1343_v43  ;;  %1139 = vmatpush.msrb.mxu0 %v1128_v53  ;;  %v664_v8 = vld [vmem:[%s4388_s26 + $0x6a] sm:$0xff]  ;;  %v237_v9 = vld [vmem:[%s4388_s26 + $0x58] sm:$0xff]  ;;  %v451_v18 = vld [vmem:[%s4388_s26 + $0x61] sm:$0xff] }
  0x62   : > { %728 = vmatmul.f32.gmra.mxu2 %v655_v20  ;;  %1745 = vmatpush.msrb.mxu3 %v1734_v54  ;;  %v878_v10 = vld [vmem:[%s4388_s26 + $0x6b] sm:$0xff]  ;;  %v450_v11 = vld [vmem:[%s4388_s26 + $0x59] sm:$0xff]  ;;  %v667_v24 = vld [vmem:[%s4388_s26 + $0x82] sm:$0xff] }
  0x63   : > { %300 = vmatmul.f32.gmra.mxu0 %v228_v21  ;;  %1353 = vmatpush.msrb.mxu1 %v1342_v55  ;;  %v665_v13 = vld [vmem:[%s4388_s26 + $0x72] sm:$0xff]  ;;  %v666_v20 = vld [vmem:[%s4388_s26 + $0x7a] sm:$0xff]  ;;  %v239_v21 = vld [vmem:[%s4388_s26 + $0x68] sm:$0xff] }
  0x64   : > { %942 = vmatmul.f32.gmra.mxu3 %v869_v22  ;;  %1532 = vmatpush.msrb.mxu2 %v1519_v0  ;;  %v879_v15 = vld [vmem:[%s4388_s26 + $0x73] sm:$0xff]  ;;  %v880_v22 = vld [vmem:[%s4388_s26 + $0x7b] sm:$0xff]  ;;  %v243_v54 = vld [vmem:[%s4388_s26 + $0x88] sm:$0xff] }
  0x65   : > { %1140 = vmatpush.msrb.mxu0 %v1127_v1  ;;  %1746 = vmatpush.msrb.mxu3 %v1733_v2  ;;  %v1126_v16 = vld [vmem:[#allocation5 + $0x240] sm:$0xff]  ;;  %v1125_v29 = vld [vmem:[#allocation5 + $0x238] sm:$0xff] }
  0x66   : > { %514 = vmatmul.f32.gmra.mxu1 %v441_v23  ;;  %1533 = vmatpush.msrb.mxu2 %v1518_v12  ;;  %v1732_v17 = vld [vmem:[#allocation5 + $0x3c0] sm:$0xff]  ;;  %v1339_v31 = vld [vmem:[#allocation5 + $0x2b8] sm:$0xff] }
  0x67   : > { %1354 = vmatpush.msrb.mxu1 %v1341_v6  ;;  %1747 = vmatpush.msrb.mxu3 %v1732_v17  ;;  %v1340_v19 = vld [vmem:[#allocation5 + $0x2c0] sm:$0xff]  ;;  %v242_v39 = vld [vmem:[%s4388_s26 + $0x80] sm:$0xff] }
  0x68   : > { %1141 = vmatpush.msrb.mxu0 %v1126_v16  ;;  %v452_v23 = vld [vmem:[%s4388_s26 + $0x69] sm:$0xff]  ;;  %v453_v28 = vld [vmem:[%s4388_s26 + $0x71] sm:$0xff]  ;;  %v455_v43 = vld [vmem:[%s4388_s26 + $0x81] sm:$0xff] }
  0x69   : > { %1355 = vmatpush.msrb.mxu1 %v1340_v19  ;;  %v883_v41 = vld [vmem:[%s4388_s26 + $0x93] sm:$0xff]  ;;  %v671_v0 = vld [vmem:[%s4388_s26 + $0xa2] sm:$0xff] }
  0x6a   : > { %731 = vmatmul.f32.gmra.mxu2 %v656_v25  ;;  %v240_v25 = vld [vmem:[%s4388_s26 + $0x70] sm:$0xff]  ;;  %1142 = vmatpush.msrb.mxu0 %v1125_v29  ;;  %v245_v16 = vld [vmem:[%s4388_s26 + $0x98] sm:$0xff] }
  0x6b   : > { %303 = vmatmul.f32.gmra.mxu0 %v229_v26  ;;  %v881_v26 = vld [vmem:[%s4388_s26 + $0x83] sm:$0xff]  ;;  %1356 = vmatpush.msrb.mxu1 %v1339_v31  ;;  %v1123_v19 = vld [vmem:[#allocation5 + $0x228] sm:$0xff] }
  0x6c   : > { %945 = vmatmul.f32.gmra.mxu3 %v870_v27  ;;  %v1517_v27 = vld [vmem:[#allocation5 + $0x338] sm:$0xff] }
  0x6d   : > { %1534 = vmatpush.msrb.mxu2 %v1517_v27  ;;  %v246_v31 = vld [vmem:[%s4388_s26 + $0xa0] sm:$0xff] }
  0x6e   : > { %517 = vmatmul.f32.gmra.mxu1 %v442_v30  ;;  %v1731_v30 = vld [vmem:[#allocation5 + $0x3b8] sm:$0xff] }
  0x6f   : > { %1748 = vmatpush.msrb.mxu3 %v1731_v30 }
  0x72   : > { %734 = vmatmul.f32.gmra.mxu2 %v657_v32  ;;  %v668_v32 = vld [vmem:[%s4388_s26 + $0x8a] sm:$0xff] }
  0x73   : > { %306 = vmatmul.f32.gmra.mxu0 %v230_v33  ;;  %v241_v33 = vld [vmem:[%s4388_s26 + $0x78] sm:$0xff] }
  0x74   : > { %948 = vmatmul.f32.gmra.mxu3 %v871_v34  ;;  %v882_v34 = vld [vmem:[%s4388_s26 + $0x8b] sm:$0xff] }
  0x76   : > { %520 = vmatmul.f32.gmra.mxu1 %v443_v35  ;;  %v454_v35 = vld [vmem:[%s4388_s26 + $0x79] sm:$0xff] }
  0x7a   : > { %737 = vmatmul.f32.gmra.mxu2 %v658_v36  ;;  %v4462_v36 = vld [vmem:[#allocation7] ss:$0 sm:$0xff] }
  0x7b   : > { %309 = vmatmul.f32.gmra.mxu0 %v231_v37  ;;  %v669_v37 = vld [vmem:[%s4388_s26 + $0x92] sm:$0xff] }
  0x7c   : > { %951 = vmatmul.f32.gmra.mxu3 %v872_v38 }
  0x7e   : > { %523 = vmatmul.f32.gmra.mxu1 %v444_v40 }
  0x82   : > { %740 = vmatmul.f32.gmra.mxu2 %v659_v44 }
  0x83   : > { %312 = vmatmul.f32.gmra.mxu0 %v232_v45  ;;  %v1516_v45 = vld [vmem:[#allocation5 + $0x330] sm:$0xff] }
  0x84   : > { %954 = vmatmul.f32.gmra.mxu3 %v873_v46  ;;  %1535 = vmatpush.msrb.mxu2 %v1516_v45 }
  0x86   : > { %526 = vmatmul.f32.gmra.mxu1 %v445_v47 }
  0x8a   : > { %743 = vmatmul.f32.gmra.mxu2 %v660_v48  ;;  %v1124_v48 = vld [vmem:[#allocation5 + $0x230] sm:$0xff] }
  0x8b   : > { %315 = vmatmul.f32.gmra.mxu0 %v233_v49  ;;  %v1730_v49 = vld [vmem:[#allocation5 + $0x3b0] sm:$0xff] }
  0x8c   : > { %957 = vmatmul.f32.gmra.mxu3 %v874_v50  ;;  %1143 = vmatpush.msrb.mxu0 %v1124_v48  ;;  %v1122_v48 = vld [vmem:[#allocation5 + $0x220] sm:$0xff] }
  0x8d   : > { %1749 = vmatpush.msrb.mxu3 %v1730_v49  ;;  %v1728_v49 = vld [vmem:[#allocation5 + $0x3a0] sm:$0xff] }
  0x8e   : > { %529 = vmatmul.f32.gmra.mxu1 %v446_v51  ;;  %v670_v51 = vld [vmem:[%s4388_s26 + $0x9a] sm:$0xff]  ;;  %1144 = vmatpush.msrb.mxu0 %v1123_v19 }
  0x8f   : > { %v1335_v19 = vld [vmem:[#allocation5 + $0x298] sm:$0xff] }
  0x90   : > { %1145 = vmatpush.msrb.mxu0 %v1122_v48 }
  0x92   : > { %746 = vmatmul.f32.gmra.mxu2 %v661_v56  ;;  %v884_v56 = vld [vmem:[%s4388_s26 + $0x9b] sm:$0xff] }
  0x93   : > { %318 = vmatmul.f32.gmra.mxu0 %v234_v57  ;;  %v1338_v57 = vld [vmem:[#allocation5 + $0x2b0] sm:$0xff] }
  0x94   : > { %960 = vmatmul.f32.gmra.mxu3 %v875_v58  ;;  %1357 = vmatpush.msrb.mxu1 %v1338_v57  ;;  %v675_v57 = vld [vmem:[%s4388_s26 + $0xc2] sm:$0xff] }
  0x96   : > { %532 = vmatmul.f32.gmra.mxu1 %v447_v59  ;;  %v456_v59 = vld [vmem:[%s4388_s26 + $0x89] sm:$0xff] }
  0x9a   : > { %749 = vmatmul.f32.gmra.mxu2 %v662_v60 }
  0x9b   : > { %321 = vmatmul.f32.gmra.mxu0 %v235_v61 }
  0x9c   : > { %963 = vmatmul.f32.gmra.mxu3 %v876_v62 }
  0x9e   : > { %535 = vmatmul.f32.gmra.mxu1 %v448_v63 }
  0xa2   : > { %752 = vmatmul.f32.gmra.mxu2 %v663_v3  ;;  %v244_v3 = vld [vmem:[%s4388_s26 + $0x90] sm:$0xff] }
  0xa3   : > { %324 = vmatmul.f32.gmra.mxu0 %v236_v4 }
  0xa4   : > { %966 = vmatmul.f32.gmra.mxu3 %v877_v5  ;;  %v885_v5 = vld [vmem:[%s4388_s26 + $0xa3] sm:$0xff] }
  0xa6   : > { %538 = vmatmul.f32.gmra.mxu1 %v449_v7  ;;  %v457_v7 = vld [vmem:[%s4388_s26 + $0x91] sm:$0xff] }
  0xaa   : > { %755 = vmatmul.f32.gmra.mxu2 %v664_v8 }
  0xab   : > { %327 = vmatmul.f32.gmra.mxu0 %v237_v9 }
  0xac   : > { %969 = vmatmul.f32.gmra.mxu3 %v878_v10 }
  0xae   : > { %541 = vmatmul.f32.gmra.mxu1 %v450_v11  ;;  %v1515_v11 = vld [vmem:[#allocation5 + $0x328] sm:$0xff] }
  0xaf   : > { %1536 = vmatpush.msrb.mxu2 %v1515_v11  ;;  %v1513_v11 = vld [vmem:[#allocation5 + $0x318] sm:$0xff] }
  0xb2   : > { %758 = vmatmul.f32.gmra.mxu2 %v665_v13  ;;  %v672_v13 = vld [vmem:[%s4388_s26 + $0xaa] sm:$0xff] }
  0xb3   : > { %330 = vmatmul.f32.gmra.mxu0 %v238_v14 }
  0xb4   : > { %972 = vmatmul.f32.gmra.mxu3 %v879_v15 }
  0xb6   : > { %544 = vmatmul.f32.gmra.mxu1 %v451_v18  ;;  %v886_v18 = vld [vmem:[%s4388_s26 + $0xab] sm:$0xff] }
  0xba   : > { %761 = vmatmul.f32.gmra.mxu2 %v666_v20  ;;  %v1729_v20 = vld [vmem:[#allocation5 + $0x3a8] sm:$0xff] }
  0xbb   : > { %333 = vmatmul.f32.gmra.mxu0 %v239_v21  ;;  %v1337_v21 = vld [vmem:[#allocation5 + $0x2a8] sm:$0xff]  ;;  %1750 = vmatpush.msrb.mxu3 %v1729_v20 }
  0xbc   : > { %975 = vmatmul.f32.gmra.mxu3 %v880_v22  ;;  %1358 = vmatpush.msrb.mxu1 %v1337_v21  ;;  %v677_v21 = vld [vmem:[%s4388_s26 + $0xd2] sm:$0xff] }
  0xbd   : > { %1751 = vmatpush.msrb.mxu3 %v1728_v49  ;;  %v679_v49 = vld [vmem:[%s4388_s26 + $0xe2] sm:$0xff] }
  0xbe   : > { %547 = vmatmul.f32.gmra.mxu1 %v452_v23  ;;  %v458_v23 = vld [vmem:[%s4388_s26 + $0x99] sm:$0xff] }
  0xc2   : > { %764 = vmatmul.f32.gmra.mxu2 %v667_v24 }
  0xc3   : > { %336 = vmatmul.f32.gmra.mxu0 %v240_v25 }
  0xc4   : > { %978 = vmatmul.f32.gmra.mxu3 %v881_v26 }
  0xc6   : > { %550 = vmatmul.f32.gmra.mxu1 %v453_v28  ;;  %v673_v28 = vld [vmem:[%s4388_s26 + $0xb2] sm:$0xff] }
  0xca   : > { %767 = vmatmul.f32.gmra.mxu2 %v668_v32 }
  0xcb   : > { %339 = vmatmul.f32.gmra.mxu0 %v241_v33  ;;  %v887_v33 = vld [vmem:[%s4388_s26 + $0xb3] sm:$0xff] }
  0xcc   : > { %981 = vmatmul.f32.gmra.mxu3 %v882_v34 }
  0xce   : > { %553 = vmatmul.f32.gmra.mxu1 %v454_v35  ;;  %v459_v35 = vld [vmem:[%s4388_s26 + $0xa1] sm:$0xff] }
  0xd0   : > { %v295_v38 = vpop.f32.mrf.mxu0 }
  0xd1   : > { %v403_v40 = vadd.f32 %v4462_v36, %v295_v38 }
  0xd2   : > { %770 = vmatmul.f32.gmra.mxu2 %v669_v37 }
  0xd3   : > { %v509_v42 = vpop.f32.mrf.mxu1  ;;  %342 = vmatmul.f32.gmra.mxu0 %v242_v39 }
  0xd4   : > { %v617_v44 = vadd.f32 %v509_v42, %v403_v40  ;;  %984 = vmatmul.f32.gmra.mxu3 %v883_v41  ;;  %v674_v41 = vld [vmem:[%s4388_s26 + $0xba] sm:$0xff] }
  0xd5   : > { %v723_v46 = vpop.f32.mrf.mxu2 }
  0xd6   : > { %v831_v47 = vadd.f32 %v723_v46, %v617_v44  ;;  %556 = vmatmul.f32.gmra.mxu1 %v455_v43  ;;  %v247_v44 = vld [vmem:[%s4388_s26 + $0xa8] sm:$0xff]  ;;  %v888_v46 = vld [vmem:[%s4388_s26 + $0xbb] sm:$0xff] }
  0xd7   : > { %v937_v50 = vpop.f32.mrf.mxu3 }
  0xd8   : > { %v1045_v52 = vadd.f32 %v937_v50, %v831_v47  ;;  %v298_v53 = vpop.f32.mrf.mxu0  ;;  %v1514_v47 = vld [vmem:[#allocation5 + $0x320] sm:$0xff] }
  0xd9   : > { %v404_v55 = vadd.f32 %v4462_v36, %v298_v53  ;;  %1537 = vmatpush.msrb.mxu2 %v1514_v47  ;;  %v1336_v53 = vld [vmem:[#allocation5 + $0x2a0] sm:$0xff]  ;;  %v1726_v47 = vld [vmem:[#allocation5 + $0x390] sm:$0xff] }
  0xda   : > { %1081 = vst [vmem:[%s4474_s23] sm:$0xff] %v1045_v52  ;;  %773 = vmatmul.f32.gmra.mxu2 %v670_v51  ;;  %v460_v51 = vld [vmem:[%s4388_s26 + $0xa9] sm:$0xff]  ;;  %1359 = vmatpush.msrb.mxu1 %v1336_v53 }
  0xdb   : > { %v512_v58 = vpop.f32.mrf.mxu1  ;;  %345 = vmatmul.f32.gmra.mxu0 %v243_v54  ;;  %1538 = vmatpush.msrb.mxu2 %v1513_v11  ;;  %v681_v11 = vld [vmem:[%s4388_s26 + $0xf2] sm:$0xff] }
  0xdc   : > { %v618_v60 = vadd.f32 %v512_v58, %v404_v55  ;;  %987 = vmatmul.f32.gmra.mxu3 %v884_v56  ;;  %1360 = vmatpush.msrb.mxu1 %v1335_v19  ;;  %v1333_v19 = vld [vmem:[#allocation5 + $0x288] sm:$0xff] }
  0xdd   : > { %v726_v61 = vpop.f32.mrf.mxu2 }
  0xde   : > { %v832_v62 = vadd.f32 %v726_v61, %v618_v60  ;;  %559 = vmatmul.f32.gmra.mxu1 %v456_v59  ;;  %v248_v60 = vld [vmem:[%s4388_s26 + $0xb0] sm:$0xff] }
  0xdf   : > { %v940_v63 = vpop.f32.mrf.mxu3 }
  0xe0   : > { %v1046_v1 = vadd.f32 %v940_v63, %v832_v62  ;;  %v301_v2 = vpop.f32.mrf.mxu0  ;;  %v889_v62 = vld [vmem:[%s4388_s26 + $0xc3] sm:$0xff] }
  0xe1   : > { %v405_v4 = vadd.f32 %v4462_v36, %v301_v2 }
  0xe2   : > { %1082 = vst [vmem:[%s4474_s23 + $0x8] sm:$0xff] %v1046_v1  ;;  %776 = vmatmul.f32.gmra.mxu2 %v671_v0  ;;  %v461_v0 = vld [vmem:[%s4388_s26 + $0xb1] sm:$0xff] }
  0xe3   : > { %v515_v6 = vpop.f32.mrf.mxu1  ;;  %348 = vmatmul.f32.gmra.mxu0 %v244_v3 }
  0xe4   : > { %v619_v8 = vadd.f32 %v515_v6, %v405_v4  ;;  %990 = vmatmul.f32.gmra.mxu3 %v885_v5  ;;  %v676_v5 = vld [vmem:[%s4388_s26 + $0xca] sm:$0xff] }
  0xe5   : > { %v729_v9 = vpop.f32.mrf.mxu2 }
  0xe6   : > { %v833_v10 = vadd.f32 %v729_v9, %v619_v8  ;;  %562 = vmatmul.f32.gmra.mxu1 %v457_v7  ;;  %v249_v8 = vld [vmem:[%s4388_s26 + $0xb8] sm:$0xff] }
  0xe7   : > { %v943_v12 = vpop.f32.mrf.mxu3 }
  0xe8   : > { %v1047_v14 = vadd.f32 %v943_v12, %v833_v10  ;;  %v304_v15 = vpop.f32.mrf.mxu0  ;;  %v890_v10 = vld [vmem:[%s4388_s26 + $0xcb] sm:$0xff] }
  0xe9   : > { %v406_v17 = vadd.f32 %v4462_v36, %v304_v15  ;;  %v1121_v15 = vld [vmem:[#allocation5 + $0x218] sm:$0xff] }
  0xea   : > { %1083 = vst [vmem:[%s4474_s23 + $0x10] sm:$0xff] %v1047_v14  ;;  %779 = vmatmul.f32.gmra.mxu2 %v672_v13  ;;  %v462_v13 = vld [vmem:[%s4388_s26 + $0xb9] sm:$0xff]  ;;  %1146 = vmatpush.msrb.mxu0 %v1121_v15 }
  0xeb   : > { %v518_v22 = vpop.f32.mrf.mxu1  ;;  %351 = vmatmul.f32.gmra.mxu0 %v245_v16  ;;  %v1727_v16 = vld [vmem:[#allocation5 + $0x398] sm:$0xff] }
  0xec   : > { %v620_v24 = vadd.f32 %v518_v22, %v406_v17  ;;  %993 = vmatmul.f32.gmra.mxu3 %v886_v18 }
  0xed   : > { %v732_v25 = vpop.f32.mrf.mxu2  ;;  %1752 = vmatpush.msrb.mxu3 %v1727_v16  ;;  %v895_v16 = vld [vmem:[%s4388_s26 + $0xf3] sm:$0xff] }
  0xee   : > { %v834_v26 = vadd.f32 %v732_v25, %v620_v24  ;;  %565 = vmatmul.f32.gmra.mxu1 %v458_v23  ;;  %v250_v24 = vld [vmem:[%s4388_s26 + $0xc0] sm:$0xff] }
  0xef   : > { %v946_v27 = vpop.f32.mrf.mxu3  ;;  %1753 = vmatpush.msrb.mxu3 %v1726_v47  ;;  %v1724_v47 = vld [vmem:[#allocation5 + $0x380] sm:$0xff] }
  0xf0   : > { %v1048_v29 = vadd.f32 %v946_v27, %v834_v26  ;;  %v307_v30 = vpop.f32.mrf.mxu0  ;;  %v891_v26 = vld [vmem:[%s4388_s26 + $0xd3] sm:$0xff] }
  0xf1   : > { %v407_v32 = vadd.f32 %v4462_v36, %v307_v30 }
  0xf2   : > { %1084 = vst [vmem:[%s4474_s23 + $0x18] sm:$0xff] %v1048_v29  ;;  %782 = vmatmul.f32.gmra.mxu2 %v673_v28  ;;  %v463_v28 = vld [vmem:[%s4388_s26 + $0xc1] sm:$0xff] }
  0xf3   : > { %v521_v34 = vpop.f32.mrf.mxu1  ;;  %354 = vmatmul.f32.gmra.mxu0 %v246_v31 }
  0xf4   : > { %v621_v37 = vadd.f32 %v521_v34, %v407_v32  ;;  %996 = vmatmul.f32.gmra.mxu3 %v887_v33  ;;  %v678_v33 = vld [vmem:[%s4388_s26 + $0xda] sm:$0xff] }
  0xf5   : > { %v735_v38 = vpop.f32.mrf.mxu2 }
  0xf6   : > { %v835_v39 = vadd.f32 %v735_v38, %v621_v37  ;;  %568 = vmatmul.f32.gmra.mxu1 %v459_v35  ;;  %v251_v37 = vld [vmem:[%s4388_s26 + $0xc8] sm:$0xff] }
  0xf7   : > { %v949_v40 = vpop.f32.mrf.mxu3 }
  0xf8   : > { %v1049_v42 = vadd.f32 %v949_v40, %v835_v39  ;;  %v310_v43 = vpop.f32.mrf.mxu0  ;;  %v892_v39 = vld [vmem:[%s4388_s26 + $0xdb] sm:$0xff] }
  0xf9   : > { %v408_v45 = vadd.f32 %v4462_v36, %v310_v43  ;;  %v1512_v43 = vld [vmem:[#allocation5 + $0x310] sm:$0xff] }
  0xfa   : > { %1085 = vst [vmem:[%s4474_s23 + $0x20] sm:$0xff] %v1049_v42  ;;  %785 = vmatmul.f32.gmra.mxu2 %v674_v41  ;;  %v464_v41 = vld [vmem:[%s4388_s26 + $0xc9] sm:$0xff] }
  0xfb   : > { %v524_v50 = vpop.f32.mrf.mxu1  ;;  %357 = vmatmul.f32.gmra.mxu0 %v247_v44  ;;  %1539 = vmatpush.msrb.mxu2 %v1512_v43 }
  0xfc   : > { %v622_v52 = vadd.f32 %v524_v50, %v408_v45  ;;  %999 = vmatmul.f32.gmra.mxu3 %v888_v46  ;;  %v1120_v46 = vld [vmem:[#allocation5 + $0x210] sm:$0xff] }
  0xfd   : > { %v738_v54 = vpop.f32.mrf.mxu2  ;;  %1147 = vmatpush.msrb.mxu0 %v1120_v46  ;;  %v1118_v46 = vld [vmem:[#allocation5 + $0x200] sm:$0xff] }
  0xfe   : > { %v836_v55 = vadd.f32 %v738_v54, %v622_v52  ;;  %571 = vmatmul.f32.gmra.mxu1 %v460_v51  ;;  %v252_v52 = vld [vmem:[%s4388_s26 + $0xd0] sm:$0xff]  ;;  %v893_v54 = vld [vmem:[%s4388_s26 + $0xe3] sm:$0xff] }
  0xff   : > { %v952_v56 = vpop.f32.mrf.mxu3 }
 0x100   : > { %v1050_v58 = vadd.f32 %v952_v56, %v836_v55  ;;  %v313_v59 = vpop.f32.mrf.mxu0  ;;  %v1334_v55 = vld [vmem:[#allocation5 + $0x290] sm:$0xff] }
 0x101   : > { %v409_v61 = vadd.f32 %v4462_v36, %v313_v59  ;;  %1361 = vmatpush.msrb.mxu1 %v1334_v55  ;;  %v684_v55 = vld [vmem:[%s4388_s26 + $0x10a] sm:$0xff] }
 0x102   : > { %1086 = vst [vmem:[%s4474_s23 + $0x28] sm:$0xff] %v1050_v58  ;;  %788 = vmatmul.f32.gmra.mxu2 %v675_v57  ;;  %v465_v57 = vld [vmem:[%s4388_s26 + $0xd1] sm:$0xff] }
 0x103   : > { %v527_v63 = vpop.f32.mrf.mxu1  ;;  %360 = vmatmul.f32.gmra.mxu0 %v248_v60  ;;  %1362 = vmatpush.msrb.mxu1 %v1333_v19  ;;  %v686_v19 = vld [vmem:[%s4388_s26 + $0x11a] sm:$0xff] }
 0x104   : > { %v623_v1 = vadd.f32 %v527_v63, %v409_v61  ;;  %1002 = vmatmul.f32.gmra.mxu3 %v889_v62  ;;  %v680_v62 = vld [vmem:[%s4388_s26 + $0xea] sm:$0xff] }
 0x105   : > { %v741_v2 = vpop.f32.mrf.mxu2 }
 0x106   : > { %v837_v3 = vadd.f32 %v741_v2, %v623_v1  ;;  %574 = vmatmul.f32.gmra.mxu1 %v461_v0  ;;  %v253_v1 = vld [vmem:[%s4388_s26 + $0xd8] sm:$0xff] }
 0x107   : > { %v955_v4 = vpop.f32.mrf.mxu3 }
 0x108   : > { %v1051_v6 = vadd.f32 %v955_v4, %v837_v3  ;;  %v316_v7 = vpop.f32.mrf.mxu0  ;;  %v894_v3 = vld [vmem:[%s4388_s26 + $0xeb] sm:$0xff] }
 0x109   : > { %v410_v9 = vadd.f32 %v4462_v36, %v316_v7 }
 0x10a   : > { %1087 = vst [vmem:[%s4474_s23 + $0x30] sm:$0xff] %v1051_v6  ;;  %791 = vmatmul.f32.gmra.mxu2 %v676_v5  ;;  %v466_v5 = vld [vmem:[%s4388_s26 + $0xd9] sm:$0xff] }
 0x10b   : > { %v530_v12 = vpop.f32.mrf.mxu1  ;;  %363 = vmatmul.f32.gmra.mxu0 %v249_v8 }
 0x10c   : > { %v624_v14 = vadd.f32 %v530_v12, %v410_v9  ;;  %1005 = vmatmul.f32.gmra.mxu3 %v890_v10  ;;  %v1511_v9 = vld [vmem:[#allocation5 + $0x308] sm:$0xff] }
 0x10d   : > { %v744_v17 = vpop.f32.mrf.mxu2  ;;  %1540 = vmatpush.msrb.mxu2 %v1511_v9  ;;  %v2346_v9 = vld [vmem:[#allocation5 + $0x578] sm:$0xff] }
 0x10e   : > { %v838_v18 = vadd.f32 %v744_v17, %v624_v14  ;;  %577 = vmatmul.f32.gmra.mxu1 %v462_v13  ;;  %v254_v14 = vld [vmem:[%s4388_s26 + $0xe0] sm:$0xff]  ;;  %v1119_v17 = vld [vmem:[#allocation5 + $0x208] sm:$0xff] }
 0x10f   : > { %v958_v20 = vpop.f32.mrf.mxu3  ;;  %1148 = vmatpush.msrb.mxu0 %v1119_v17  ;;  %v2132_v17 = vld [vmem:[#allocation5 + $0x4f8] sm:$0xff] }
 0x110   : > { %v1052_v22 = vadd.f32 %v958_v20, %v838_v18  ;;  %v319_v23 = vpop.f32.mrf.mxu0  ;;  %v1725_v18 = vld [vmem:[#allocation5 + $0x388] sm:$0xff] }
 0x111   : > { %v411_v25 = vadd.f32 %v4462_v36, %v319_v23  ;;  %1754 = vmatpush.msrb.mxu3 %v1725_v18  ;;  %1149 = vmatpush.msrb.mxu0 %v1118_v46 }
 0x112   : > { %1088 = vst [vmem:[%s4474_s23 + $0x38] sm:$0xff] %v1052_v22  ;;  %794 = vmatmul.f32.gmra.mxu2 %v677_v21  ;;  %v467_v21 = vld [vmem:[%s4388_s26 + $0xe1] sm:$0xff] }
 0x113   : > { %v533_v27 = vpop.f32.mrf.mxu1  ;;  %366 = vmatmul.f32.gmra.mxu0 %v250_v24  ;;  %1755 = vmatpush.msrb.mxu3 %v1724_v47  ;;  %v688_v47 = vld [vmem:[%s4388_s26 + $0x12a] sm:$0xff] }
 0x114   : > { %v625_v29 = vadd.f32 %v533_v27, %v411_v25  ;;  %1008 = vmatmul.f32.gmra.mxu3 %v891_v26  ;;  %v682_v26 = vld [vmem:[%s4388_s26 + $0xfa] sm:$0xff] }
 0x115   : > { %v747_v30 = vpop.f32.mrf.mxu2 }
 0x116   : > { %v839_v31 = vadd.f32 %v747_v30, %v625_v29  ;;  %580 = vmatmul.f32.gmra.mxu1 %v463_v28  ;;  %v255_v29 = vld [vmem:[%s4388_s26 + $0xe8] sm:$0xff] }
 0x117   : > { %v961_v32 = vpop.f32.mrf.mxu3 }
 0x118   : > { %v1053_v34 = vadd.f32 %v961_v32, %v839_v31  ;;  %v322_v35 = vpop.f32.mrf.mxu0  ;;  %v896_v31 = vld [vmem:[%s4388_s26 + $0xfb] sm:$0xff] }
 0x119   : > { %v412_v38 = vadd.f32 %v4462_v36, %v322_v35 }
 0x11a   : > { %1089 = vst [vmem:[%s4474_s23 + $0x40] sm:$0xff] %v1053_v34  ;;  %797 = vmatmul.f32.gmra.mxu2 %v678_v33  ;;  %v468_v33 = vld [vmem:[%s4388_s26 + $0xe9] sm:$0xff] }
 0x11b   : > { %v536_v40 = vpop.f32.mrf.mxu1  ;;  %369 = vmatmul.f32.gmra.mxu0 %v251_v37 }
 0x11c   : > { %v626_v42 = vadd.f32 %v536_v40, %v412_v38  ;;  %1011 = vmatmul.f32.gmra.mxu3 %v892_v39  ;;  %v683_v39 = vld [vmem:[%s4388_s26 + $0x102] sm:$0xff] }
 0x11d   : > { %v750_v44 = vpop.f32.mrf.mxu2 }
 0x11e   : > { %v840_v45 = vadd.f32 %v750_v44, %v626_v42  ;;  %583 = vmatmul.f32.gmra.mxu1 %v464_v41  ;;  %v256_v42 = vld [vmem:[%s4388_s26 + $0xf0] sm:$0xff]  ;;  %v897_v44 = vld [vmem:[%s4388_s26 + $0x103] sm:$0xff] }
 0x11f   : > { %v964_v48 = vpop.f32.mrf.mxu3 }
 0x120   : > { %v1054_v50 = vadd.f32 %v964_v48, %v840_v45  ;;  %v325_v51 = vpop.f32.mrf.mxu0  ;;  %v1510_v45 = vld [vmem:[#allocation5 + $0x300] sm:$0xff] }
 0x121   : > { %v413_v53 = vadd.f32 %v4462_v36, %v325_v51  ;;  %1541 = vmatpush.msrb.mxu2 %v1510_v45  ;;  %v1332_v51 = vld [vmem:[#allocation5 + $0x280] sm:$0xff]  ;;  %v2559_v45 = vld [vmem:[#allocation5 + $0x5f0] sm:$0xff] }
 0x122   : > { %1090 = vst [vmem:[%s4474_s23 + $0x48] sm:$0xff] %v1054_v50  ;;  %800 = vmatmul.f32.gmra.mxu2 %v679_v49  ;;  %v469_v49 = vld [vmem:[%s4388_s26 + $0xf1] sm:$0xff]  ;;  %1363 = vmatpush.msrb.mxu1 %v1332_v51 }
 0x123   : > { %v539_v56 = vpop.f32.mrf.mxu1  ;;  %372 = vmatmul.f32.gmra.mxu0 %v252_v52  ;;  %2347 = vmatpush.msra.mxu2 %v2346_v9 }
 0x124   : > { %v627_v58 = vadd.f32 %v539_v56, %v413_v53  ;;  %1014 = vmatmul.f32.gmra.mxu3 %v893_v54  ;;  %2133 = vmatpush.msra.mxu1 %v2132_v17 }
 0x125   : > { %v753_v59 = vpop.f32.mrf.mxu2 }
 0x126   : > { %v841_v60 = vadd.f32 %v753_v59, %v627_v58  ;;  %586 = vmatmul.f32.gmra.mxu1 %v465_v57  ;;  %v257_v58 = vld [vmem:[%s4388_s26 + $0xf8] sm:$0xff] }
 0x127   : > { %v967_v61 = vpop.f32.mrf.mxu3 }
 0x128   : > { %v1055_v63 = vadd.f32 %v967_v61, %v841_v60  ;;  %v328_v0 = vpop.f32.mrf.mxu0  ;;  %v898_v60 = vld [vmem:[%s4388_s26 + $0x10b] sm:$0xff] }
 0x129   : > { %v414_v2 = vadd.f32 %v4462_v36, %v328_v0 }
 0x12a   : > { %1091 = vst [vmem:[%s4474_s23 + $0x50] sm:$0xff] %v1055_v63  ;;  %803 = vmatmul.f32.gmra.mxu2 %v680_v62  ;;  %v470_v62 = vld [vmem:[%s4388_s26 + $0xf9] sm:$0xff] }
 0x12b   : > { %v542_v4 = vpop.f32.mrf.mxu1  ;;  %375 = vmatmul.f32.gmra.mxu0 %v253_v1 }
 0x12c   : > { %v628_v6 = vadd.f32 %v542_v4, %v414_v2  ;;  %1017 = vmatmul.f32.gmra.mxu3 %v894_v3  ;;  %v685_v3 = vld [vmem:[%s4388_s26 + $0x112] sm:$0xff] }
 0x12d   : > { %v756_v7 = vpop.f32.mrf.mxu2 }
 0x12e   : > { %v842_v8 = vadd.f32 %v756_v7, %v628_v6  ;;  %589 = vmatmul.f32.gmra.mxu1 %v466_v5  ;;  %v258_v6 = vld [vmem:[%s4388_s26 + $0x100] sm:$0xff] }
 0x12f   : > { %v970_v10 = vpop.f32.mrf.mxu3 }
 0x130   : > { %v1056_v12 = vadd.f32 %v970_v10, %v842_v8  ;;  %v331_v13 = vpop.f32.mrf.mxu0  ;;  %v899_v8 = vld [vmem:[%s4388_s26 + $0x113] sm:$0xff] }
 0x131   : > { %v415_v15 = vadd.f32 %v4462_v36, %v331_v13  ;;  %v1954_v13 = vld [vmem:[#allocation5 + $0x478] sm:$0xff] }
 0x132   : > { %1092 = vst [vmem:[%s4474_s23 + $0x58] sm:$0xff] %v1056_v12  ;;  %806 = vmatmul.f32.gmra.mxu2 %v681_v11  ;;  %v471_v11 = vld [vmem:[%s4388_s26 + $0x101] sm:$0xff]  ;;  %1955 = vmatpush.msra.mxu0 %v1954_v13 }
 0x133   : > { %v545_v20 = vpop.f32.mrf.mxu1  ;;  %378 = vmatmul.f32.gmra.mxu0 %v254_v14  ;;  %v2560_v14 = vld [vmem:[#allocation5 + $0x5f8] sm:$0xff] }
 0x134   : > { %v629_v22 = vadd.f32 %v545_v20, %v415_v15  ;;  %1020 = vmatmul.f32.gmra.mxu3 %v895_v16  ;;  %v3851_v13 = vld [vmem:[%s4388_s26 + $0x1b] sm:$0xff] }
 0x135   : > { %v759_v23 = vpop.f32.mrf.mxu2  ;;  %2561 = vmatpush.msra.mxu3 %v2560_v14  ;;  %v1952_v14 = vld [vmem:[#allocation5 + $0x468] sm:$0xff] }
 0x136   : > { %v843_v24 = vadd.f32 %v759_v23, %v629_v22  ;;  %592 = vmatmul.f32.gmra.mxu1 %v467_v21  ;;  %v259_v22 = vld [vmem:[%s4388_s26 + $0x108] sm:$0xff] }
 0x137   : > { %v973_v25 = vpop.f32.mrf.mxu3  ;;  %2562 = vmatpush.msra.mxu3 %v2559_v45 }
 0x138   : > { %v1057_v27 = vadd.f32 %v973_v25, %v843_v24  ;;  %v334_v28 = vpop.f32.mrf.mxu0  ;;  %v900_v24 = vld [vmem:[%s4388_s26 + $0x11b] sm:$0xff] }
 0x139   : > { %v416_v30 = vadd.f32 %v4462_v36, %v334_v28 }
 0x13a   : > { %1093 = vst [vmem:[%s4474_s23 + $0x60] sm:$0xff] %v1057_v27  ;;  %809 = vmatmul.f32.gmra.mxu2 %v682_v26  ;;  %v472_v26 = vld [vmem:[%s4388_s26 + $0x109] sm:$0xff] }
 0x13b   : > { %v548_v32 = vpop.f32.mrf.mxu1  ;;  %381 = vmatmul.f32.gmra.mxu0 %v255_v29 }
 0x13c   : > { %v630_v34 = vadd.f32 %v548_v32, %v416_v30  ;;  %1023 = vmatmul.f32.gmra.mxu3 %v896_v31  ;;  %v687_v31 = vld [vmem:[%s4388_s26 + $0x122] sm:$0xff] }
 0x13d   : > { %v762_v35 = vpop.f32.mrf.mxu2 }
 0x13e   : > { %v844_v37 = vadd.f32 %v762_v35, %v630_v34  ;;  %595 = vmatmul.f32.gmra.mxu1 %v468_v33  ;;  %v260_v34 = vld [vmem:[%s4388_s26 + $0x110] sm:$0xff] }
 0x13f   : > { %v976_v38 = vpop.f32.mrf.mxu3 }
 0x140   : > { %v1058_v40 = vadd.f32 %v976_v38, %v844_v37  ;;  %v337_v41 = vpop.f32.mrf.mxu0  ;;  %v901_v37 = vld [vmem:[%s4388_s26 + $0x123] sm:$0xff] }
 0x141   : > { %v417_v43 = vadd.f32 %v4462_v36, %v337_v41  ;;  %v2345_v41 = vld [vmem:[#allocation5 + $0x570] sm:$0xff] }
 0x142   : > { %1094 = vst [vmem:[%s4474_s23 + $0x68] sm:$0xff] %v1058_v40  ;;  %812 = vmatmul.f32.gmra.mxu2 %v683_v39  ;;  %v473_v39 = vld [vmem:[%s4388_s26 + $0x111] sm:$0xff] }
 0x143   : > { %v551_v48 = vpop.f32.mrf.mxu1  ;;  %384 = vmatmul.f32.gmra.mxu0 %v256_v42  ;;  %2348 = vmatpush.msra.mxu2 %v2345_v41  ;;  %v3855_v41 = vld [vmem:[%s4388_s26 + $0x2b] sm:$0xff] }
 0x144   : > { %v631_v50 = vadd.f32 %v551_v48, %v417_v43  ;;  %1026 = vmatmul.f32.gmra.mxu3 %v897_v44  ;;  %v1953_v44 = vld [vmem:[#allocation5 + $0x470] sm:$0xff] }
 0x145   : > { %v765_v52 = vpop.f32.mrf.mxu2  ;;  %1956 = vmatpush.msra.mxu0 %v1953_v44  ;;  %v2557_v44 = vld [vmem:[#allocation5 + $0x5e0] sm:$0xff] }
 0x146   : > { %v845_v53 = vadd.f32 %v765_v52, %v631_v50  ;;  %598 = vmatmul.f32.gmra.mxu1 %v469_v49  ;;  %v261_v50 = vld [vmem:[%s4388_s26 + $0x118] sm:$0xff]  ;;  %v902_v52 = vld [vmem:[%s4388_s26 + $0x12b] sm:$0xff] }
 0x147   : > { %v979_v54 = vpop.f32.mrf.mxu3  ;;  %1957 = vmatpush.msra.mxu0 %v1952_v14  ;;  %v2128_v14 = vld [vmem:[#allocation5 + $0x4d8] sm:$0xff] }
 0x148   : > { %v1059_v56 = vadd.f32 %v979_v54, %v845_v53  ;;  %v340_v57 = vpop.f32.mrf.mxu0  ;;  %v2131_v53 = vld [vmem:[#allocation5 + $0x4f0] sm:$0xff] }
 0x149   : > { %v418_v59 = vadd.f32 %v4462_v36, %v340_v57  ;;  %2134 = vmatpush.msra.mxu1 %v2131_v53 }
 0x14a   : > { %1095 = vst [vmem:[%s4474_s23 + $0x70] sm:$0xff] %v1059_v56  ;;  %815 = vmatmul.f32.gmra.mxu2 %v684_v55  ;;  %v474_v55 = vld [vmem:[%s4388_s26 + $0x119] sm:$0xff] }
 0x14b   : > { %v554_v61 = vpop.f32.mrf.mxu1  ;;  %387 = vmatmul.f32.gmra.mxu0 %v257_v58 }
 0x14c   : > { %v632_v63 = vadd.f32 %v554_v61, %v418_v59  ;;  %1029 = vmatmul.f32.gmra.mxu3 %v898_v60 }
 0x14d   : > { %v768_v0 = vpop.f32.mrf.mxu2 }
 0x14e   : > { %v846_v1 = vadd.f32 %v768_v0, %v632_v63  ;;  %601 = vmatmul.f32.gmra.mxu1 %v470_v62  ;;  %v1687_v63 = vld [vmem:[%s4388_s26 + $0x14] sm:$0xff] }
 0x14f   : > { %v982_v2 = vpop.f32.mrf.mxu3  ;;  %v3849_v0 = vld [vmem:[%s4388_s26 + $0x13] sm:$0xff] }
 0x150   : > { %v1060_v4 = vadd.f32 %v982_v2, %v846_v1  ;;  %v343_v5 = vpop.f32.mrf.mxu0  ;;  %v3850_v2 = vld [vmem:[%s4388_s26 + $0x1] sm:$0xff] }
 0x151   : > { %v419_v7 = vadd.f32 %v4462_v36, %v343_v5 }
 0x152   : > { %1096 = vst [vmem:[%s4474_s23 + $0x78] sm:$0xff] %v1060_v4  ;;  %818 = vmatmul.f32.gmra.mxu2 %v685_v3  ;;  %v1295_v3 = vld [vmem:[%s4388_s26 + $0x2] sm:$0xff] }
 0x153   : > { %v557_v10 = vpop.f32.mrf.mxu1  ;;  %390 = vmatmul.f32.gmra.mxu0 %v258_v6 }
 0x154   : > { %v633_v12 = vadd.f32 %v557_v10, %v419_v7  ;;  %1032 = vmatmul.f32.gmra.mxu3 %v899_v8  ;;  %v2344_v7 = vld [vmem:[#allocation5 + $0x568] sm:$0xff] }
 0x155   : > { %v771_v15 = vpop.f32.mrf.mxu2  ;;  %2349 = vmatpush.msra.mxu2 %v2344_v7 }
 0x156   : > { %v847_v16 = vadd.f32 %v771_v15, %v633_v12  ;;  %604 = vmatmul.f32.gmra.mxu1 %v471_v11  ;;  %v1688_v12 = vld [vmem:[%s4388_s26 + $0x1c] sm:$0xff] }
 0x157   : > { %v985_v18 = vpop.f32.mrf.mxu3  ;;  %v2558_v15 = vld [vmem:[#allocation5 + $0x5e8] sm:$0xff] }
 0x158   : > { %v1061_v20 = vadd.f32 %v985_v18, %v847_v16  ;;  %v346_v21 = vpop.f32.mrf.mxu0  ;;  %v2130_v16 = vld [vmem:[#allocation5 + $0x4e8] sm:$0xff]  ;;  %2563 = vmatpush.msra.mxu3 %v2558_v15 }
 0x159   : > { %v420_v23 = vadd.f32 %v4462_v36, %v346_v21  ;;  %v3852_v18 = vld [vmem:[%s4388_s26 + $0x9] sm:$0xff]  ;;  %2135 = vmatpush.msra.mxu1 %v2130_v16 }
 0x15a   : > { %1097 = vst [vmem:[%s4474_s23 + $0x80] sm:$0xff] %v1061_v20  ;;  %821 = vmatmul.f32.gmra.mxu2 %v686_v19  ;;  %v1296_v19 = vld [vmem:[%s4388_s26 + $0xa] sm:$0xff]  ;;  %2564 = vmatpush.msra.mxu3 %v2557_v44 }
 0x15b   : > { %v560_v25 = vpop.f32.mrf.mxu1  ;;  %393 = vmatmul.f32.gmra.mxu0 %v259_v22 }
 0x15c   : > { %v634_v27 = vadd.f32 %v560_v25, %v420_v23  ;;  %1035 = vmatmul.f32.gmra.mxu3 %v900_v24 }
 0x15d   : > { %v774_v28 = vpop.f32.mrf.mxu2 }
 0x15e   : > { %v848_v29 = vadd.f32 %v774_v28, %v634_v27  ;;  %607 = vmatmul.f32.gmra.mxu1 %v472_v26  ;;  %v1689_v27 = vld [vmem:[%s4388_s26 + $0x24] sm:$0xff] }
 0x15f   : > { %v988_v30 = vpop.f32.mrf.mxu3  ;;  %v3853_v28 = vld [vmem:[%s4388_s26 + $0x23] sm:$0xff] }
 0x160   : > { %v1062_v32 = vadd.f32 %v988_v30, %v848_v29  ;;  %v349_v33 = vpop.f32.mrf.mxu0  ;;  %v3854_v30 = vld [vmem:[%s4388_s26 + $0x11] sm:$0xff] }
 0x161   : > { %v421_v35 = vadd.f32 %v4462_v36, %v349_v33 }
 0x162   : > { %1098 = vst [vmem:[%s4474_s23 + $0x88] sm:$0xff] %v1062_v32  ;;  %824 = vmatmul.f32.gmra.mxu2 %v687_v31  ;;  %v1297_v31 = vld [vmem:[%s4388_s26 + $0x12] sm:$0xff] }
 0x163   : > { %v563_v38 = vpop.f32.mrf.mxu1  ;;  %396 = vmatmul.f32.gmra.mxu0 %v260_v34 }
 0x164   : > { %v635_v40 = vadd.f32 %v563_v38, %v421_v35  ;;  %1038 = vmatmul.f32.gmra.mxu3 %v901_v37 }
 0x165   : > { %v777_v42 = vpop.f32.mrf.mxu2 }
 0x166   : > { %v849_v43 = vadd.f32 %v777_v42, %v635_v40  ;;  %610 = vmatmul.f32.gmra.mxu1 %v473_v39  ;;  %v1690_v40 = vld [vmem:[%s4388_s26 + $0x2c] sm:$0xff] }
 0x167   : > { %v991_v46 = vpop.f32.mrf.mxu3  ;;  %v2343_v42 = vld [vmem:[#allocation5 + $0x560] sm:$0xff] }
 0x168   : > { %v1063_v48 = vadd.f32 %v991_v46, %v849_v43  ;;  %v352_v49 = vpop.f32.mrf.mxu0  ;;  %v1951_v43 = vld [vmem:[#allocation5 + $0x460] sm:$0xff]  ;;  %v3856_v46 = vld [vmem:[%s4388_s26 + $0x19] sm:$0xff]  ;;  %2350 = vmatpush.msra.mxu2 %v2343_v42 }
 0x169   : > { %v422_v51 = vadd.f32 %v4462_v36, %v352_v49  ;;  %1958 = vmatpush.msra.mxu0 %v1951_v43  ;;  %v2129_v49 = vld [vmem:[#allocation5 + $0x4e0] sm:$0xff]  ;;  %v1949_v42 = vld [vmem:[#allocation5 + $0x450] sm:$0xff] }
 0x16a   : > { %1099 = vst [vmem:[%s4474_s23 + $0x90] sm:$0xff] %v1063_v48  ;;  %827 = vmatmul.f32.gmra.mxu2 %v688_v47  ;;  %v1298_v47 = vld [vmem:[%s4388_s26 + $0x1a] sm:$0xff]  ;;  %2136 = vmatpush.msra.mxu1 %v2129_v49 }
 0x16b   : > { %v566_v54 = vpop.f32.mrf.mxu1  ;;  %399 = vmatmul.f32.gmra.mxu0 %v261_v50  ;;  %v2555_v43 = vld [vmem:[#allocation5 + $0x5d0] sm:$0xff] }
 0x16c   : > { %v636_v56 = vadd.f32 %v566_v54, %v422_v51  ;;  %1041 = vmatmul.f32.gmra.mxu3 %v902_v52  ;;  %2137 = vmatpush.msra.mxu1 %v2128_v14  ;;  %v3866_v49 = vld [vmem:[%s4388_s26 + $0x53] sm:$0xff] }
 0x16d   : > { %v780_v57 = vpop.f32.mrf.mxu2 }
 0x16e   : > { %v850_v58 = vadd.f32 %v780_v57, %v636_v56  ;;  %613 = vmatmul.f32.gmra.mxu1 %v474_v55  ;;  %v1691_v56 = vld [vmem:[%s4388_s26 + $0x34] sm:$0xff] }
 0x16f   : > { %v994_v59 = vpop.f32.mrf.mxu3  ;;  %v3857_v57 = vld [vmem:[%s4388_s26 + $0x33] sm:$0xff] }
 0x170   : > { %v1064_v60 = vadd.f32 %v994_v59, %v850_v58  ;;  %v355_v61 = vpop.f32.mrf.mxu0  ;;  %v3858_v59 = vld [vmem:[%s4388_s26 + $0x21] sm:$0xff] }
 0x171   : > { %v423_v62 = vadd.f32 %v4462_v36, %v355_v61 }
 0x172   : > { %1100 = vst [vmem:[%s4474_s23 + $0x98] sm:$0xff] %v1064_v60  ;;  %1542 = vmatmul.f32.vlgmr.msrb.gmra.mxu2 %v3849_v0  ;;  %v1299_v60 = vld [vmem:[%s4388_s26 + $0x22] sm:$0xff] }
 0x173   : > { %v569_v1 = vpop.f32.mrf.mxu1  ;;  %1150 = vmatmul.f32.vlgmr.msrb.gmra.mxu0 %v3850_v2 }
 0x174   : > { %v637_v4 = vadd.f32 %v569_v1, %v423_v62  ;;  %1756 = vmatmul.f32.vlgmr.msrb.gmra.mxu3 %v1687_v63 }
 0x175   : > { %v783_v5 = vpop.f32.mrf.mxu2 }
 0x176   : > { %v851_v6 = vadd.f32 %v783_v5, %v637_v4  ;;  %1364 = vmatmul.f32.vlgmr.msrb.gmra.mxu1 %v1295_v3  ;;  %v1692_v4 = vld [vmem:[%s4388_s26 + $0x3c] sm:$0xff] }
 0x177   : > { %v997_v8 = vpop.f32.mrf.mxu3  ;;  %v3859_v5 = vld [vmem:[%s4388_s26 + $0x3b] sm:$0xff] }
 0x178   : > { %v1065_v9 = vadd.f32 %v997_v8, %v851_v6  ;;  %v358_v10 = vpop.f32.mrf.mxu0  ;;  %v2342_v6 = vld [vmem:[#allocation5 + $0x558] sm:$0xff] }
 0x179   : > { %v424_v11 = vadd.f32 %v4462_v36, %v358_v10  ;;  %v3860_v8 = vld [vmem:[%s4388_s26 + $0x29] sm:$0xff]  ;;  %2351 = vmatpush.msra.mxu2 %v2342_v6 }
 0x17a   : > { %1101 = vst [vmem:[%s4474_s23 + $0xa0] sm:$0xff] %v1065_v9  ;;  %1545 = vmatmul.f32.gmra.mxu2 %v3851_v13  ;;  %v1300_v9 = vld [vmem:[%s4388_s26 + $0x2a] sm:$0xff] }
 0x17b   : > { %v572_v17 = vpop.f32.mrf.mxu1  ;;  %1153 = vmatmul.f32.gmra.mxu0 %v3852_v18  ;;  %v4622_v18 = vld [vmem:[#allocation7] ss:$0 sm:$0xff] }
 0x17c   : > { %v638_v20 = vadd.f32 %v572_v17, %v424_v11  ;;  %1759 = vmatmul.f32.gmra.mxu3 %v1688_v12  ;;  %v1950_v11 = vld [vmem:[#allocation5 + $0x458] sm:$0xff] }
 0x17d   : > { %v786_v21 = vpop.f32.mrf.mxu2  ;;  %v2556_v12 = vld [vmem:[#allocation5 + $0x5d8] sm:$0xff]  ;;  %1959 = vmatpush.msra.mxu0 %v1950_v11 }
 0x17e   : > { %v852_v22 = vadd.f32 %v786_v21, %v638_v20  ;;  %1367 = vmatmul.f32.gmra.mxu1 %v1296_v19  ;;  %2565 = vmatpush.msra.mxu3 %v2556_v12  ;;  %v1693_v20 = vld [vmem:[%s4388_s26 + $0x44] sm:$0xff]  ;;  %v1948_v12 = vld [vmem:[#allocation5 + $0x448] sm:$0xff] }
 0x17f   : > { %v1000_v23 = vpop.f32.mrf.mxu3  ;;  %v3862_v21 = vld [vmem:[%s4388_s26 + $0x43] sm:$0xff]  ;;  %1960 = vmatpush.msra.mxu0 %v1949_v42 }
 0x180   : > { %v1066_v24 = vadd.f32 %v1000_v23, %v852_v22  ;;  %v361_v25 = vpop.f32.mrf.mxu0  ;;  %v3863_v23 = vld [vmem:[%s4388_s26 + $0x31] sm:$0xff]  ;;  %2566 = vmatpush.msra.mxu3 %v2555_v43  ;;  %v3870_v11 = vld [vmem:[%s4388_s26 + $0x63] sm:$0xff] }
 0x181   : > { %v425_v26 = vadd.f32 %v4462_v36, %v361_v25  ;;  %1961 = vmatpush.msra.mxu0 %v1948_v12  ;;  %v2553_v42 = vld [vmem:[#allocation5 + $0x5c0] sm:$0xff] }
 0x182   : > { %1102 = vst [vmem:[%s4474_s23 + $0xa8] sm:$0xff] %v1066_v24  ;;  %1548 = vmatmul.f32.gmra.mxu2 %v3853_v28  ;;  %v1301_v24 = vld [vmem:[%s4388_s26 + $0x32] sm:$0xff] }
 0x183   : > { %v575_v29 = vpop.f32.mrf.mxu1  ;;  %1156 = vmatmul.f32.gmra.mxu0 %v3854_v30 }
 0x184   : > { %v639_v32 = vadd.f32 %v575_v29, %v425_v26  ;;  %1762 = vmatmul.f32.gmra.mxu3 %v1689_v27 }
 0x185   : > { %v789_v33 = vpop.f32.mrf.mxu2 }
 0x186   : > { %v853_v34 = vadd.f32 %v789_v33, %v639_v32  ;;  %1370 = vmatmul.f32.gmra.mxu1 %v1297_v31  ;;  %v1694_v32 = vld [vmem:[%s4388_s26 + $0x4c] sm:$0xff] }
 0x187   : > { %v1003_v35 = vpop.f32.mrf.mxu3  ;;  %v3864_v33 = vld [vmem:[%s4388_s26 + $0x4b] sm:$0xff] }
 0x188   : > { %v1067_v37 = vadd.f32 %v1003_v35, %v853_v34  ;;  %v364_v38 = vpop.f32.mrf.mxu0  ;;  %v3865_v35 = vld [vmem:[%s4388_s26 + $0x39] sm:$0xff] }
 0x189   : > { %v426_v39 = vadd.f32 %v4462_v36, %v364_v38 }
 0x18a   : > { %1103 = vst [vmem:[%s4474_s23 + $0xb0] sm:$0xff] %v1067_v37  ;;  %1551 = vmatmul.f32.gmra.mxu2 %v3855_v41  ;;  %v1302_v37 = vld [vmem:[%s4388_s26 + $0x3a] sm:$0xff] }
 0x18b   : > { %v578_v45 = vpop.f32.mrf.mxu1  ;;  %1159 = vmatmul.f32.gmra.mxu0 %v3856_v46 }
 0x18c   : > { %v640_v48 = vadd.f32 %v578_v45, %v426_v39  ;;  %1765 = vmatmul.f32.gmra.mxu3 %v1690_v40  ;;  %v2341_v39 = vld [vmem:[#allocation5 + $0x550] sm:$0xff] }
 0x18d   : > { %v792_v50 = vpop.f32.mrf.mxu2  ;;  %2352 = vmatpush.msra.mxu2 %v2341_v39  ;;  %v3874_v39 = vld [vmem:[%s4388_s26 + $0x73] sm:$0xff] }
 0x18e   : > { %v854_v51 = vadd.f32 %v792_v50, %v640_v48  ;;  %1373 = vmatmul.f32.gmra.mxu1 %v1298_v47  ;;  %v1695_v48 = vld [vmem:[%s4388_s26 + $0x54] sm:$0xff] }
 0x18f   : > { %v1006_v52 = vpop.f32.mrf.mxu3  ;;  %v2127_v50 = vld [vmem:[#allocation5 + $0x4d0] sm:$0xff] }
 0x190   : > { %v1068_v53 = vadd.f32 %v1006_v52, %v854_v51  ;;  %v367_v54 = vpop.f32.mrf.mxu0  ;;  %v3867_v52 = vld [vmem:[%s4388_s26 + $0x41] sm:$0xff]  ;;  %2138 = vmatpush.msra.mxu1 %v2127_v50 }
 0x191   : > { %v427_v55 = vadd.f32 %v4462_v36, %v367_v54 }
 0x192   : > { %1104 = vst [vmem:[%s4474_s23 + $0xb8] sm:$0xff] %v1068_v53  ;;  %1554 = vmatmul.f32.gmra.mxu2 %v3857_v57  ;;  %v1303_v53 = vld [vmem:[%s4388_s26 + $0x42] sm:$0xff] }
 0x193   : > { %v581_v58 = vpop.f32.mrf.mxu1  ;;  %1162 = vmatmul.f32.gmra.mxu0 %v3858_v59 }
 0x194   : > { %v641_v61 = vadd.f32 %v581_v58, %v427_v55  ;;  %1768 = vmatmul.f32.gmra.mxu3 %v1691_v56 }
 0x195   : > { %v795_v62 = vpop.f32.mrf.mxu2 }
 0x196   : > { %v855_v63 = vadd.f32 %v795_v62, %v641_v61  ;;  %1376 = vmatmul.f32.gmra.mxu1 %v1299_v60  ;;  %v1696_v61 = vld [vmem:[%s4388_s26 + $0x5c] sm:$0xff] }
 0x197   : > { %v1009_v0 = vpop.f32.mrf.mxu3  ;;  %v3868_v62 = vld [vmem:[%s4388_s26 + $0x5b] sm:$0xff] }
 0x198   : > { %v1069_v1 = vadd.f32 %v1009_v0, %v855_v63  ;;  %v370_v2 = vpop.f32.mrf.mxu0  ;;  %v3869_v0 = vld [vmem:[%s4388_s26 + $0x49] sm:$0xff] }
 0x199   : > { %v428_v3 = vadd.f32 %v4462_v36, %v370_v2 }
 0x19a   : > { %1105 = vst [vmem:[%s4474_s23 + $0xc0] sm:$0xff] %v1069_v1  ;;  %1557 = vmatmul.f32.gmra.mxu2 %v3859_v5  ;;  %v1304_v1 = vld [vmem:[%s4388_s26 + $0x4a] sm:$0xff] }
 0x19b   : > { %v584_v7 = vpop.f32.mrf.mxu1  ;;  %1165 = vmatmul.f32.gmra.mxu0 %v3860_v8  ;;  %v2340_v5 = vld [vmem:[#allocation5 + $0x548] sm:$0xff] }
 0x19c   : > { %v642_v10 = vadd.f32 %v584_v7, %v428_v3  ;;  %1771 = vmatmul.f32.gmra.mxu3 %v1692_v4  ;;  %2353 = vmatpush.msra.mxu2 %v2340_v5 }
 0x19d   : > { %v798_v13 = vpop.f32.mrf.mxu2 }
 0x19e   : > { %v856_v36 = vadd.f32 %v798_v13, %v642_v10  ;;  %1379 = vmatmul.f32.gmra.mxu1 %v1300_v9  ;;  %v1697_v10 = vld [vmem:[%s4388_s26 + $0x64] sm:$0xff]  ;;  %v2554_v13 = vld [vmem:[#allocation5 + $0x5c8] sm:$0xff] }
 0x19f   : > { %v1012_v15 = vpop.f32.mrf.mxu3  ;;  %2567 = vmatpush.msra.mxu3 %v2554_v13  ;;  %v2124_v13 = vld [vmem:[#allocation5 + $0x4b8] sm:$0xff] }
 0x1a0   : > { %v1070_v16 = vadd.f32 %v1012_v15, %v856_v36  ;;  %v373_v17 = vpop.f32.mrf.mxu0  ;;  %v2126_v36 = vld [vmem:[#allocation5 + $0x4c8] sm:$0xff] }
 0x1a1   : > { %v429_v19 = vadd.f32 %v4622_v18, %v373_v17  ;;  %v3871_v15 = vld [vmem:[%s4388_s26 + $0x51] sm:$0xff]  ;;  %2139 = vmatpush.msra.mxu1 %v2126_v36  ;;  %2568 = vmatpush.msra.mxu3 %v2553_v42 }
 0x1a2   : > { %1106 = vst [vmem:[%s4474_s23 + $0xc8] sm:$0xff] %v1070_v16  ;;  %1560 = vmatmul.f32.gmra.mxu2 %v3862_v21  ;;  %v1305_v16 = vld [vmem:[%s4388_s26 + $0x52] sm:$0xff] }
 0x1a3   : > { %v587_v22 = vpop.f32.mrf.mxu1  ;;  %1168 = vmatmul.f32.gmra.mxu0 %v3863_v23 }
 0x1a4   : > { %v643_v25 = vadd.f32 %v587_v22, %v429_v19  ;;  %1774 = vmatmul.f32.gmra.mxu3 %v1693_v20 }
 0x1a5   : > { %v801_v26 = vpop.f32.mrf.mxu2 }
 0x1a6   : > { %v857_v27 = vadd.f32 %v801_v26, %v643_v25  ;;  %1382 = vmatmul.f32.gmra.mxu1 %v1301_v24  ;;  %v1698_v25 = vld [vmem:[%s4388_s26 + $0x6c] sm:$0xff] }
 0x1a7   : > { %v1015_v28 = vpop.f32.mrf.mxu3  ;;  %v3872_v26 = vld [vmem:[%s4388_s26 + $0x6b] sm:$0xff] }
 0x1a8   : > { %v1071_v29 = vadd.f32 %v1015_v28, %v857_v27  ;;  %v376_v30 = vpop.f32.mrf.mxu0  ;;  %v3873_v28 = vld [vmem:[%s4388_s26 + $0x59] sm:$0xff] }
 0x1a9   : > { %v430_v31 = vadd.f32 %v4622_v18, %v376_v30 }
 0x1aa   : > { %1107 = vst [vmem:[%s4474_s23 + $0xd0] sm:$0xff] %v1071_v29  ;;  %1563 = vmatmul.f32.gmra.mxu2 %v3864_v33  ;;  %v1306_v29 = vld [vmem:[%s4388_s26 + $0x5a] sm:$0xff] }
 0x1ab   : > { %v590_v34 = vpop.f32.mrf.mxu1  ;;  %1171 = vmatmul.f32.gmra.mxu0 %v3865_v35 }
 0x1ac   : > { %v644_v38 = vadd.f32 %v590_v34, %v430_v31  ;;  %1777 = vmatmul.f32.gmra.mxu3 %v1694_v32 }
 0x1ad   : > { %v804_v40 = vpop.f32.mrf.mxu2 }
 0x1ae   : > { %v858_v41 = vadd.f32 %v804_v40, %v644_v38  ;;  %1385 = vmatmul.f32.gmra.mxu1 %v1302_v37  ;;  %v1699_v38 = vld [vmem:[%s4388_s26 + $0x74] sm:$0xff] }
 0x1af   : > { %v1018_v44 = vpop.f32.mrf.mxu3  ;;  %v2339_v40 = vld [vmem:[#allocation5 + $0x540] sm:$0xff] }
 0x1b0   : > { %v1072_v45 = vadd.f32 %v1018_v44, %v858_v41  ;;  %v379_v46 = vpop.f32.mrf.mxu0  ;;  %v1947_v41 = vld [vmem:[#allocation5 + $0x440] sm:$0xff]  ;;  %2354 = vmatpush.msra.mxu2 %v2339_v40  ;;  %v1945_v40 = vld [vmem:[#allocation5 + $0x430] sm:$0xff] }
 0x1b1   : > { %v431_v47 = vadd.f32 %v4622_v18, %v379_v46  ;;  %v3875_v44 = vld [vmem:[%s4388_s26 + $0x61] sm:$0xff]  ;;  %1962 = vmatpush.msra.mxu0 %v1947_v41 }
 0x1b2   : > { %1108 = vst [vmem:[%s4474_s23 + $0xd8] sm:$0xff] %v1072_v45  ;;  %1566 = vmatmul.f32.gmra.mxu2 %v3866_v49  ;;  %v1307_v45 = vld [vmem:[%s4388_s26 + $0x62] sm:$0xff] }
 0x1b3   : > { %v593_v51 = vpop.f32.mrf.mxu1  ;;  %1174 = vmatmul.f32.gmra.mxu0 %v3867_v52  ;;  %v2551_v41 = vld [vmem:[#allocation5 + $0x5b0] sm:$0xff] }
 0x1b4   : > { %v645_v54 = vadd.f32 %v593_v51, %v431_v47  ;;  %1780 = vmatmul.f32.gmra.mxu3 %v1695_v48  ;;  %v2125_v47 = vld [vmem:[#allocation5 + $0x4c0] sm:$0xff] }
 0x1b5   : > { %v807_v55 = vpop.f32.mrf.mxu2  ;;  %2140 = vmatpush.msra.mxu1 %v2125_v47  ;;  %v3884_v47 = vld [vmem:[%s4388_s26 + $0x9b] sm:$0xff] }
 0x1b6   : > { %v859_v56 = vadd.f32 %v807_v55, %v645_v54  ;;  %1388 = vmatmul.f32.gmra.mxu1 %v1303_v53  ;;  %v1700_v54 = vld [vmem:[%s4388_s26 + $0x7c] sm:$0xff] }
 0x1b7   : > { %v1021_v57 = vpop.f32.mrf.mxu3  ;;  %v3876_v55 = vld [vmem:[%s4388_s26 + $0x7b] sm:$0xff]  ;;  %2141 = vmatpush.msra.mxu1 %v2124_v13 }
 0x1b8   : > { %v1073_v58 = vadd.f32 %v1021_v57, %v859_v56  ;;  %v382_v59 = vpop.f32.mrf.mxu0  ;;  %v3877_v57 = vld [vmem:[%s4388_s26 + $0x69] sm:$0xff] }
 0x1b9   : > { %v432_v60 = vadd.f32 %v4622_v18, %v382_v59 }
 0x1ba   : > { %1109 = vst [vmem:[%s4474_s23 + $0xe0] sm:$0xff] %v1073_v58  ;;  %1569 = vmatmul.f32.gmra.mxu2 %v3868_v62  ;;  %v1308_v58 = vld [vmem:[%s4388_s26 + $0x6a] sm:$0xff] }
 0x1bb   : > { %v596_v63 = vpop.f32.mrf.mxu1  ;;  %1177 = vmatmul.f32.gmra.mxu0 %v3869_v0 }
 0x1bc   : > { %v646_v2 = vadd.f32 %v596_v63, %v432_v60  ;;  %1783 = vmatmul.f32.gmra.mxu3 %v1696_v61 }
 0x1bd   : > { %v810_v3 = vpop.f32.mrf.mxu2 }
 0x1be   : > { %v860_v4 = vadd.f32 %v810_v3, %v646_v2  ;;  %1391 = vmatmul.f32.gmra.mxu1 %v1304_v1  ;;  %v1701_v2 = vld [vmem:[%s4388_s26 + $0x84] sm:$0xff] }
 0x1bf   : > { %v1024_v6 = vpop.f32.mrf.mxu3  ;;  %v3878_v3 = vld [vmem:[%s4388_s26 + $0x83] sm:$0xff] }
 0x1c0   : > { %v1074_v7 = vadd.f32 %v1024_v6, %v860_v4  ;;  %v385_v8 = vpop.f32.mrf.mxu0  ;;  %v2338_v4 = vld [vmem:[#allocation5 + $0x538] sm:$0xff]  ;;  %v3879_v6 = vld [vmem:[%s4388_s26 + $0x71] sm:$0xff] }
 0x1c1   : > { %v433_v9 = vadd.f32 %v4622_v18, %v385_v8  ;;  %2355 = vmatpush.msra.mxu2 %v2338_v4 }
 0x1c2   : > { %1110 = vst [vmem:[%s4474_s23 + $0xe8] sm:$0xff] %v1074_v7  ;;  %1572 = vmatmul.f32.gmra.mxu2 %v3870_v11  ;;  %v1309_v7 = vld [vmem:[%s4388_s26 + $0x72] sm:$0xff] }
 0x1c3   : > { %v599_v14 = vpop.f32.mrf.mxu1  ;;  %1180 = vmatmul.f32.gmra.mxu0 %v3871_v15 }
 0x1c4   : > { %v647_v17 = vadd.f32 %v599_v14, %v433_v9  ;;  %1786 = vmatmul.f32.gmra.mxu3 %v1697_v10  ;;  %v1946_v9 = vld [vmem:[#allocation5 + $0x438] sm:$0xff] }
 0x1c5   : > { %v813_v19 = vpop.f32.mrf.mxu2  ;;  %v2552_v10 = vld [vmem:[#allocation5 + $0x5b8] sm:$0xff]  ;;  %1963 = vmatpush.msra.mxu0 %v1946_v9 }
 0x1c6   : > { %v861_v20 = vadd.f32 %v813_v19, %v647_v17  ;;  %1394 = vmatmul.f32.gmra.mxu1 %v1305_v16  ;;  %2569 = vmatpush.msra.mxu3 %v2552_v10  ;;  %v1702_v17 = vld [vmem:[%s4388_s26 + $0x8c] sm:$0xff] }
 0x1c7   : > { %v1027_v21 = vpop.f32.mrf.mxu3  ;;  %v3880_v19 = vld [vmem:[%s4388_s26 + $0x8b] sm:$0xff]  ;;  %1964 = vmatpush.msra.mxu0 %v1945_v40 }
 0x1c8   : > { %v1075_v22 = vadd.f32 %v1027_v21, %v861_v20  ;;  %v388_v23 = vpop.f32.mrf.mxu0  ;;  %v3881_v21 = vld [vmem:[%s4388_s26 + $0x79] sm:$0xff]  ;;  %2570 = vmatpush.msra.mxu3 %v2551_v41  ;;  %v3888_v9 = vld [vmem:[%s4388_s26 + $0xab] sm:$0xff] }
 0x1c9   : > { %v434_v24 = vadd.f32 %v4622_v18, %v388_v23  ;;  %v1944_v10 = vld [vmem:[#allocation5 + $0x428] sm:$0xff]  ;;  %v2549_v40 = vld [vmem:[#allocation5 + $0x5a0] sm:$0xff] }
 0x1ca   : > { %1111 = vst [vmem:[%s4474_s23 + $0xf0] sm:$0xff] %v1075_v22  ;;  %1575 = vmatmul.f32.gmra.mxu2 %v3872_v26  ;;  %v1310_v22 = vld [vmem:[%s4388_s26 + $0x7a] sm:$0xff]  ;;  %1965 = vmatpush.msra.mxu0 %v1944_v10 }
 0x1cb   : > { %v602_v27 = vpop.f32.mrf.mxu1  ;;  %1183 = vmatmul.f32.gmra.mxu0 %v3873_v28 }
 0x1cc   : > { %v648_v30 = vadd.f32 %v602_v27, %v434_v24  ;;  %1789 = vmatmul.f32.gmra.mxu3 %v1698_v25 }
 0x1cd   : > { %v816_v31 = vpop.f32.mrf.mxu2 }
 0x1ce   : > { %v862_v32 = vadd.f32 %v816_v31, %v648_v30  ;;  %1397 = vmatmul.f32.gmra.mxu1 %v1306_v29  ;;  %v1703_v30 = vld [vmem:[%s4388_s26 + $0x94] sm:$0xff] }
 0x1cf   : > { %v1030_v33 = vpop.f32.mrf.mxu3  ;;  %v3882_v31 = vld [vmem:[%s4388_s26 + $0x93] sm:$0xff] }
 0x1d0   : > { %v1076_v34 = vadd.f32 %v1030_v33, %v862_v32  ;;  %v391_v35 = vpop.f32.mrf.mxu0  ;;  %v3883_v33 = vld [vmem:[%s4388_s26 + $0x81] sm:$0xff] }
 0x1d1   : > { %v435_v37 = vadd.f32 %v4622_v18, %v391_v35 }
 0x1d2   : > { %1112 = vst [vmem:[%s4474_s23 + $0xf8] sm:$0xff] %v1076_v34  ;;  %1578 = vmatmul.f32.gmra.mxu2 %v3874_v39  ;;  %v1311_v34 = vld [vmem:[%s4388_s26 + $0x82] sm:$0xff] }
 0x1d3   : > { %v605_v43 = vpop.f32.mrf.mxu1  ;;  %1186 = vmatmul.f32.gmra.mxu0 %v3875_v44 }
 0x1d4   : > { %v649_v46 = vadd.f32 %v605_v43, %v435_v37  ;;  %1792 = vmatmul.f32.gmra.mxu3 %v1699_v38  ;;  %v2337_v37 = vld [vmem:[#allocation5 + $0x530] sm:$0xff] }
 0x1d5   : > { %v819_v48 = vpop.f32.mrf.mxu2  ;;  %2356 = vmatpush.msra.mxu2 %v2337_v37  ;;  %v3892_v37 = vld [vmem:[%s4388_s26 + $0xbb] sm:$0xff] }
 0x1d6   : > { %v863_v49 = vadd.f32 %v819_v48, %v649_v46  ;;  %1400 = vmatmul.f32.gmra.mxu1 %v1307_v45  ;;  %v1704_v46 = vld [vmem:[%s4388_s26 + $0x9c] sm:$0xff] }
 0x1d7   : > { %v1033_v50 = vpop.f32.mrf.mxu3  ;;  %v2123_v48 = vld [vmem:[#allocation5 + $0x4b0] sm:$0xff] }
 0x1d8   : > { %v1077_v51 = vadd.f32 %v1033_v50, %v863_v49  ;;  %v394_v52 = vpop.f32.mrf.mxu0  ;;  %v3885_v50 = vld [vmem:[%s4388_s26 + $0x89] sm:$0xff]  ;;  %2142 = vmatpush.msra.mxu1 %v2123_v48 }
 0x1d9   : > { %v436_v53 = vadd.f32 %v4622_v18, %v394_v52 }
 0x1da   : > { %1113 = vst [vmem:[%s4474_s23 + $0x100] sm:$0xff] %v1077_v51  ;;  %1581 = vmatmul.f32.gmra.mxu2 %v3876_v55  ;;  %v1312_v51 = vld [vmem:[%s4388_s26 + $0x8a] sm:$0xff] }
 0x1db   : > { %v608_v56 = vpop.f32.mrf.mxu1  ;;  %1189 = vmatmul.f32.gmra.mxu0 %v3877_v57 }
 0x1dc   : > { %v650_v59 = vadd.f32 %v608_v56, %v436_v53  ;;  %1795 = vmatmul.f32.gmra.mxu3 %v1700_v54 }
 0x1dd   : > { %v822_v60 = vpop.f32.mrf.mxu2 }
 0x1de   : > { %v864_v61 = vadd.f32 %v822_v60, %v650_v59  ;;  %1403 = vmatmul.f32.gmra.mxu1 %v1308_v58  ;;  %v1705_v59 = vld [vmem:[%s4388_s26 + $0xa4] sm:$0xff] }
 0x1df   : > { %v1036_v62 = vpop.f32.mrf.mxu3  ;;  %v3886_v60 = vld [vmem:[%s4388_s26 + $0xa3] sm:$0xff] }
 0x1e0   : > { %v1078_v63 = vadd.f32 %v1036_v62, %v864_v61  ;;  %v397_v0 = vpop.f32.mrf.mxu0  ;;  %v3887_v62 = vld [vmem:[%s4388_s26 + $0x91] sm:$0xff] }
 0x1e1   : > { %v437_v1 = vadd.f32 %v4622_v18, %v397_v0 }
 0x1e2   : > { %1114 = vst [vmem:[%s4474_s23 + $0x108] sm:$0xff] %v1078_v63  ;;  %1584 = vmatmul.f32.gmra.mxu2 %v3878_v3  ;;  %v1313_v63 = vld [vmem:[%s4388_s26 + $0x92] sm:$0xff] }
 0x1e3   : > { %v611_v5 = vpop.f32.mrf.mxu1  ;;  %1192 = vmatmul.f32.gmra.mxu0 %v3879_v6  ;;  %v2336_v3 = vld [vmem:[#allocation5 + $0x528] sm:$0xff] }
 0x1e4   : > { %v651_v8 = vadd.f32 %v611_v5, %v437_v1  ;;  %1798 = vmatmul.f32.gmra.mxu3 %v1701_v2  ;;  %2357 = vmatpush.msra.mxu2 %v2336_v3 }
 0x1e5   : > { %v825_v11 = vpop.f32.mrf.mxu2 }
 0x1e6   : > { %v865_v12 = vadd.f32 %v825_v11, %v651_v8  ;;  %1406 = vmatmul.f32.gmra.mxu1 %v1309_v7  ;;  %v1706_v8 = vld [vmem:[%s4388_s26 + $0xac] sm:$0xff] }
 0x1e7   : > { %v1039_v36 = vpop.f32.mrf.mxu3  ;;  %v2550_v11 = vld [vmem:[#allocation5 + $0x5a8] sm:$0xff] }
 0x1e8   : > { %v1079_v14 = vadd.f32 %v1039_v36, %v865_v12  ;;  %v400_v15 = vpop.f32.mrf.mxu0  ;;  %v2122_v12 = vld [vmem:[#allocation5 + $0x4a8] sm:$0xff]  ;;  %2571 = vmatpush.msra.mxu3 %v2550_v11  ;;  %v2120_v11 = vld [vmem:[#allocation5 + $0x498] sm:$0xff] }
 0x1e9   : > { %v438_v16 = vadd.f32 %v4622_v18, %v400_v15  ;;  %v3889_v36 = vld [vmem:[%s4388_s26 + $0x99] sm:$0xff]  ;;  %2143 = vmatpush.msra.mxu1 %v2122_v12 }
 0x1ea   : > { %1115 = vst [vmem:[%s4474_s23 + $0x110] sm:$0xff] %v1079_v14  ;;  %1587 = vmatmul.f32.gmra.mxu2 %v3880_v19  ;;  %v1314_v14 = vld [vmem:[%s4388_s26 + $0x9a] sm:$0xff]  ;;  %2572 = vmatpush.msra.mxu3 %v2549_v40 }
 0x1eb   : > { %v614_v20 = vpop.f32.mrf.mxu1  ;;  %1195 = vmatmul.f32.gmra.mxu0 %v3881_v21 }
 0x1ec   : > { %v652_v23 = vadd.f32 %v614_v20, %v438_v16  ;;  %1801 = vmatmul.f32.gmra.mxu3 %v1702_v17 }
 0x1ed   : > { %v828_v24 = vpop.f32.mrf.mxu2 }
 0x1ee   : > { %v866_v25 = vadd.f32 %v828_v24, %v652_v23  ;;  %1409 = vmatmul.f32.gmra.mxu1 %v1310_v22  ;;  %v1707_v23 = vld [vmem:[%s4388_s26 + $0xb4] sm:$0xff] }
 0x1ef   : > { %v1042_v26 = vpop.f32.mrf.mxu3  ;;  %v3890_v24 = vld [vmem:[%s4388_s26 + $0xb3] sm:$0xff] }
 0x1f0   : > { %v1080_v27 = vadd.f32 %v1042_v26, %v866_v25  ;;  %v1151_v28 = vpop.f32.mrf.mxu0  ;;  %v3891_v26 = vld [vmem:[%s4388_s26 + $0xa1] sm:$0xff] }
 0x1f1   : > { %v1259_v29 = vadd.f32 %v4622_v18, %v1151_v28 }
 0x1f2   : > { %1116 = vst [vmem:[%s4474_s23 + $0x118] sm:$0xff] %v1080_v27  ;;  %1590 = vmatmul.f32.gmra.mxu2 %v3882_v31  ;;  %v1315_v27 = vld [vmem:[%s4388_s26 + $0xa2] sm:$0xff] }
 0x1f3   : > { %v1365_v32 = vpop.f32.mrf.mxu1  ;;  %1198 = vmatmul.f32.gmra.mxu0 %v3883_v33 }
 0x1f4   : > { %v1473_v35 = vadd.f32 %v1365_v32, %v1259_v29  ;;  %1804 = vmatmul.f32.gmra.mxu3 %v1703_v30 }
 0x1f5   : > { %v1543_v38 = vpop.f32.mrf.mxu2 }
 0x1f6   : > { %v1651_v39 = vadd.f32 %v1543_v38, %v1473_v35  ;;  %1412 = vmatmul.f32.gmra.mxu1 %v1311_v34  ;;  %v1708_v35 = vld [vmem:[%s4388_s26 + $0xbc] sm:$0xff]  ;;  %v2335_v38 = vld [vmem:[#allocation5 + $0x520] sm:$0xff] }
 0x1f7   : > { %v1757_v42 = vpop.f32.mrf.mxu3  ;;  %2358 = vmatpush.msra.mxu2 %v2335_v38  ;;  %v1941_v38 = vld [vmem:[#allocation5 + $0x410] sm:$0xff] }
 0x1f8   : > { %v1865_v43 = vadd.f32 %v1757_v42, %v1651_v39  ;;  %v1154_v44 = vpop.f32.mrf.mxu0  ;;  %v1943_v39 = vld [vmem:[#allocation5 + $0x420] sm:$0xff] }
 0x1f9   : > { %v1260_v45 = vadd.f32 %v4622_v18, %v1154_v44  ;;  %v3893_v42 = vld [vmem:[%s4388_s26 + $0xa9] sm:$0xff]  ;;  %1966 = vmatpush.msra.mxu0 %v1943_v39  ;;  %v2547_v39 = vld [vmem:[#allocation5 + $0x590] sm:$0xff] }
 0x1fa   : > { %3661 = vst [vmem:[%s4474_s23 + $0x120] sm:$0xff] %v1865_v43  ;;  %1593 = vmatmul.f32.gmra.mxu2 %v3884_v47  ;;  %v1316_v43 = vld [vmem:[%s4388_s26 + $0xaa] sm:$0xff] }
 0x1fb   : > { %v1368_v49 = vpop.f32.mrf.mxu1  ;;  %1201 = vmatmul.f32.gmra.mxu0 %v3885_v50 }
 0x1fc   : > { %v1474_v52 = vadd.f32 %v1368_v49, %v1260_v45  ;;  %1807 = vmatmul.f32.gmra.mxu3 %v1704_v46  ;;  %v2121_v45 = vld [vmem:[#allocation5 + $0x4a0] sm:$0xff] }
 0x1fd   : > { %v1546_v53 = vpop.f32.mrf.mxu2  ;;  %2144 = vmatpush.msra.mxu1 %v2121_v45  ;;  %v3902_v45 = vld [vmem:[%s4388_s26 + $0xe3] sm:$0xff] }
 0x1fe   : > { %v1652_v54 = vadd.f32 %v1546_v53, %v1474_v52  ;;  %1415 = vmatmul.f32.gmra.mxu1 %v1312_v51  ;;  %v1709_v52 = vld [vmem:[%s4388_s26 + $0xc4] sm:$0xff] }
 0x1ff   : > { %v1760_v55 = vpop.f32.mrf.mxu3  ;;  %v3894_v53 = vld [vmem:[%s4388_s26 + $0xc3] sm:$0xff]  ;;  %2145 = vmatpush.msra.mxu1 %v2120_v11 }
 0x200   : > { %v1866_v56 = vadd.f32 %v1760_v55, %v1652_v54  ;;  %v1157_v57 = vpop.f32.mrf.mxu0  ;;  %v3895_v55 = vld [vmem:[%s4388_s26 + $0xb1] sm:$0xff] }
 0x201   : > { %v1261_v58 = vadd.f32 %v4622_v18, %v1157_v57 }
 0x202   : > { %3662 = vst [vmem:[%s4474_s23 + $0x128] sm:$0xff] %v1866_v56  ;;  %1596 = vmatmul.f32.gmra.mxu2 %v3886_v60  ;;  %v1317_v56 = vld [vmem:[%s4388_s26 + $0xb2] sm:$0xff] }
 0x203   : > { %v1371_v61 = vpop.f32.mrf.mxu1  ;;  %1204 = vmatmul.f32.gmra.mxu0 %v3887_v62 }
 0x204   : > { %v1475_v0 = vadd.f32 %v1371_v61, %v1261_v58  ;;  %1810 = vmatmul.f32.gmra.mxu3 %v1705_v59 }
 0x205   : > { %v1549_v1 = vpop.f32.mrf.mxu2 }
 0x206   : > { %v1653_v2 = vadd.f32 %v1549_v1, %v1475_v0  ;;  %1418 = vmatmul.f32.gmra.mxu1 %v1313_v63  ;;  %v1710_v0 = vld [vmem:[%s4388_s26 + $0xcc] sm:$0xff] }
 0x207   : > { %v1763_v4 = vpop.f32.mrf.mxu3  ;;  %v3896_v1 = vld [vmem:[%s4388_s26 + $0xcb] sm:$0xff] }
 0x208   : > { %v1867_v5 = vadd.f32 %v1763_v4, %v1653_v2  ;;  %v1160_v6 = vpop.f32.mrf.mxu0  ;;  %v2334_v2 = vld [vmem:[#allocation5 + $0x518] sm:$0xff] }
 0x209   : > { %v1262_v7 = vadd.f32 %v4622_v18, %v1160_v6  ;;  %v3897_v4 = vld [vmem:[%s4388_s26 + $0xb9] sm:$0xff]  ;;  %2359 = vmatpush.msra.mxu2 %v2334_v2 }
 0x20a   : > { %3663 = vst [vmem:[%s4474_s23 + $0x130] sm:$0xff] %v1867_v5  ;;  %1599 = vmatmul.f32.gmra.mxu2 %v3888_v9  ;;  %v1318_v5 = vld [vmem:[%s4388_s26 + $0xba] sm:$0xff] }
 0x20b   : > { %v1374_v13 = vpop.f32.mrf.mxu1  ;;  %1207 = vmatmul.f32.gmra.mxu0 %v3889_v36 }
 0x20c   : > { %v1476_v15 = vadd.f32 %v1374_v13, %v1262_v7  ;;  %1813 = vmatmul.f32.gmra.mxu3 %v1706_v8  ;;  %v1942_v7 = vld [vmem:[#allocation5 + $0x418] sm:$0xff] }
 0x20d   : > { %v1552_v16 = vpop.f32.mrf.mxu2  ;;  %v2548_v8 = vld [vmem:[#allocation5 + $0x598] sm:$0xff]  ;;  %1967 = vmatpush.msra.mxu0 %v1942_v7  ;;  %v3906_v7 = vld [vmem:[%s4388_s26 + $0xf3] sm:$0xff] }
 0x20e   : > { %v1654_v17 = vadd.f32 %v1552_v16, %v1476_v15  ;;  %1421 = vmatmul.f32.gmra.mxu1 %v1314_v14  ;;  %2573 = vmatpush.msra.mxu3 %v2548_v8  ;;  %v1711_v15 = vld [vmem:[%s4388_s26 + $0xd4] sm:$0xff] }
 0x20f   : > { %v1766_v19 = vpop.f32.mrf.mxu3  ;;  %v3898_v16 = vld [vmem:[%s4388_s26 + $0xd3] sm:$0xff]  ;;  %1968 = vmatpush.msra.mxu0 %v1941_v38 }
 0x210   : > { %v1868_v20 = vadd.f32 %v1766_v19, %v1654_v17  ;;  %v1163_v21 = vpop.f32.mrf.mxu0  ;;  %v3899_v19 = vld [vmem:[%s4388_s26 + $0xc1] sm:$0xff]  ;;  %2574 = vmatpush.msra.mxu3 %v2547_v39  ;;  %v1940_v8 = vld [vmem:[#allocation5 + $0x408] sm:$0xff] }
 0x211   : > { %v1263_v22 = vadd.f32 %v4622_v18, %v1163_v21  ;;  %1969 = vmatpush.msra.mxu0 %v1940_v8  ;;  %v2545_v38 = vld [vmem:[#allocation5 + $0x580] sm:$0xff] }
 0x212   : > { %3664 = vst [vmem:[%s4474_s23 + $0x138] sm:$0xff] %v1868_v20  ;;  %1602 = vmatmul.f32.gmra.mxu2 %v3890_v24  ;;  %v1319_v20 = vld [vmem:[%s4388_s26 + $0xc2] sm:$0xff] }
 0x213   : > { %v1377_v25 = vpop.f32.mrf.mxu1  ;;  %1210 = vmatmul.f32.gmra.mxu0 %v3891_v26 }
 0x214   : > { %v1477_v28 = vadd.f32 %v1377_v25, %v1263_v22  ;;  %1816 = vmatmul.f32.gmra.mxu3 %v1707_v23 }
 0x215   : > { %v1555_v29 = vpop.f32.mrf.mxu2 }
 0x216   : > { %v1655_v30 = vadd.f32 %v1555_v29, %v1477_v28  ;;  %1424 = vmatmul.f32.gmra.mxu1 %v1315_v27  ;;  %v1712_v28 = vld [vmem:[%s4388_s26 + $0xdc] sm:$0xff] }
 0x217   : > { %v1769_v31 = vpop.f32.mrf.mxu3  ;;  %v3900_v29 = vld [vmem:[%s4388_s26 + $0xdb] sm:$0xff] }
 0x218   : > { %v1869_v32 = vadd.f32 %v1769_v31, %v1655_v30  ;;  %v1166_v33 = vpop.f32.mrf.mxu0  ;;  %v3901_v31 = vld [vmem:[%s4388_s26 + $0xc9] sm:$0xff] }
 0x219   : > { %v1264_v34 = vadd.f32 %v4622_v18, %v1166_v33 }
 0x21a   : > { %3665 = vst [vmem:[%s4474_s23 + $0x140] sm:$0xff] %v1869_v32  ;;  %1605 = vmatmul.f32.gmra.mxu2 %v3892_v37  ;;  %v1320_v32 = vld [vmem:[%s4388_s26 + $0xca] sm:$0xff] }
 0x21b   : > { %v1380_v41 = vpop.f32.mrf.mxu1  ;;  %1213 = vmatmul.f32.gmra.mxu0 %v3893_v42 }
 0x21c   : > { %v1478_v44 = vadd.f32 %v1380_v41, %v1264_v34  ;;  %1819 = vmatmul.f32.gmra.mxu3 %v1708_v35  ;;  %v2333_v34 = vld [vmem:[#allocation5 + $0x510] sm:$0xff] }
 0x21d   : > { %v1558_v46 = vpop.f32.mrf.mxu2  ;;  %2360 = vmatpush.msra.mxu2 %v2333_v34  ;;  %v3910_v34 = vld [vmem:[%s4388_s26 + $0x103] sm:$0xff] }
 0x21e   : > { %v1656_v47 = vadd.f32 %v1558_v46, %v1478_v44  ;;  %1427 = vmatmul.f32.gmra.mxu1 %v1316_v43  ;;  %v1713_v44 = vld [vmem:[%s4388_s26 + $0xe4] sm:$0xff] }
 0x21f   : > { %v1772_v48 = vpop.f32.mrf.mxu3  ;;  %v2119_v46 = vld [vmem:[#allocation5 + $0x490] sm:$0xff] }
 0x220   : > { %v1870_v49 = vadd.f32 %v1772_v48, %v1656_v47  ;;  %v1169_v50 = vpop.f32.mrf.mxu0  ;;  %v3903_v48 = vld [vmem:[%s4388_s26 + $0xd1] sm:$0xff]  ;;  %2146 = vmatpush.msra.mxu1 %v2119_v46 }
 0x221   : > { %v1265_v51 = vadd.f32 %v4622_v18, %v1169_v50 }
 0x222   : > { %3666 = vst [vmem:[%s4474_s23 + $0x148] sm:$0xff] %v1870_v49  ;;  %1608 = vmatmul.f32.gmra.mxu2 %v3894_v53  ;;  %v1321_v49 = vld [vmem:[%s4388_s26 + $0xd2] sm:$0xff] }
 0x223   : > { %v1383_v54 = vpop.f32.mrf.mxu1  ;;  %1216 = vmatmul.f32.gmra.mxu0 %v3895_v55 }
 0x224   : > { %v1479_v57 = vadd.f32 %v1383_v54, %v1265_v51  ;;  %1822 = vmatmul.f32.gmra.mxu3 %v1709_v52 }
 0x225   : > { %v1561_v58 = vpop.f32.mrf.mxu2 }
 0x226   : > { %v1657_v59 = vadd.f32 %v1561_v58, %v1479_v57  ;;  %1430 = vmatmul.f32.gmra.mxu1 %v1317_v56  ;;  %v1714_v57 = vld [vmem:[%s4388_s26 + $0xec] sm:$0xff] }
 0x227   : > { %v1775_v60 = vpop.f32.mrf.mxu3  ;;  %v3904_v58 = vld [vmem:[%s4388_s26 + $0xeb] sm:$0xff] }
 0x228   : > { %v1871_v61 = vadd.f32 %v1775_v60, %v1657_v59  ;;  %v1172_v62 = vpop.f32.mrf.mxu0  ;;  %v3905_v60 = vld [vmem:[%s4388_s26 + $0xd9] sm:$0xff] }
 0x229   : > { %v1266_v63 = vadd.f32 %v4622_v18, %v1172_v62 }
 0x22a   : > { %3667 = vst [vmem:[%s4474_s23 + $0x150] sm:$0xff] %v1871_v61  ;;  %1611 = vmatmul.f32.gmra.mxu2 %v3896_v1  ;;  %v1322_v61 = vld [vmem:[%s4388_s26 + $0xda] sm:$0xff] }
 0x22b   : > { %v1386_v3 = vpop.f32.mrf.mxu1  ;;  %1219 = vmatmul.f32.gmra.mxu0 %v3897_v4  ;;  %v2332_v1 = vld [vmem:[#allocation5 + $0x508] sm:$0xff] }
 0x22c   : > { %v1480_v6 = vadd.f32 %v1386_v3, %v1266_v63  ;;  %1825 = vmatmul.f32.gmra.mxu3 %v1710_v0  ;;  %2361 = vmatpush.msra.mxu2 %v2332_v1 }
 0x22d   : > { %v1564_v9 = vpop.f32.mrf.mxu2 }
 0x22e   : > { %v1658_v10 = vadd.f32 %v1564_v9, %v1480_v6  ;;  %1433 = vmatmul.f32.gmra.mxu1 %v1318_v5  ;;  %v1715_v6 = vld [vmem:[%s4388_s26 + $0xf4] sm:$0xff] }
 0x22f   : > { %v1778_v12 = vpop.f32.mrf.mxu3  ;;  %v2546_v9 = vld [vmem:[#allocation5 + $0x588] sm:$0xff] }
 0x230   : > { %v1872_v13 = vadd.f32 %v1778_v12, %v1658_v10  ;;  %v1175_v36 = vpop.f32.mrf.mxu0  ;;  %v2118_v10 = vld [vmem:[#allocation5 + $0x488] sm:$0xff]  ;;  %v3907_v12 = vld [vmem:[%s4388_s26 + $0xe1] sm:$0xff]  ;;  %2575 = vmatpush.msra.mxu3 %v2546_v9 }
 0x231   : > { %v1267_v14 = vadd.f32 %v4622_v18, %v1175_v36  ;;  %2147 = vmatpush.msra.mxu1 %v2118_v10  ;;  %v2953_v9 = vld [vmem:[#allocation5 + $0x6f8] sm:$0xff] }
 0x232   : > { %3668 = vst [vmem:[%s4474_s23 + $0x158] sm:$0xff] %v1872_v13  ;;  %1614 = vmatmul.f32.gmra.mxu2 %v3898_v16  ;;  %v1323_v13 = vld [vmem:[%s4388_s26 + $0xe2] sm:$0xff]  ;;  %2576 = vmatpush.msra.mxu3 %v2545_v38 }
 0x233   : > { %v1389_v17 = vpop.f32.mrf.mxu1  ;;  %1222 = vmatmul.f32.gmra.mxu0 %v3899_v19 }
 0x234   : > { %v1481_v21 = vadd.f32 %v1389_v17, %v1267_v14  ;;  %1828 = vmatmul.f32.gmra.mxu3 %v1711_v15 }
 0x235   : > { %v1567_v22 = vpop.f32.mrf.mxu2 }
 0x236   : > { %v1659_v23 = vadd.f32 %v1567_v22, %v1481_v21  ;;  %1436 = vmatmul.f32.gmra.mxu1 %v1319_v20  ;;  %v1716_v21 = vld [vmem:[%s4388_s26 + $0xfc] sm:$0xff] }
 0x237   : > { %v1781_v24 = vpop.f32.mrf.mxu3  ;;  %v3908_v22 = vld [vmem:[%s4388_s26 + $0xfb] sm:$0xff] }
 0x238   : > { %v1873_v25 = vadd.f32 %v1781_v24, %v1659_v23  ;;  %v1178_v26 = vpop.f32.mrf.mxu0  ;;  %v3909_v24 = vld [vmem:[%s4388_s26 + $0xe9] sm:$0xff] }
 0x239   : > { %v1268_v27 = vadd.f32 %v4622_v18, %v1178_v26 }
 0x23a   : > { %3669 = vst [vmem:[%s4474_s23 + $0x160] sm:$0xff] %v1873_v25  ;;  %1617 = vmatmul.f32.gmra.mxu2 %v3900_v29  ;;  %v1324_v25 = vld [vmem:[%s4388_s26 + $0xea] sm:$0xff] }
 0x23b   : > { %v1392_v30 = vpop.f32.mrf.mxu1  ;;  %1225 = vmatmul.f32.gmra.mxu0 %v3901_v31 }
 0x23c   : > { %v1482_v33 = vadd.f32 %v1392_v30, %v1268_v27  ;;  %1831 = vmatmul.f32.gmra.mxu3 %v1712_v28 }
 0x23d   : > { %v1570_v35 = vpop.f32.mrf.mxu2 }
 0x23e   : > { %v1660_v37 = vadd.f32 %v1570_v35, %v1482_v33  ;;  %1439 = vmatmul.f32.gmra.mxu1 %v1320_v32  ;;  %v1717_v33 = vld [vmem:[%s4388_s26 + $0x104] sm:$0xff] }
 0x23f   : > { %v1784_v40 = vpop.f32.mrf.mxu3  ;;  %v2331_v35 = vld [vmem:[#allocation5 + $0x500] sm:$0xff] }
 0x240   : > { %v1874_v41 = vadd.f32 %v1784_v40, %v1660_v37  ;;  %v1181_v42 = vpop.f32.mrf.mxu0  ;;  %v1939_v37 = vld [vmem:[#allocation5 + $0x400] sm:$0xff]  ;;  %2362 = vmatpush.msra.mxu2 %v2331_v35  ;;  %v2774_v35 = vld [vmem:[#allocation5 + $0x670] sm:$0xff] }
 0x241   : > { %v1269_v43 = vadd.f32 %v4622_v18, %v1181_v42  ;;  %v3911_v40 = vld [vmem:[%s4388_s26 + $0xf1] sm:$0xff]  ;;  %1970 = vmatpush.msra.mxu0 %v1939_v37 }
 0x242   : > { %3670 = vst [vmem:[%s4474_s23 + $0x168] sm:$0xff] %v1874_v41  ;;  %1620 = vmatmul.f32.gmra.mxu2 %v3902_v45  ;;  %v1325_v41 = vld [vmem:[%s4388_s26 + $0xf2] sm:$0xff] }
 0x243   : > { %v1395_v47 = vpop.f32.mrf.mxu1  ;;  %1228 = vmatmul.f32.gmra.mxu0 %v3903_v48  ;;  %v3344_v37 = vld [vmem:[#allocation5 + $0x7f0] sm:$0xff] }
 0x244   : > { %v1483_v50 = vadd.f32 %v1395_v47, %v1269_v43  ;;  %1834 = vmatmul.f32.gmra.mxu3 %v1713_v44  ;;  %v2117_v43 = vld [vmem:[#allocation5 + $0x480] sm:$0xff] }
 0x245   : > { %v1573_v51 = vpop.f32.mrf.mxu2  ;;  %2148 = vmatpush.msra.mxu1 %v2117_v43  ;;  %v3921_v43 = vld [vmem:[%s4388_s26 + $0x12b] sm:$0xff] }
 0x246   : > { %v1661_v52 = vadd.f32 %v1573_v51, %v1483_v50  ;;  %1442 = vmatmul.f32.gmra.mxu1 %v1321_v49  ;;  %v1718_v50 = vld [vmem:[%s4388_s26 + $0x10c] sm:$0xff] }
 0x247   : > { %v1787_v53 = vpop.f32.mrf.mxu3  ;;  %v3912_v51 = vld [vmem:[%s4388_s26 + $0x10b] sm:$0xff]  ;;  %2954 = vmatpush.msrb.mxu1 %v2953_v9 }
 0x248   : > { %v1875_v54 = vadd.f32 %v1787_v53, %v1661_v52  ;;  %v1184_v55 = vpop.f32.mrf.mxu0  ;;  %v3913_v53 = vld [vmem:[%s4388_s26 + $0xf9] sm:$0xff] }
 0x249   : > { %v1270_v56 = vadd.f32 %v4622_v18, %v1184_v55 }
 0x24a   : > { %3671 = vst [vmem:[%s4474_s23 + $0x170] sm:$0xff] %v1875_v54  ;;  %1623 = vmatmul.f32.gmra.mxu2 %v3904_v58  ;;  %v1326_v54 = vld [vmem:[%s4388_s26 + $0xfa] sm:$0xff] }
 0x24b   : > { %v1398_v59 = vpop.f32.mrf.mxu1  ;;  %1231 = vmatmul.f32.gmra.mxu0 %v3905_v60 }
 0x24c   : > { %v1484_v62 = vadd.f32 %v1398_v59, %v1270_v56  ;;  %1837 = vmatmul.f32.gmra.mxu3 %v1714_v57 }
 0x24d   : > { %v1576_v63 = vpop.f32.mrf.mxu2 }
 0x24e   : > { %v1662_v0 = vadd.f32 %v1576_v63, %v1484_v62  ;;  %1445 = vmatmul.f32.gmra.mxu1 %v1322_v61  ;;  %v1719_v62 = vld [vmem:[%s4388_s26 + $0x114] sm:$0xff] }
 0x24f   : > { %v1790_v2 = vpop.f32.mrf.mxu3  ;;  %v3914_v63 = vld [vmem:[%s4388_s26 + $0x113] sm:$0xff] }
 0x250   : > { %v1876_v3 = vadd.f32 %v1790_v2, %v1662_v0  ;;  %v1187_v4 = vpop.f32.mrf.mxu0  ;;  %v3131_v0 = vld [vmem:[#allocation5 + $0x778] sm:$0xff] }
 0x251   : > { %v1271_v5 = vadd.f32 %v4622_v18, %v1187_v4  ;;  %v3915_v2 = vld [vmem:[%s4388_s26 + $0x101] sm:$0xff]  ;;  %3132 = vmatpush.msrb.mxu2 %v3131_v0 }
 0x252   : > { %3672 = vst [vmem:[%s4474_s23 + $0x178] sm:$0xff] %v1876_v3  ;;  %1626 = vmatmul.f32.gmra.mxu2 %v3906_v7  ;;  %v1327_v3 = vld [vmem:[%s4388_s26 + $0x102] sm:$0xff] }
 0x253   : > { %v1401_v11 = vpop.f32.mrf.mxu1  ;;  %1234 = vmatmul.f32.gmra.mxu0 %v3907_v12 }
 0x254   : > { %v1485_v36 = vadd.f32 %v1401_v11, %v1271_v5  ;;  %1840 = vmatmul.f32.gmra.mxu3 %v1715_v6  ;;  %v2775_v5 = vld [vmem:[#allocation5 + $0x678] sm:$0xff] }
 0x255   : > { %v1579_v14 = vpop.f32.mrf.mxu2  ;;  %v3345_v6 = vld [vmem:[#allocation5 + $0x7f8] sm:$0xff]  ;;  %2776 = vmatpush.msrb.mxu0 %v2775_v5 }
 0x256   : > { %v1663_v15 = vadd.f32 %v1579_v14, %v1485_v36  ;;  %1448 = vmatmul.f32.gmra.mxu1 %v1323_v13  ;;  %3346 = vmatpush.msrb.mxu3 %v3345_v6  ;;  %v1720_v36 = vld [vmem:[%s4388_s26 + $0x11c] sm:$0xff]  ;;  %v2509_v5 = vld [vmem:[%s4388_s26 + $0x2d] sm:$0xff] }
 0x257   : > { %v1793_v16 = vpop.f32.mrf.mxu3  ;;  %v3916_v14 = vld [vmem:[%s4388_s26 + $0x11b] sm:$0xff]  ;;  %2777 = vmatpush.msrb.mxu0 %v2774_v35  ;;  %v3342_v35 = vld [vmem:[#allocation5 + $0x7e0] sm:$0xff] }
 0x258   : > { %v1877_v17 = vadd.f32 %v1793_v16, %v1663_v15  ;;  %v1190_v19 = vpop.f32.mrf.mxu0  ;;  %v3917_v16 = vld [vmem:[%s4388_s26 + $0x109] sm:$0xff]  ;;  %3347 = vmatpush.msrb.mxu3 %v3344_v37 }
 0x259   : > { %v1272_v20 = vadd.f32 %v4622_v18, %v1190_v19  ;;  %v2773_v6 = vld [vmem:[#allocation5 + $0x668] sm:$0xff] }
 0x25a   : > { %3673 = vst [vmem:[%s4474_s23 + $0x180] sm:$0xff] %v1877_v17  ;;  %1629 = vmatmul.f32.gmra.mxu2 %v3908_v22  ;;  %v1328_v17 = vld [vmem:[%s4388_s26 + $0x10a] sm:$0xff]  ;;  %2778 = vmatpush.msrb.mxu0 %v2773_v6  ;;  %v3934_v6 = vld [vmem:[%s4388_s26 + $0x3b] sm:$0xff] }
 0x25b   : > { %v1404_v23 = vpop.f32.mrf.mxu1  ;;  %1237 = vmatmul.f32.gmra.mxu0 %v3909_v24  ;;  %v4792_v24 = vld [vmem:[#allocation7] ss:$0 sm:$0xff] }
 0x25c   : > { %v1486_v26 = vadd.f32 %v1404_v23, %v1272_v20  ;;  %1843 = vmatmul.f32.gmra.mxu3 %v1716_v21 }
 0x25d   : > { %v1582_v27 = vpop.f32.mrf.mxu2 }
 0x25e   : > { %v1664_v28 = vadd.f32 %v1582_v27, %v1486_v26  ;;  %1451 = vmatmul.f32.gmra.mxu1 %v1324_v25  ;;  %v1721_v26 = vld [vmem:[%s4388_s26 + $0x124] sm:$0xff] }
 0x25f   : > { %v1796_v29 = vpop.f32.mrf.mxu3  ;;  %v3919_v27 = vld [vmem:[%s4388_s26 + $0x123] sm:$0xff] }
 0x260   : > { %v1878_v30 = vadd.f32 %v1796_v29, %v1664_v28  ;;  %v1193_v31 = vpop.f32.mrf.mxu0  ;;  %v3920_v29 = vld [vmem:[%s4388_s26 + $0x111] sm:$0xff] }
 0x261   : > { %v1273_v32 = vadd.f32 %v4622_v18, %v1193_v31 }
 0x262   : > { %3674 = vst [vmem:[%s4474_s23 + $0x188] sm:$0xff] %v1878_v30  ;;  %1632 = vmatmul.f32.gmra.mxu2 %v3910_v34  ;;  %v1329_v30 = vld [vmem:[%s4388_s26 + $0x112] sm:$0xff] }
 0x263   : > { %v1407_v39 = vpop.f32.mrf.mxu1  ;;  %1240 = vmatmul.f32.gmra.mxu0 %v3911_v40 }
 0x264   : > { %v1487_v42 = vadd.f32 %v1407_v39, %v1273_v32  ;;  %1846 = vmatmul.f32.gmra.mxu3 %v1717_v33  ;;  %v3130_v32 = vld [vmem:[#allocation5 + $0x770] sm:$0xff] }
 0x265   : > { %v1585_v44 = vpop.f32.mrf.mxu2  ;;  %3133 = vmatpush.msrb.mxu2 %v3130_v32  ;;  %v2511_v32 = vld [vmem:[%s4388_s26 + $0x3d] sm:$0xff] }
 0x266   : > { %v1665_v45 = vadd.f32 %v1585_v44, %v1487_v42  ;;  %1454 = vmatmul.f32.gmra.mxu1 %v1325_v41  ;;  %v1722_v42 = vld [vmem:[%s4388_s26 + $0x12c] sm:$0xff]  ;;  %v2952_v44 = vld [vmem:[#allocation5 + $0x6f0] sm:$0xff] }
 0x267   : > { %v1799_v46 = vpop.f32.mrf.mxu3  ;;  %2955 = vmatpush.msrb.mxu1 %v2952_v44 }
 0x268   : > { %v1879_v47 = vadd.f32 %v1799_v46, %v1665_v45  ;;  %v1196_v48 = vpop.f32.mrf.mxu0  ;;  %v3922_v46 = vld [vmem:[%s4388_s26 + $0x119] sm:$0xff] }
 0x269   : > { %v1274_v49 = vadd.f32 %v4622_v18, %v1196_v48 }
 0x26a   : > { %3675 = vst [vmem:[%s4474_s23 + $0x190] sm:$0xff] %v1879_v47  ;;  %1635 = vmatmul.f32.gmra.mxu2 %v3912_v51  ;;  %v1330_v47 = vld [vmem:[%s4388_s26 + $0x11a] sm:$0xff] }
 0x26b   : > { %v1410_v52 = vpop.f32.mrf.mxu1  ;;  %1243 = vmatmul.f32.gmra.mxu0 %v3913_v53 }
 0x26c   : > { %v1488_v55 = vadd.f32 %v1410_v52, %v1274_v49  ;;  %1849 = vmatmul.f32.gmra.mxu3 %v1718_v50  ;;  %v2294_v52 = vld [vmem:[%s4388_s26 + $0x24] sm:$0xff] }
 0x26d   : > { %v1588_v56 = vpop.f32.mrf.mxu2 }
 0x26e   : > { %v1666_v57 = vadd.f32 %v1588_v56, %v1488_v55  ;;  %1457 = vmatmul.f32.gmra.mxu1 %v1326_v54  ;;  %v2508_v56 = vld [vmem:[%s4388_s26 + $0x25] sm:$0xff] }
 0x26f   : > { %v1802_v58 = vpop.f32.mrf.mxu3 }
 0x270   : > { %v1880_v59 = vadd.f32 %v1802_v58, %v1666_v57  ;;  %v1199_v60 = vpop.f32.mrf.mxu0  ;;  %v3923_v58 = vld [vmem:[%s4388_s26 + $0x12] sm:$0xff] }
 0x271   : > { %v1275_v61 = vadd.f32 %v4622_v18, %v1199_v60 }
 0x272   : > { %3676 = vst [vmem:[%s4474_s23 + $0x198] sm:$0xff] %v1880_v59  ;;  %1638 = vmatmul.f32.gmra.mxu2 %v3914_v63  ;;  %v3129_v63 = vld [vmem:[#allocation5 + $0x768] sm:$0xff] }
 0x273   : > { %v1413_v1 = vpop.f32.mrf.mxu1  ;;  %1246 = vmatmul.f32.gmra.mxu0 %v3915_v2  ;;  %3134 = vmatpush.msrb.mxu2 %v3129_v63 }
 0x274   : > { %v1489_v4 = vadd.f32 %v1413_v1, %v1275_v61  ;;  %1852 = vmatmul.f32.gmra.mxu3 %v1719_v62  ;;  %v3924_v62 = vld [vmem:[%s4388_s26 + $0x13] sm:$0xff] }
 0x275   : > { %v1591_v7 = vpop.f32.mrf.mxu2  ;;  %v2295_v1 = vld [vmem:[%s4388_s26 + $0x2c] sm:$0xff] }
 0x276   : > { %v1667_v8 = vadd.f32 %v1591_v7, %v1489_v4  ;;  %1460 = vmatmul.f32.gmra.mxu1 %v1327_v3  ;;  %v3343_v7 = vld [vmem:[#allocation5 + $0x7e8] sm:$0xff] }
 0x277   : > { %v1805_v10 = vpop.f32.mrf.mxu3  ;;  %3348 = vmatpush.msrb.mxu3 %v3343_v7  ;;  %v2949_v7 = vld [vmem:[#allocation5 + $0x6d8] sm:$0xff] }
 0x278   : > { %v1881_v11 = vadd.f32 %v1805_v10, %v1667_v8  ;;  %v1202_v12 = vpop.f32.mrf.mxu0  ;;  %v2951_v8 = vld [vmem:[#allocation5 + $0x6e8] sm:$0xff] }
 0x279   : > { %v1276_v13 = vadd.f32 %v4622_v18, %v1202_v12  ;;  %v3925_v10 = vld [vmem:[%s4388_s26 + $0x1a] sm:$0xff]  ;;  %2956 = vmatpush.msrb.mxu1 %v2951_v8  ;;  %3349 = vmatpush.msrb.mxu3 %v3342_v35 }
 0x27a   : > { %3677 = vst [vmem:[%s4474_s23 + $0x1a0] sm:$0xff] %v1881_v11  ;;  %1641 = vmatmul.f32.gmra.mxu2 %v3916_v14 }
 0x27b   : > { %v1416_v15 = vpop.f32.mrf.mxu1  ;;  %1249 = vmatmul.f32.gmra.mxu0 %v3917_v16 }
 0x27c   : > { %v1490_v19 = vadd.f32 %v1416_v15, %v1276_v13  ;;  %1855 = vmatmul.f32.gmra.mxu3 %v1720_v36  ;;  %v3926_v36 = vld [vmem:[%s4388_s26 + $0x1b] sm:$0xff] }
 0x27d   : > { %v1594_v20 = vpop.f32.mrf.mxu2  ;;  %v2296_v15 = vld [vmem:[%s4388_s26 + $0x34] sm:$0xff] }
 0x27e   : > { %v1668_v21 = vadd.f32 %v1594_v20, %v1490_v19  ;;  %1463 = vmatmul.f32.gmra.mxu1 %v1328_v17  ;;  %v2510_v20 = vld [vmem:[%s4388_s26 + $0x35] sm:$0xff] }
 0x27f   : > { %v1808_v22 = vpop.f32.mrf.mxu3 }
 0x280   : > { %v1882_v18 = vadd.f32 %v1808_v22, %v1668_v21  ;;  %v1205_v23 = vpop.f32.mrf.mxu0  ;;  %v3927_v22 = vld [vmem:[%s4388_s26 + $0x22] sm:$0xff] }
 0x281   : > { %v1277_v25 = vadd.f32 %v4792_v24, %v1205_v23 }
 0x282   : > { %3678 = vst [vmem:[%s4474_s23 + $0x1a8] sm:$0xff] %v1882_v18  ;;  %1644 = vmatmul.f32.gmra.mxu2 %v3919_v27 }
 0x283   : > { %v1419_v28 = vpop.f32.mrf.mxu1  ;;  %1252 = vmatmul.f32.gmra.mxu0 %v3920_v29 }
 0x284   : > { %v1491_v31 = vadd.f32 %v1419_v28, %v1277_v25  ;;  %1858 = vmatmul.f32.gmra.mxu3 %v1721_v26  ;;  %v3928_v26 = vld [vmem:[%s4388_s26 + $0x23] sm:$0xff] }
 0x285   : > { %v1597_v33 = vpop.f32.mrf.mxu2  ;;  %v2297_v28 = vld [vmem:[%s4388_s26 + $0x3c] sm:$0xff] }
 0x286   : > { %v1669_v34 = vadd.f32 %v1597_v33, %v1491_v31  ;;  %1466 = vmatmul.f32.gmra.mxu1 %v1329_v30  ;;  %v3128_v33 = vld [vmem:[#allocation5 + $0x760] sm:$0xff] }
 0x287   : > { %v1811_v38 = vpop.f32.mrf.mxu3  ;;  %3135 = vmatpush.msrb.mxu2 %v3128_v33  ;;  %v2770_v33 = vld [vmem:[#allocation5 + $0x650] sm:$0xff] }
 0x288   : > { %v1883_v39 = vadd.f32 %v1811_v38, %v1669_v34  ;;  %v1208_v40 = vpop.f32.mrf.mxu0  ;;  %v2772_v34 = vld [vmem:[#allocation5 + $0x660] sm:$0xff] }
 0x289   : > { %v1278_v41 = vadd.f32 %v4792_v24, %v1208_v40  ;;  %v3929_v38 = vld [vmem:[%s4388_s26 + $0x2a] sm:$0xff]  ;;  %2779 = vmatpush.msrb.mxu0 %v2772_v34  ;;  %v3340_v34 = vld [vmem:[#allocation5 + $0x7d0] sm:$0xff] }
 0x28a   : > { %3679 = vst [vmem:[%s4474_s23 + $0x1b0] sm:$0xff] %v1883_v39  ;;  %1647 = vmatmul.f32.gmra.mxu2 %v3921_v43  ;;  %v2950_v40 = vld [vmem:[#allocation5 + $0x6e0] sm:$0xff] }
 0x28b   : > { %v1422_v45 = vpop.f32.mrf.mxu1  ;;  %1255 = vmatmul.f32.gmra.mxu0 %v3922_v46  ;;  %2957 = vmatpush.msrb.mxu1 %v2950_v40  ;;  %v3930_v43 = vld [vmem:[%s4388_s26 + $0x2b] sm:$0xff] }
 0x28c   : > { %v1492_v48 = vadd.f32 %v1422_v45, %v1278_v41  ;;  %1861 = vmatmul.f32.gmra.mxu3 %v1722_v42  ;;  %v2298_v45 = vld [vmem:[%s4388_s26 + $0x44] sm:$0xff] }
 0x28d   : > { %v1600_v49 = vpop.f32.mrf.mxu2  ;;  %2958 = vmatpush.msrb.mxu1 %v2949_v7 }
 0x28e   : > { %v1670_v50 = vadd.f32 %v1600_v49, %v1492_v48  ;;  %1469 = vmatmul.f32.gmra.mxu1 %v1330_v47  ;;  %v2512_v49 = vld [vmem:[%s4388_s26 + $0x45] sm:$0xff] }
 0x28f   : > { %v1814_v51 = vpop.f32.mrf.mxu3 }
 0x290   : > { %v1884_v53 = vadd.f32 %v1814_v51, %v1670_v50  ;;  %v1211_v54 = vpop.f32.mrf.mxu0  ;;  %v3931_v51 = vld [vmem:[%s4388_s26 + $0x32] sm:$0xff] }
 0x291   : > { %v1279_v55 = vadd.f32 %v4792_v24, %v1211_v54 }
 0x292   : > { %3680 = vst [vmem:[%s4474_s23 + $0x1b8] sm:$0xff] %v1884_v53  ;;  %2363 = vmatmul.f32.vlgmr.msra.gmra.mxu2 %v2294_v52 }
 0x293   : > { %v1425_v57 = vpop.f32.mrf.mxu1  ;;  %1971 = vmatmul.f32.vlgmr.msra.gmra.mxu0 %v3923_v58 }
 0x294   : > { %v1493_v59 = vadd.f32 %v1425_v57, %v1279_v55  ;;  %2577 = vmatmul.f32.vlgmr.msra.gmra.mxu3 %v2508_v56  ;;  %v3932_v55 = vld [vmem:[%s4388_s26 + $0x33] sm:$0xff] }
 0x295   : > { %v1603_v60 = vpop.f32.mrf.mxu2  ;;  %v2299_v57 = vld [vmem:[%s4388_s26 + $0x4c] sm:$0xff] }
 0x296   : > { %v1671_v61 = vadd.f32 %v1603_v60, %v1493_v59  ;;  %2149 = vmatmul.f32.vlgmr.msra.gmra.mxu1 %v3924_v62  ;;  %v3127_v62 = vld [vmem:[#allocation5 + $0x758] sm:$0xff] }
 0x297   : > { %v1817_v0 = vpop.f32.mrf.mxu3  ;;  %3136 = vmatpush.msrb.mxu2 %v3127_v62 }
 0x298   : > { %v1885_v2 = vadd.f32 %v1817_v0, %v1671_v61  ;;  %v1214_v3 = vpop.f32.mrf.mxu0  ;;  %v2513_v61 = vld [vmem:[%s4388_s26 + $0x4d] sm:$0xff]  ;;  %v3933_v0 = vld [vmem:[%s4388_s26 + $0x3a] sm:$0xff] }
 0x299   : > { %v1280_v4 = vadd.f32 %v4792_v24, %v1214_v3  ;;  %v3341_v3 = vld [vmem:[#allocation5 + $0x7d8] sm:$0xff] }
 0x29a   : > { %3681 = vst [vmem:[%s4474_s23 + $0x1c0] sm:$0xff] %v1885_v2  ;;  %2366 = vmatmul.f32.gmra.mxu2 %v2295_v1  ;;  %v2771_v2 = vld [vmem:[#allocation5 + $0x658] sm:$0xff]  ;;  %3350 = vmatpush.msrb.mxu3 %v3341_v3  ;;  %v2518_v3 = vld [vmem:[%s4388_s26 + $0x75] sm:$0xff] }
 0x29b   : > { %v1428_v9 = vpop.f32.mrf.mxu1  ;;  %1974 = vmatmul.f32.gmra.mxu0 %v3925_v10 }
 0x29c   : > { %v1494_v11 = vadd.f32 %v1428_v9, %v1280_v4  ;;  %2580 = vmatmul.f32.gmra.mxu3 %v2509_v5  ;;  %2780 = vmatpush.msrb.mxu0 %v2771_v2  ;;  %v2300_v9 = vld [vmem:[%s4388_s26 + $0x54] sm:$0xff] }
 0x29d   : > { %v1606_v12 = vpop.f32.mrf.mxu2  ;;  %3351 = vmatpush.msrb.mxu3 %v3340_v34 }
 0x29e   : > { %v1672_v13 = vadd.f32 %v1606_v12, %v1494_v11  ;;  %2152 = vmatmul.f32.gmra.mxu1 %v3926_v36  ;;  %2781 = vmatpush.msrb.mxu0 %v2770_v33  ;;  %v3338_v33 = vld [vmem:[#allocation5 + $0x7c0] sm:$0xff] }
 0x29f   : > { %v1820_v14 = vpop.f32.mrf.mxu3 }
 0x2a0   : > { %v1886_v16 = vadd.f32 %v1820_v14, %v1672_v13  ;;  %v1217_v17 = vpop.f32.mrf.mxu0  ;;  %v2514_v13 = vld [vmem:[%s4388_s26 + $0x55] sm:$0xff]  ;;  %v3935_v14 = vld [vmem:[%s4388_s26 + $0x42] sm:$0xff] }
 0x2a1   : > { %v1281_v19 = vadd.f32 %v4792_v24, %v1217_v17 }
 0x2a2   : > { %3682 = vst [vmem:[%s4474_s23 + $0x1c8] sm:$0xff] %v1886_v16  ;;  %2369 = vmatmul.f32.gmra.mxu2 %v2296_v15 }
 0x2a3   : > { %v1431_v21 = vpop.f32.mrf.mxu1  ;;  %1977 = vmatmul.f32.gmra.mxu0 %v3927_v22 }
 0x2a4   : > { %v1495_v18 = vadd.f32 %v1431_v21, %v1281_v19  ;;  %2583 = vmatmul.f32.gmra.mxu3 %v2510_v20  ;;  %v3936_v19 = vld [vmem:[%s4388_s26 + $0x43] sm:$0xff] }
 0x2a5   : > { %v1609_v23 = vpop.f32.mrf.mxu2  ;;  %v2301_v21 = vld [vmem:[%s4388_s26 + $0x5c] sm:$0xff] }
 0x2a6   : > { %v1673_v25 = vadd.f32 %v1609_v23, %v1495_v18  ;;  %2155 = vmatmul.f32.gmra.mxu1 %v3928_v26 }
 0x2a7   : > { %v1823_v27 = vpop.f32.mrf.mxu3 }
 0x2a8   : > { %v1887_v29 = vadd.f32 %v1823_v27, %v1673_v25  ;;  %v1220_v30 = vpop.f32.mrf.mxu0  ;;  %v2515_v25 = vld [vmem:[%s4388_s26 + $0x5d] sm:$0xff]  ;;  %v3937_v27 = vld [vmem:[%s4388_s26 + $0x4a] sm:$0xff] }
 0x2a9   : > { %v1282_v31 = vadd.f32 %v4792_v24, %v1220_v30 }
 0x2aa   : > { %3683 = vst [vmem:[%s4474_s23 + $0x1d0] sm:$0xff] %v1887_v29  ;;  %2372 = vmatmul.f32.gmra.mxu2 %v2297_v28  ;;  %v3126_v29 = vld [vmem:[#allocation5 + $0x750] sm:$0xff] }
 0x2ab   : > { %v1434_v37 = vpop.f32.mrf.mxu1  ;;  %1980 = vmatmul.f32.gmra.mxu0 %v3929_v38  ;;  %3137 = vmatpush.msrb.mxu2 %v3126_v29 }
 0x2ac   : > { %v1496_v39 = vadd.f32 %v1434_v37, %v1282_v31  ;;  %2586 = vmatmul.f32.gmra.mxu3 %v2511_v32  ;;  %v3938_v32 = vld [vmem:[%s4388_s26 + $0x4b] sm:$0xff] }
 0x2ad   : > { %v1612_v41 = vpop.f32.mrf.mxu2  ;;  %v2302_v37 = vld [vmem:[%s4388_s26 + $0x64] sm:$0xff] }
 0x2ae   : > { %v1674_v42 = vadd.f32 %v1612_v41, %v1496_v39  ;;  %2158 = vmatmul.f32.gmra.mxu1 %v3930_v43  ;;  %v2516_v41 = vld [vmem:[%s4388_s26 + $0x65] sm:$0xff] }
 0x2af   : > { %v1826_v44 = vpop.f32.mrf.mxu3 }
 0x2b0   : > { %v1888_v46 = vadd.f32 %v1826_v44, %v1674_v42  ;;  %v1223_v47 = vpop.f32.mrf.mxu0  ;;  %v2948_v42 = vld [vmem:[#allocation5 + $0x6d0] sm:$0xff] }
 0x2b1   : > { %v1283_v48 = vadd.f32 %v4792_v24, %v1223_v47  ;;  %v3939_v44 = vld [vmem:[%s4388_s26 + $0x52] sm:$0xff]  ;;  %2959 = vmatpush.msrb.mxu1 %v2948_v42 }
 0x2b2   : > { %3684 = vst [vmem:[%s4474_s23 + $0x1d8] sm:$0xff] %v1888_v46  ;;  %2375 = vmatmul.f32.gmra.mxu2 %v2298_v45 }
 0x2b3   : > { %v1437_v50 = vpop.f32.mrf.mxu1  ;;  %1983 = vmatmul.f32.gmra.mxu0 %v3931_v51 }
 0x2b4   : > { %v1497_v52 = vadd.f32 %v1437_v50, %v1283_v48  ;;  %2589 = vmatmul.f32.gmra.mxu3 %v2512_v49  ;;  %v3940_v48 = vld [vmem:[%s4388_s26 + $0x53] sm:$0xff] }
 0x2b5   : > { %v1615_v53 = vpop.f32.mrf.mxu2  ;;  %v2303_v50 = vld [vmem:[%s4388_s26 + $0x6c] sm:$0xff] }
 0x2b6   : > { %v1675_v54 = vadd.f32 %v1615_v53, %v1497_v52  ;;  %2161 = vmatmul.f32.gmra.mxu1 %v3932_v55 }
 0x2b7   : > { %v1829_v56 = vpop.f32.mrf.mxu3 }
 0x2b8   : > { %v1889_v58 = vadd.f32 %v1829_v56, %v1675_v54  ;;  %v1226_v59 = vpop.f32.mrf.mxu0  ;;  %v2517_v54 = vld [vmem:[%s4388_s26 + $0x6d] sm:$0xff]  ;;  %v3941_v56 = vld [vmem:[%s4388_s26 + $0x5a] sm:$0xff] }
 0x2b9   : > { %v1284_v60 = vadd.f32 %v4792_v24, %v1226_v59 }
 0x2ba   : > { %3685 = vst [vmem:[%s4474_s23 + $0x1e0] sm:$0xff] %v1889_v58  ;;  %2378 = vmatmul.f32.gmra.mxu2 %v2299_v57 }
 0x2bb   : > { %v1440_v63 = vpop.f32.mrf.mxu1  ;;  %1986 = vmatmul.f32.gmra.mxu0 %v3933_v0 }
 0x2bc   : > { %v1498_v1 = vadd.f32 %v1440_v63, %v1284_v60  ;;  %2592 = vmatmul.f32.gmra.mxu3 %v2513_v61  ;;  %v3942_v60 = vld [vmem:[%s4388_s26 + $0x5b] sm:$0xff] }
 0x2bd   : > { %v1618_v4 = vpop.f32.mrf.mxu2  ;;  %v3125_v61 = vld [vmem:[#allocation5 + $0x748] sm:$0xff] }
 0x2be   : > { %v1676_v5 = vadd.f32 %v1618_v4, %v1498_v1  ;;  %2164 = vmatmul.f32.gmra.mxu1 %v3934_v6  ;;  %v2304_v63 = vld [vmem:[%s4388_s26 + $0x74] sm:$0xff]  ;;  %3138 = vmatpush.msrb.mxu2 %v3125_v61 }
 0x2bf   : > { %v1832_v8 = vpop.f32.mrf.mxu3  ;;  %v2769_v4 = vld [vmem:[#allocation5 + $0x648] sm:$0xff] }
 0x2c0   : > { %v1890_v10 = vadd.f32 %v1832_v8, %v1676_v5  ;;  %v1229_v11 = vpop.f32.mrf.mxu0  ;;  %v3339_v5 = vld [vmem:[#allocation5 + $0x7c8] sm:$0xff]  ;;  %v3943_v8 = vld [vmem:[%s4388_s26 + $0x62] sm:$0xff]  ;;  %2782 = vmatpush.msrb.mxu0 %v2769_v4 }
 0x2c1   : > { %v1285_v12 = vadd.f32 %v4792_v24, %v1229_v11  ;;  %v2947_v6 = vld [vmem:[#allocation5 + $0x6c8] sm:$0xff]  ;;  %3352 = vmatpush.msrb.mxu3 %v3339_v5  ;;  %v3952_v4 = vld [vmem:[%s4388_s26 + $0x83] sm:$0xff] }
 0x2c2   : > { %3686 = vst [vmem:[%s4474_s23 + $0x1e8] sm:$0xff] %v1890_v10  ;;  %2381 = vmatmul.f32.gmra.mxu2 %v2300_v9  ;;  %2960 = vmatpush.msrb.mxu1 %v2947_v6  ;;  %v2945_v5 = vld [vmem:[#allocation5 + $0x6b8] sm:$0xff] }
 0x2c3   : > { %v1443_v36 = vpop.f32.mrf.mxu1  ;;  %1989 = vmatmul.f32.gmra.mxu0 %v3935_v14  ;;  %3353 = vmatpush.msrb.mxu3 %v3338_v33 }
 0x2c4   : > { %v1499_v15 = vadd.f32 %v1443_v36, %v1285_v12  ;;  %2595 = vmatmul.f32.gmra.mxu3 %v2514_v13  ;;  %v3944_v12 = vld [vmem:[%s4388_s26 + $0x63] sm:$0xff] }
 0x2c5   : > { %v1621_v16 = vpop.f32.mrf.mxu2  ;;  %v2305_v36 = vld [vmem:[%s4388_s26 + $0x7c] sm:$0xff] }
 0x2c6   : > { %v1677_v17 = vadd.f32 %v1621_v16, %v1499_v15  ;;  %2167 = vmatmul.f32.gmra.mxu1 %v3936_v19 }
 0x2c7   : > { %v1835_v20 = vpop.f32.mrf.mxu3 }
 0x2c8   : > { %v1891_v22 = vadd.f32 %v1835_v20, %v1677_v17  ;;  %v1232_v18 = vpop.f32.mrf.mxu0  ;;  %v2519_v17 = vld [vmem:[%s4388_s26 + $0x7d] sm:$0xff]  ;;  %v3945_v20 = vld [vmem:[%s4388_s26 + $0x6a] sm:$0xff] }
 0x2c9   : > { %v1286_v23 = vadd.f32 %v4792_v24, %v1232_v18 }
 0x2ca   : > { %3687 = vst [vmem:[%s4474_s23 + $0x1f0] sm:$0xff] %v1891_v22  ;;  %2384 = vmatmul.f32.gmra.mxu2 %v2301_v21 }
 0x2cb   : > { %v1446_v26 = vpop.f32.mrf.mxu1  ;;  %1992 = vmatmul.f32.gmra.mxu0 %v3937_v27 }
 0x2cc   : > { %v1500_v28 = vadd.f32 %v1446_v26, %v1286_v23  ;;  %2598 = vmatmul.f32.gmra.mxu3 %v2515_v25  ;;  %v3946_v23 = vld [vmem:[%s4388_s26 + $0x6b] sm:$0xff] }
 0x2cd   : > { %v1624_v30 = vpop.f32.mrf.mxu2  ;;  %v2306_v26 = vld [vmem:[%s4388_s26 + $0x84] sm:$0xff] }
 0x2ce   : > { %v1678_v31 = vadd.f32 %v1624_v30, %v1500_v28  ;;  %2170 = vmatmul.f32.gmra.mxu1 %v3938_v32  ;;  %v2520_v30 = vld [vmem:[%s4388_s26 + $0x85] sm:$0xff] }
 0x2cf   : > { %v1838_v35 = vpop.f32.mrf.mxu3  ;;  %v2768_v32 = vld [vmem:[#allocation5 + $0x640] sm:$0xff] }
 0x2d0   : > { %v1892_v38 = vadd.f32 %v1838_v35, %v1678_v31  ;;  %v1235_v39 = vpop.f32.mrf.mxu0  ;;  %v3124_v31 = vld [vmem:[#allocation5 + $0x740] sm:$0xff]  ;;  %2783 = vmatpush.msrb.mxu0 %v2768_v32  ;;  %v3336_v32 = vld [vmem:[#allocation5 + $0x7b0] sm:$0xff] }
 0x2d1   : > { %v1287_v40 = vadd.f32 %v4792_v24, %v1235_v39  ;;  %v3947_v35 = vld [vmem:[%s4388_s26 + $0x72] sm:$0xff]  ;;  %3139 = vmatpush.msrb.mxu2 %v3124_v31 }
 0x2d2   : > { %3688 = vst [vmem:[%s4474_s23 + $0x1f8] sm:$0xff] %v1892_v38  ;;  %2387 = vmatmul.f32.gmra.mxu2 %v2302_v37  ;;  %v2946_v38 = vld [vmem:[#allocation5 + $0x6c0] sm:$0xff]  ;;  %v2766_v31 = vld [vmem:[#allocation5 + $0x630] sm:$0xff] }
 0x2d3   : > { %v1449_v43 = vpop.f32.mrf.mxu1  ;;  %1995 = vmatmul.f32.gmra.mxu0 %v3939_v44  ;;  %2961 = vmatpush.msrb.mxu1 %v2946_v38 }
 0x2d4   : > { %v1501_v45 = vadd.f32 %v1449_v43, %v1287_v40  ;;  %2601 = vmatmul.f32.gmra.mxu3 %v2516_v41  ;;  %v3948_v41 = vld [vmem:[%s4388_s26 + $0x73] sm:$0xff] }
 0x2d5   : > { %v1627_v46 = vpop.f32.mrf.mxu2  ;;  %v2307_v43 = vld [vmem:[%s4388_s26 + $0x8c] sm:$0xff]  ;;  %2962 = vmatpush.msrb.mxu1 %v2945_v5 }
 0x2d6   : > { %v1679_v47 = vadd.f32 %v1627_v46, %v1501_v45  ;;  %2173 = vmatmul.f32.gmra.mxu1 %v3940_v48 }
 0x2d7   : > { %v1841_v49 = vpop.f32.mrf.mxu3 }
 0x2d8   : > { %v1893_v51 = vadd.f32 %v1841_v49, %v1679_v47  ;;  %v1238_v52 = vpop.f32.mrf.mxu0  ;;  %v2521_v47 = vld [vmem:[%s4388_s26 + $0x8d] sm:$0xff]  ;;  %v3949_v49 = vld [vmem:[%s4388_s26 + $0x7a] sm:$0xff] }
 0x2d9   : > { %v1288_v53 = vadd.f32 %v4792_v24, %v1238_v52 }
 0x2da   : > { %3689 = vst [vmem:[%s4474_s23 + $0x200] sm:$0xff] %v1893_v51  ;;  %2390 = vmatmul.f32.gmra.mxu2 %v2303_v50 }
 0x2db   : > { %v1452_v55 = vpop.f32.mrf.mxu1  ;;  %1998 = vmatmul.f32.gmra.mxu0 %v3941_v56 }
 0x2dc   : > { %v1502_v57 = vadd.f32 %v1452_v55, %v1288_v53  ;;  %2604 = vmatmul.f32.gmra.mxu3 %v2517_v54  ;;  %v3950_v53 = vld [vmem:[%s4388_s26 + $0x7b] sm:$0xff] }
 0x2dd   : > { %v1630_v58 = vpop.f32.mrf.mxu2  ;;  %v2308_v55 = vld [vmem:[%s4388_s26 + $0x94] sm:$0xff] }
 0x2de   : > { %v1680_v59 = vadd.f32 %v1630_v58, %v1502_v57  ;;  %2176 = vmatmul.f32.gmra.mxu1 %v3942_v60  ;;  %v3123_v60 = vld [vmem:[#allocation5 + $0x738] sm:$0xff] }
 0x2df   : > { %v1844_v62 = vpop.f32.mrf.mxu3  ;;  %3140 = vmatpush.msrb.mxu2 %v3123_v60 }
 0x2e0   : > { %v1894_v0 = vadd.f32 %v1844_v62, %v1680_v59  ;;  %v1241_v1 = vpop.f32.mrf.mxu0  ;;  %v2522_v59 = vld [vmem:[%s4388_s26 + $0x95] sm:$0xff]  ;;  %v3951_v62 = vld [vmem:[%s4388_s26 + $0x82] sm:$0xff] }
 0x2e1   : > { %v1289_v2 = vadd.f32 %v4792_v24, %v1241_v1  ;;  %v3337_v1 = vld [vmem:[#allocation5 + $0x7b8] sm:$0xff] }
 0x2e2   : > { %3690 = vst [vmem:[%s4474_s23 + $0x208] sm:$0xff] %v1894_v0  ;;  %2393 = vmatmul.f32.gmra.mxu2 %v2304_v63  ;;  %v2767_v0 = vld [vmem:[#allocation5 + $0x638] sm:$0xff]  ;;  %3354 = vmatpush.msrb.mxu3 %v3337_v1 }
 0x2e3   : > { %v1455_v7 = vpop.f32.mrf.mxu1  ;;  %2001 = vmatmul.f32.gmra.mxu0 %v3943_v8  ;;  %v2527_v1 = vld [vmem:[%s4388_s26 + $0xbd] sm:$0xff] }
 0x2e4   : > { %v1503_v9 = vadd.f32 %v1455_v7, %v1289_v2  ;;  %2607 = vmatmul.f32.gmra.mxu3 %v2518_v3  ;;  %2784 = vmatpush.msrb.mxu0 %v2767_v0  ;;  %v2309_v7 = vld [vmem:[%s4388_s26 + $0x9c] sm:$0xff] }
 0x2e5   : > { %v1633_v10 = vpop.f32.mrf.mxu2  ;;  %3355 = vmatpush.msrb.mxu3 %v3336_v32 }
 0x2e6   : > { %v1681_v11 = vadd.f32 %v1633_v10, %v1503_v9  ;;  %2179 = vmatmul.f32.gmra.mxu1 %v3944_v12  ;;  %2785 = vmatpush.msrb.mxu0 %v2766_v31  ;;  %v3334_v31 = vld [vmem:[#allocation5 + $0x7a0] sm:$0xff] }
 0x2e7   : > { %v1847_v13 = vpop.f32.mrf.mxu3 }
 0x2e8   : > { %v1895_v14 = vadd.f32 %v1847_v13, %v1681_v11  ;;  %v1244_v15 = vpop.f32.mrf.mxu0  ;;  %v2523_v11 = vld [vmem:[%s4388_s26 + $0x9d] sm:$0xff]  ;;  %v3953_v13 = vld [vmem:[%s4388_s26 + $0x8a] sm:$0xff] }
 0x2e9   : > { %v1290_v16 = vadd.f32 %v4792_v24, %v1244_v15 }
 0x2ea   : > { %3691 = vst [vmem:[%s4474_s23 + $0x210] sm:$0xff] %v1895_v14  ;;  %2396 = vmatmul.f32.gmra.mxu2 %v2305_v36 }
 0x2eb   : > { %v1458_v19 = vpop.f32.mrf.mxu1  ;;  %2004 = vmatmul.f32.gmra.mxu0 %v3945_v20 }
 0x2ec   : > { %v1504_v21 = vadd.f32 %v1458_v19, %v1290_v16  ;;  %2610 = vmatmul.f32.gmra.mxu3 %v2519_v17  ;;  %v3954_v16 = vld [vmem:[%s4388_s26 + $0x8b] sm:$0xff] }
 0x2ed   : > { %v1636_v22 = vpop.f32.mrf.mxu2  ;;  %v2310_v19 = vld [vmem:[%s4388_s26 + $0xa4] sm:$0xff] }
 0x2ee   : > { %v1682_v18 = vadd.f32 %v1636_v22, %v1504_v21  ;;  %2182 = vmatmul.f32.gmra.mxu1 %v3946_v23 }
 0x2ef   : > { %v1850_v25 = vpop.f32.mrf.mxu3 }
 0x2f0   : > { %v1896_v27 = vadd.f32 %v1850_v25, %v1682_v18  ;;  %v1247_v28 = vpop.f32.mrf.mxu0  ;;  %v2524_v18 = vld [vmem:[%s4388_s26 + $0xa5] sm:$0xff]  ;;  %v3955_v25 = vld [vmem:[%s4388_s26 + $0x92] sm:$0xff] }
 0x2f1   : > { %v1291_v29 = vadd.f32 %v4792_v24, %v1247_v28 }
 0x2f2   : > { %3692 = vst [vmem:[%s4474_s23 + $0x218] sm:$0xff] %v1896_v27  ;;  %2399 = vmatmul.f32.gmra.mxu2 %v2306_v26  ;;  %v3122_v27 = vld [vmem:[#allocation5 + $0x730] sm:$0xff] }
 0x2f3   : > { %v1461_v34 = vpop.f32.mrf.mxu1  ;;  %2007 = vmatmul.f32.gmra.mxu0 %v3947_v35  ;;  %3141 = vmatpush.msrb.mxu2 %v3122_v27 }
 0x2f4   : > { %v1505_v37 = vadd.f32 %v1461_v34, %v1291_v29  ;;  %2613 = vmatmul.f32.gmra.mxu3 %v2520_v30  ;;  %v3956_v30 = vld [vmem:[%s4388_s26 + $0x93] sm:$0xff] }
 0x2f5   : > { %v1639_v39 = vpop.f32.mrf.mxu2  ;;  %v2311_v34 = vld [vmem:[%s4388_s26 + $0xac] sm:$0xff] }
 0x2f6   : > { %v1683_v40 = vadd.f32 %v1639_v39, %v1505_v37  ;;  %2185 = vmatmul.f32.gmra.mxu1 %v3948_v41  ;;  %v2525_v39 = vld [vmem:[%s4388_s26 + $0xad] sm:$0xff] }
 0x2f7   : > { %v1853_v42 = vpop.f32.mrf.mxu3 }
 0x2f8   : > { %v1897_v44 = vadd.f32 %v1853_v42, %v1683_v40  ;;  %v1250_v45 = vpop.f32.mrf.mxu0  ;;  %v2944_v40 = vld [vmem:[#allocation5 + $0x6b0] sm:$0xff] }
 0x2f9   : > { %v1292_v46 = vadd.f32 %v4792_v24, %v1250_v45  ;;  %v3957_v42 = vld [vmem:[%s4388_s26 + $0x9a] sm:$0xff]  ;;  %2963 = vmatpush.msrb.mxu1 %v2944_v40 }
 0x2fa   : > { %3693 = vst [vmem:[%s4474_s23 + $0x220] sm:$0xff] %v1897_v44  ;;  %2402 = vmatmul.f32.gmra.mxu2 %v2307_v43 }
 0x2fb   : > { %v1464_v48 = vpop.f32.mrf.mxu1  ;;  %2010 = vmatmul.f32.gmra.mxu0 %v3949_v49 }
 0x2fc   : > { %v1506_v50 = vadd.f32 %v1464_v48, %v1292_v46  ;;  %2616 = vmatmul.f32.gmra.mxu3 %v2521_v47  ;;  %v3958_v46 = vld [vmem:[%s4388_s26 + $0x9b] sm:$0xff] }
 0x2fd   : > { %v1642_v51 = vpop.f32.mrf.mxu2  ;;  %v2312_v48 = vld [vmem:[%s4388_s26 + $0xb4] sm:$0xff] }
 0x2fe   : > { %v1684_v52 = vadd.f32 %v1642_v51, %v1506_v50  ;;  %2188 = vmatmul.f32.gmra.mxu1 %v3950_v53 }
 0x2ff   : > { %v1856_v54 = vpop.f32.mrf.mxu3 }
 0x300   : > { %v1898_v56 = vadd.f32 %v1856_v54, %v1684_v52  ;;  %v1253_v57 = vpop.f32.mrf.mxu0  ;;  %v2526_v52 = vld [vmem:[%s4388_s26 + $0xb5] sm:$0xff]  ;;  %v3959_v54 = vld [vmem:[%s4388_s26 + $0xa2] sm:$0xff] }
 0x301   : > { %v1293_v58 = vadd.f32 %v4792_v24, %v1253_v57 }
 0x302   : > { %3694 = vst [vmem:[%s4474_s23 + $0x228] sm:$0xff] %v1898_v56  ;;  %2405 = vmatmul.f32.gmra.mxu2 %v2308_v55 }
 0x303   : > { %v1467_v61 = vpop.f32.mrf.mxu1  ;;  %2013 = vmatmul.f32.gmra.mxu0 %v3951_v62 }
 0x304   : > { %v1507_v63 = vadd.f32 %v1467_v61, %v1293_v58  ;;  %2619 = vmatmul.f32.gmra.mxu3 %v2522_v59  ;;  %v3960_v58 = vld [vmem:[%s4388_s26 + $0xa3] sm:$0xff]  ;;  %v3121_v59 = vld [vmem:[#allocation5 + $0x728] sm:$0xff] }
 0x305   : > { %v1645_v2 = vpop.f32.mrf.mxu2  ;;  %v2313_v61 = vld [vmem:[%s4388_s26 + $0xbc] sm:$0xff]  ;;  %3142 = vmatpush.msrb.mxu2 %v3121_v59 }
 0x306   : > { %v1685_v3 = vadd.f32 %v1645_v2, %v1507_v63  ;;  %2191 = vmatmul.f32.gmra.mxu1 %v3952_v4  ;;  %v2765_v2 = vld [vmem:[#allocation5 + $0x628] sm:$0xff] }
 0x307   : > { %v1859_v6 = vpop.f32.mrf.mxu3  ;;  %v2943_v4 = vld [vmem:[#allocation5 + $0x6a8] sm:$0xff]  ;;  %2786 = vmatpush.msrb.mxu0 %v2765_v2 }
 0x308   : > { %v1899_v8 = vadd.f32 %v1859_v6, %v1685_v3  ;;  %v1256_v9 = vpop.f32.mrf.mxu0  ;;  %v3335_v3 = vld [vmem:[#allocation5 + $0x7a8] sm:$0xff]  ;;  %2964 = vmatpush.msrb.mxu1 %v2943_v4 }
 0x309   : > { %v1294_v10 = vadd.f32 %v4792_v24, %v1256_v9  ;;  %v3961_v6 = vld [vmem:[%s4388_s26 + $0xaa] sm:$0xff]  ;;  %3356 = vmatpush.msrb.mxu3 %v3335_v3 }
 0x30a   : > { %3695 = vst [vmem:[%s4474_s23 + $0x230] sm:$0xff] %v1899_v8  ;;  %2408 = vmatmul.f32.gmra.mxu2 %v2309_v7  ;;  %v3970_v2 = vld [vmem:[%s4388_s26 + $0xcb] sm:$0xff] }
 0x30b   : > { %v1470_v12 = vpop.f32.mrf.mxu1  ;;  %2016 = vmatmul.f32.gmra.mxu0 %v3953_v13  ;;  %3357 = vmatpush.msrb.mxu3 %v3334_v31  ;;  %v2941_v3 = vld [vmem:[#allocation5 + $0x698] sm:$0xff]  ;;  %v2320_v31 = vld [vmem:[%s4388_s26 + $0xf4] sm:$0xff] }
 0x30c   : > { %v1508_v36 = vadd.f32 %v1470_v12, %v1294_v10  ;;  %2622 = vmatmul.f32.gmra.mxu3 %v2523_v11  ;;  %v3962_v10 = vld [vmem:[%s4388_s26 + $0xab] sm:$0xff] }
 0x30d   : > { %v1648_v14 = vpop.f32.mrf.mxu2  ;;  %v2314_v12 = vld [vmem:[%s4388_s26 + $0xc4] sm:$0xff] }
 0x30e   : > { %v1686_v15 = vadd.f32 %v1648_v14, %v1508_v36  ;;  %2194 = vmatmul.f32.gmra.mxu1 %v3954_v16 }
 0x30f   : > { %v1862_v17 = vpop.f32.mrf.mxu3 }
 0x310   : > { %v1900_v20 = vadd.f32 %v1862_v17, %v1686_v15  ;;  %v1972_v21 = vpop.f32.mrf.mxu0  ;;  %v2528_v15 = vld [vmem:[%s4388_s26 + $0xc5] sm:$0xff]  ;;  %v3963_v17 = vld [vmem:[%s4388_s26 + $0xb2] sm:$0xff] }
 0x311   : > { %v2080_v22 = vadd.f32 %v4792_v24, %v1972_v21 }
 0x312   : > { %3696 = vst [vmem:[%s4474_s23 + $0x238] sm:$0xff] %v1900_v20  ;;  %2411 = vmatmul.f32.gmra.mxu2 %v2310_v19 }
 0x313   : > { %v2150_v23 = vpop.f32.mrf.mxu1  ;;  %2019 = vmatmul.f32.gmra.mxu0 %v3955_v25 }
 0x314   : > { %v2258_v26 = vadd.f32 %v2150_v23, %v2080_v22  ;;  %2625 = vmatmul.f32.gmra.mxu3 %v2524_v18  ;;  %v3964_v22 = vld [vmem:[%s4388_s26 + $0xb3] sm:$0xff] }
 0x315   : > { %v2364_v28 = vpop.f32.mrf.mxu2  ;;  %v2315_v23 = vld [vmem:[%s4388_s26 + $0xcc] sm:$0xff] }
 0x316   : > { %v2472_v29 = vadd.f32 %v2364_v28, %v2258_v26  ;;  %2197 = vmatmul.f32.gmra.mxu1 %v3956_v30  ;;  %v2529_v28 = vld [vmem:[%s4388_s26 + $0xcd] sm:$0xff] }
 0x317   : > { %v2578_v33 = vpop.f32.mrf.mxu3  ;;  %v2764_v30 = vld [vmem:[#allocation5 + $0x620] sm:$0xff] }
 0x318   : > { %v2686_v35 = vadd.f32 %v2578_v33, %v2472_v29  ;;  %v1975_v37 = vpop.f32.mrf.mxu0  ;;  %v3120_v29 = vld [vmem:[#allocation5 + $0x720] sm:$0xff]  ;;  %v3965_v33 = vld [vmem:[%s4388_s26 + $0xba] sm:$0xff]  ;;  %2787 = vmatpush.msrb.mxu0 %v2764_v30 }
 0x319   : > { %v2081_v38 = vadd.f32 %v4792_v24, %v1975_v37  ;;  %3143 = vmatpush.msrb.mxu2 %v3120_v29  ;;  %v2762_v29 = vld [vmem:[#allocation5 + $0x610] sm:$0xff] }
 0x31a   : > { %3697 = vst [vmem:[%s4474_s23 + $0x240] sm:$0xff] %v2686_v35  ;;  %2414 = vmatmul.f32.gmra.mxu2 %v2311_v34  ;;  %v2942_v35 = vld [vmem:[#allocation5 + $0x6a0] sm:$0xff] }
 0x31b   : > { %v2153_v41 = vpop.f32.mrf.mxu1  ;;  %2022 = vmatmul.f32.gmra.mxu0 %v3957_v42  ;;  %2965 = vmatpush.msrb.mxu1 %v2942_v35 }
 0x31c   : > { %v2259_v43 = vadd.f32 %v2153_v41, %v2081_v38  ;;  %2628 = vmatmul.f32.gmra.mxu3 %v2525_v39  ;;  %v3966_v39 = vld [vmem:[%s4388_s26 + $0xbb] sm:$0xff] }
 0x31d   : > { %v2367_v44 = vpop.f32.mrf.mxu2  ;;  %v2316_v41 = vld [vmem:[%s4388_s26 + $0xd4] sm:$0xff]  ;;  %2966 = vmatpush.msrb.mxu1 %v2941_v3 }
 0x31e   : > { %v2473_v45 = vadd.f32 %v2367_v44, %v2259_v43  ;;  %2200 = vmatmul.f32.gmra.mxu1 %v3958_v46 }
 0x31f   : > { %v2581_v47 = vpop.f32.mrf.mxu3 }
 0x320   : > { %v2687_v49 = vadd.f32 %v2581_v47, %v2473_v45  ;;  %v1978_v50 = vpop.f32.mrf.mxu0  ;;  %v2530_v45 = vld [vmem:[%s4388_s26 + $0xd5] sm:$0xff]  ;;  %v3967_v47 = vld [vmem:[%s4388_s26 + $0xc2] sm:$0xff] }
 0x321   : > { %v2082_v51 = vadd.f32 %v4792_v24, %v1978_v50 }
 0x322   : > { %3698 = vst [vmem:[%s4474_s23 + $0x248] sm:$0xff] %v2687_v49  ;;  %2417 = vmatmul.f32.gmra.mxu2 %v2312_v48 }
 0x323   : > { %v2156_v53 = vpop.f32.mrf.mxu1  ;;  %2025 = vmatmul.f32.gmra.mxu0 %v3959_v54 }
 0x324   : > { %v2260_v55 = vadd.f32 %v2156_v53, %v2082_v51  ;;  %2631 = vmatmul.f32.gmra.mxu3 %v2526_v52  ;;  %v3968_v51 = vld [vmem:[%s4388_s26 + $0xc3] sm:$0xff] }
 0x325   : > { %v2370_v56 = vpop.f32.mrf.mxu2  ;;  %v2317_v53 = vld [vmem:[%s4388_s26 + $0xdc] sm:$0xff] }
 0x326   : > { %v2474_v57 = vadd.f32 %v2370_v56, %v2260_v55  ;;  %2203 = vmatmul.f32.gmra.mxu1 %v3960_v58  ;;  %v3119_v58 = vld [vmem:[#allocation5 + $0x718] sm:$0xff] }
 0x327   : > { %v2584_v60 = vpop.f32.mrf.mxu3  ;;  %3144 = vmatpush.msrb.mxu2 %v3119_v58 }
 0x328   : > { %v2688_v62 = vadd.f32 %v2584_v60, %v2474_v57  ;;  %v1981_v63 = vpop.f32.mrf.mxu0  ;;  %v2531_v57 = vld [vmem:[%s4388_s26 + $0xdd] sm:$0xff]  ;;  %v3969_v60 = vld [vmem:[%s4388_s26 + $0xca] sm:$0xff] }
 0x329   : > { %v2083_v0 = vadd.f32 %v4792_v24, %v1981_v63  ;;  %v3333_v63 = vld [vmem:[#allocation5 + $0x798] sm:$0xff] }
 0x32a   : > { %3699 = vst [vmem:[%s4474_s23 + $0x250] sm:$0xff] %v2688_v62  ;;  %2420 = vmatmul.f32.gmra.mxu2 %v2313_v61  ;;  %v2763_v62 = vld [vmem:[#allocation5 + $0x618] sm:$0xff]  ;;  %3358 = vmatpush.msrb.mxu3 %v3333_v63 }
 0x32b   : > { %v2159_v5 = vpop.f32.mrf.mxu1  ;;  %2028 = vmatmul.f32.gmra.mxu0 %v3961_v6  ;;  %v2536_v63 = vld [vmem:[%s4388_s26 + $0x105] sm:$0xff] }
 0x32c   : > { %v2261_v7 = vadd.f32 %v2159_v5, %v2083_v0  ;;  %2634 = vmatmul.f32.gmra.mxu3 %v2527_v1  ;;  %2788 = vmatpush.msrb.mxu0 %v2763_v62  ;;  %v2318_v5 = vld [vmem:[%s4388_s26 + $0xe4] sm:$0xff] }
 0x32d   : > { %v2373_v8 = vpop.f32.mrf.mxu2 }
 0x32e   : > { %v2475_v9 = vadd.f32 %v2373_v8, %v2261_v7  ;;  %2206 = vmatmul.f32.gmra.mxu1 %v3962_v10  ;;  %2789 = vmatpush.msrb.mxu0 %v2762_v29  ;;  %v3330_v29 = vld [vmem:[#allocation5 + $0x780] sm:$0xff] }
 0x32f   : > { %v2587_v11 = vpop.f32.mrf.mxu3 }
 0x330   : > { %v2689_v13 = vadd.f32 %v2587_v11, %v2475_v9  ;;  %v1984_v36 = vpop.f32.mrf.mxu0  ;;  %v2532_v9 = vld [vmem:[%s4388_s26 + $0xe5] sm:$0xff]  ;;  %v3971_v11 = vld [vmem:[%s4388_s26 + $0xd2] sm:$0xff] }
 0x331   : > { %v2084_v14 = vadd.f32 %v4792_v24, %v1984_v36 }
 0x332   : > { %3700 = vst [vmem:[%s4474_s23 + $0x258] sm:$0xff] %v2689_v13  ;;  %2423 = vmatmul.f32.gmra.mxu2 %v2314_v12 }
 0x333   : > { %v2162_v16 = vpop.f32.mrf.mxu1  ;;  %2031 = vmatmul.f32.gmra.mxu0 %v3963_v17 }
 0x334   : > { %v2262_v19 = vadd.f32 %v2162_v16, %v2084_v14  ;;  %2637 = vmatmul.f32.gmra.mxu3 %v2528_v15  ;;  %v3972_v14 = vld [vmem:[%s4388_s26 + $0xd3] sm:$0xff] }
 0x335   : > { %v2376_v20 = vpop.f32.mrf.mxu2  ;;  %v2319_v16 = vld [vmem:[%s4388_s26 + $0xec] sm:$0xff] }
 0x336   : > { %v2476_v21 = vadd.f32 %v2376_v20, %v2262_v19  ;;  %2209 = vmatmul.f32.gmra.mxu1 %v3964_v22 }
 0x337   : > { %v2590_v18 = vpop.f32.mrf.mxu3 }
 0x338   : > { %v2690_v25 = vadd.f32 %v2590_v18, %v2476_v21  ;;  %v1987_v26 = vpop.f32.mrf.mxu0  ;;  %v2533_v21 = vld [vmem:[%s4388_s26 + $0xed] sm:$0xff]  ;;  %v3973_v18 = vld [vmem:[%s4388_s26 + $0xda] sm:$0xff] }
 0x339   : > { %v2085_v27 = vadd.f32 %v4792_v24, %v1987_v26 }
 0x33a   : > { %3701 = vst [vmem:[%s4474_s23 + $0x260] sm:$0xff] %v2690_v25  ;;  %2426 = vmatmul.f32.gmra.mxu2 %v2315_v23  ;;  %v3118_v25 = vld [vmem:[#allocation5 + $0x710] sm:$0xff] }
 0x33b   : > { %v2165_v32 = vpop.f32.mrf.mxu1  ;;  %2034 = vmatmul.f32.gmra.mxu0 %v3965_v33  ;;  %3145 = vmatpush.msrb.mxu2 %v3118_v25 }
 0x33c   : > { %v2263_v34 = vadd.f32 %v2165_v32, %v2085_v27  ;;  %2640 = vmatmul.f32.gmra.mxu3 %v2529_v28  ;;  %v3974_v28 = vld [vmem:[%s4388_s26 + $0xdb] sm:$0xff] }
 0x33d   : > { %v2379_v37 = vpop.f32.mrf.mxu2 }
 0x33e   : > { %v2477_v38 = vadd.f32 %v2379_v37, %v2263_v34  ;;  %2212 = vmatmul.f32.gmra.mxu1 %v3966_v39  ;;  %v4963_v34 = vld [vmem:[#allocation7] ss:$0 sm:$0xff]  ;;  %v2534_v37 = vld [vmem:[%s4388_s26 + $0xf5] sm:$0xff] }
 0x33f   : > { %v2593_v40 = vpop.f32.mrf.mxu3 }
 0x340   : > { %v2691_v42 = vadd.f32 %v2593_v40, %v2477_v38  ;;  %v1990_v43 = vpop.f32.mrf.mxu0  ;;  %v2940_v38 = vld [vmem:[#allocation5 + $0x690] sm:$0xff] }
 0x341   : > { %v2086_v44 = vadd.f32 %v4792_v24, %v1990_v43  ;;  %v3976_v40 = vld [vmem:[%s4388_s26 + $0xe2] sm:$0xff]  ;;  %2967 = vmatpush.msrb.mxu1 %v2940_v38 }
 0x342   : > { %3702 = vst [vmem:[%s4474_s23 + $0x268] sm:$0xff] %v2691_v42  ;;  %2429 = vmatmul.f32.gmra.mxu2 %v2316_v41 }
 0x343   : > { %v2168_v46 = vpop.f32.mrf.mxu1  ;;  %2037 = vmatmul.f32.gmra.mxu0 %v3967_v47 }
 0x344   : > { %v2264_v48 = vadd.f32 %v2168_v46, %v2086_v44  ;;  %2643 = vmatmul.f32.gmra.mxu3 %v2530_v45  ;;  %v3977_v44 = vld [vmem:[%s4388_s26 + $0xe3] sm:$0xff] }
 0x345   : > { %v2382_v49 = vpop.f32.mrf.mxu2  ;;  %v2321_v46 = vld [vmem:[%s4388_s26 + $0xfc] sm:$0xff] }
 0x346   : > { %v2478_v50 = vadd.f32 %v2382_v49, %v2264_v48  ;;  %2215 = vmatmul.f32.gmra.mxu1 %v3968_v51 }
 0x347   : > { %v2596_v52 = vpop.f32.mrf.mxu3 }
 0x348   : > { %v2692_v54 = vadd.f32 %v2596_v52, %v2478_v50  ;;  %v1993_v55 = vpop.f32.mrf.mxu0  ;;  %v2535_v50 = vld [vmem:[%s4388_s26 + $0xfd] sm:$0xff]  ;;  %v3978_v52 = vld [vmem:[%s4388_s26 + $0xea] sm:$0xff] }
 0x349   : > { %v2087_v56 = vadd.f32 %v4792_v24, %v1993_v55 }
 0x34a   : > { %3703 = vst [vmem:[%s4474_s23 + $0x270] sm:$0xff] %v2692_v54  ;;  %2432 = vmatmul.f32.gmra.mxu2 %v2317_v53 }
 0x34b   : > { %v2171_v59 = vpop.f32.mrf.mxu1  ;;  %2040 = vmatmul.f32.gmra.mxu0 %v3969_v60 }
 0x34c   : > { %v2265_v61 = vadd.f32 %v2171_v59, %v2087_v56  ;;  %2646 = vmatmul.f32.gmra.mxu3 %v2531_v57  ;;  %v3979_v56 = vld [vmem:[%s4388_s26 + $0xeb] sm:$0xff] }
 0x34d   : > { %v2385_v0 = vpop.f32.mrf.mxu2  ;;  %v3117_v57 = vld [vmem:[#allocation5 + $0x708] sm:$0xff]  ;;  %v2322_v59 = vld [vmem:[%s4388_s26 + $0x104] sm:$0xff] }
 0x34e   : > { %v2479_v1 = vadd.f32 %v2385_v0, %v2265_v61  ;;  %2218 = vmatmul.f32.gmra.mxu1 %v3970_v2  ;;  %3146 = vmatpush.msrb.mxu2 %v3117_v57  ;;  %v2761_v0 = vld [vmem:[#allocation5 + $0x608] sm:$0xff] }
 0x34f   : > { %v2599_v4 = vpop.f32.mrf.mxu3  ;;  %v2939_v2 = vld [vmem:[#allocation5 + $0x688] sm:$0xff]  ;;  %2790 = vmatpush.msrb.mxu0 %v2761_v0 }
 0x350   : > { %v2693_v6 = vadd.f32 %v2599_v4, %v2479_v1  ;;  %v1996_v7 = vpop.f32.mrf.mxu0  ;;  %v3331_v1 = vld [vmem:[#allocation5 + $0x788] sm:$0xff]  ;;  %2968 = vmatpush.msrb.mxu1 %v2939_v2 }
 0x351   : > { %v2088_v8 = vadd.f32 %v4792_v24, %v1996_v7  ;;  %v3980_v4 = vld [vmem:[%s4388_s26 + $0xf2] sm:$0xff] }
 0x352   : > { %3704 = vst [vmem:[%s4474_s23 + $0x278] sm:$0xff] %v2693_v6  ;;  %2435 = vmatmul.f32.gmra.mxu2 %v2318_v5  ;;  %v3988_v57 = vld [vmem:[%s4388_s26 + $0x112] sm:$0xff] }
 0x353   : > { %v2174_v10 = vpop.f32.mrf.mxu1  ;;  %2043 = vmatmul.f32.gmra.mxu0 %v3971_v11 }
 0x354   : > { %v2266_v12 = vadd.f32 %v2174_v10, %v2088_v8  ;;  %2649 = vmatmul.f32.gmra.mxu3 %v2532_v9  ;;  %v3981_v8 = vld [vmem:[%s4388_s26 + $0xf3] sm:$0xff] }
 0x355   : > { %v2388_v13 = vpop.f32.mrf.mxu2  ;;  %v2323_v10 = vld [vmem:[%s4388_s26 + $0x10c] sm:$0xff] }
 0x356   : > { %v2480_v36 = vadd.f32 %v2388_v13, %v2266_v12  ;;  %2221 = vmatmul.f32.gmra.mxu1 %v3972_v14 }
 0x357   : > { %v2602_v15 = vpop.f32.mrf.mxu3 }
 0x358   : > { %v2694_v17 = vadd.f32 %v2602_v15, %v2480_v36  ;;  %v1999_v19 = vpop.f32.mrf.mxu0  ;;  %v2537_v36 = vld [vmem:[%s4388_s26 + $0x10d] sm:$0xff]  ;;  %v3982_v15 = vld [vmem:[%s4388_s26 + $0xfa] sm:$0xff] }
 0x359   : > { %v2089_v20 = vadd.f32 %v4792_v24, %v1999_v19  ;;  %v3332_v24 = vld [vmem:[#allocation5 + $0x790] sm:$0xff] }
 0x35a   : > { %3705 = vst [vmem:[%s4474_s23 + $0x280] sm:$0xff] %v2694_v17  ;;  %2438 = vmatmul.f32.gmra.mxu2 %v2319_v16  ;;  %3359 = vmatpush.msrb.mxu3 %v3332_v24 }
 0x35b   : > { %v2177_v22 = vpop.f32.mrf.mxu1  ;;  %2046 = vmatmul.f32.gmra.mxu0 %v3973_v18 }
 0x35c   : > { %v2267_v23 = vadd.f32 %v2177_v22, %v2089_v20  ;;  %2652 = vmatmul.f32.gmra.mxu3 %v2533_v21  ;;  %v3983_v20 = vld [vmem:[%s4388_s26 + $0xfb] sm:$0xff] }
 0x35d   : > { %v2391_v26 = vpop.f32.mrf.mxu2  ;;  %3360 = vmatpush.msrb.mxu3 %v3331_v1  ;;  %v2324_v22 = vld [vmem:[%s4388_s26 + $0x114] sm:$0xff] }
 0x35e   : > { %v2481_v27 = vadd.f32 %v2391_v26, %v2267_v23  ;;  %2224 = vmatmul.f32.gmra.mxu1 %v3974_v28  ;;  %v2538_v26 = vld [vmem:[%s4388_s26 + $0x115] sm:$0xff] }
 0x35f   : > { %v2605_v30 = vpop.f32.mrf.mxu3  ;;  %v2760_v28 = vld [vmem:[#allocation5 + $0x600] sm:$0xff]  ;;  %3361 = vmatpush.msrb.mxu3 %v3330_v29 }
 0x360   : > { %v2695_v32 = vadd.f32 %v2605_v30, %v2481_v27  ;;  %v2002_v33 = vpop.f32.mrf.mxu0  ;;  %v3116_v27 = vld [vmem:[#allocation5 + $0x700] sm:$0xff]  ;;  %2791 = vmatpush.msrb.mxu0 %v2760_v28 }
 0x361   : > { %v2090_v35 = vadd.f32 %v4963_v34, %v2002_v33  ;;  %v3984_v30 = vld [vmem:[%s4388_s26 + $0x102] sm:$0xff]  ;;  %3147 = vmatpush.msrb.mxu2 %v3116_v27  ;;  %v3994_v29 = vld [vmem:[%s4388_s26 + $0x12a] sm:$0xff] }
 0x362   : > { %3706 = vst [vmem:[%s4474_s23 + $0x288] sm:$0xff] %v2695_v32  ;;  %2441 = vmatmul.f32.gmra.mxu2 %v2320_v31  ;;  %v2938_v32 = vld [vmem:[#allocation5 + $0x680] sm:$0xff]  ;;  %v5048_v27 = vld [vmem:[%s4388_s26 + $0x13d] sm:$0xff] }
 0x363   : > { %v2180_v39 = vpop.f32.mrf.mxu1  ;;  %2049 = vmatmul.f32.gmra.mxu0 %v3976_v40  ;;  %2969 = vmatpush.msrb.mxu1 %v2938_v32  ;;  %v5054_v32 = vld [vmem:[%s4388_s26 + $0x12b] sm:$0xff] }
 0x364   : > { %v2268_v41 = vadd.f32 %v2180_v39, %v2090_v35  ;;  %2655 = vmatmul.f32.gmra.mxu3 %v2534_v37  ;;  %v4994_v37 = vld [vmem:[%s4388_s26 + $0x103] sm:$0xff] }
 0x365   : > { %v2394_v42 = vpop.f32.mrf.mxu2  ;;  %v2325_v39 = vld [vmem:[%s4388_s26 + $0x11c] sm:$0xff] }
 0x366   : > { %v2482_v43 = vadd.f32 %v2394_v42, %v2268_v41  ;;  %2227 = vmatmul.f32.gmra.mxu1 %v3977_v44 }
 0x367   : > { %v2608_v45 = vpop.f32.mrf.mxu3 }
 0x368   : > { %v2696_v47 = vadd.f32 %v2608_v45, %v2482_v43  ;;  %v2005_v48 = vpop.f32.mrf.mxu0  ;;  %v5000_v43 = vld [vmem:[%s4388_s26 + $0x11d] sm:$0xff]  ;;  %v3986_v45 = vld [vmem:[%s4388_s26 + $0x10a] sm:$0xff] }
 0x369   : > { %v2091_v49 = vadd.f32 %v4963_v34, %v2005_v48 }
 0x36a   : > { %3707 = vst [vmem:[%s4474_s23 + $0x290] sm:$0xff] %v2696_v47  ;;  %2444 = vmatmul.f32.gmra.mxu2 %v2321_v46 }
 0x36b   : > { %v2183_v51 = vpop.f32.mrf.mxu1  ;;  %2052 = vmatmul.f32.gmra.mxu0 %v3978_v52 }
 0x36c   : > { %v2269_v53 = vadd.f32 %v2183_v51, %v2091_v49  ;;  %2658 = vmatmul.f32.gmra.mxu3 %v2535_v50  ;;  %v5006_v49 = vld [vmem:[%s4388_s26 + $0x10b] sm:$0xff] }
 0x36d   : > { %v2397_v54 = vpop.f32.mrf.mxu2  ;;  %v2326_v51 = vld [vmem:[%s4388_s26 + $0x124] sm:$0xff] }
 0x36e   : > { %v2483_v55 = vadd.f32 %v2397_v54, %v2269_v53  ;;  %2230 = vmatmul.f32.gmra.mxu1 %v3979_v56 }
 0x36f   : > { %v2611_v58 = vpop.f32.mrf.mxu3 }
 0x370   : > { %v2697_v60 = vadd.f32 %v2611_v58, %v2483_v55  ;;  %v2008_v61 = vpop.f32.mrf.mxu0  ;;  %v5012_v55 = vld [vmem:[%s4388_s26 + $0x125] sm:$0xff] }
 0x371   : > { %v2092_v62 = vadd.f32 %v4963_v34, %v2008_v61  ;;  %v5018_v61 = vld [vmem:[%s4388_s26 + $0x113] sm:$0xff] }
 0x372   : > { %3708 = vst [vmem:[%s4474_s23 + $0x298] sm:$0xff] %v2697_v60  ;;  %2447 = vmatmul.f32.gmra.mxu2 %v2322_v59 }
 0x373   : > { %v2186_v3 = vpop.f32.mrf.mxu1  ;;  %2055 = vmatmul.f32.gmra.mxu0 %v3980_v4 }
 0x374   : > { %v2270_v5 = vadd.f32 %v2186_v3, %v2092_v62  ;;  %2661 = vmatmul.f32.gmra.mxu3 %v2536_v63  ;;  %v2327_v63 = vld [vmem:[%s4388_s26 + $0x12c] sm:$0xff] }
 0x375   : > { %v2400_v6 = vpop.f32.mrf.mxu2  ;;  %v5024_v3 = vld [vmem:[%s4388_s26 + $0x12d] sm:$0xff] }
 0x376   : > { %v2484_v7 = vadd.f32 %v2400_v6, %v2270_v5  ;;  %2233 = vmatmul.f32.gmra.mxu1 %v3981_v8  ;;  %v3990_v5 = vld [vmem:[%s4388_s26 + $0x11a] sm:$0xff] }
 0x377   : > { %v2614_v9 = vpop.f32.mrf.mxu3 }
 0x378   : > { %v2698_v11 = vadd.f32 %v2614_v9, %v2484_v7  ;;  %v2011_v12 = vpop.f32.mrf.mxu0  ;;  %v5030_v9 = vld [vmem:[%s4388_s26 + $0x11b] sm:$0xff] }
 0x379   : > { %v2093_v13 = vadd.f32 %v4963_v34, %v2011_v12 }
 0x37a   : > { %3709 = vst [vmem:[%s4474_s23 + $0x2a0] sm:$0xff] %v2698_v11  ;;  %2450 = vmatmul.f32.gmra.mxu2 %v2323_v10  ;;  %v2328_v11 = vld [vmem:[%s4388_s26 + $0x134] sm:$0xff] }
 0x37b   : > { %v2189_v14 = vpop.f32.mrf.mxu1  ;;  %2058 = vmatmul.f32.gmra.mxu0 %v3982_v15 }
 0x37c   : > { %v2271_v16 = vadd.f32 %v2189_v14, %v2093_v13  ;;  %2664 = vmatmul.f32.gmra.mxu3 %v2537_v36  ;;  %v5036_v14 = vld [vmem:[%s4388_s26 + $0x135] sm:$0xff] }
 0x37d   : > { %v2403_v17 = vpop.f32.mrf.mxu2 }
 0x37e   : > { %v2485_v19 = vadd.f32 %v2403_v17, %v2271_v16  ;;  %2236 = vmatmul.f32.gmra.mxu1 %v3983_v20  ;;  %v3992_v16 = vld [vmem:[%s4388_s26 + $0x122] sm:$0xff] }
 0x37f   : > { %v2617_v21 = vpop.f32.mrf.mxu3 }
 0x380   : > { %v2699_v18 = vadd.f32 %v2617_v21, %v2485_v19  ;;  %v2014_v23 = vpop.f32.mrf.mxu0  ;;  %v5042_v21 = vld [vmem:[%s4388_s26 + $0x123] sm:$0xff] }
 0x381   : > { %v2094_v25 = vadd.f32 %v4963_v34, %v2014_v23 }
 0x382   : > { %3710 = vst [vmem:[%s4474_s23 + $0x2a8] sm:$0xff] %v2699_v18  ;;  %2453 = vmatmul.f32.gmra.mxu2 %v2324_v22  ;;  %v2329_v18 = vld [vmem:[%s4388_s26 + $0x13c] sm:$0xff] }
 0x383   : > { %v2192_v24 = vpop.f32.mrf.mxu1  ;;  %2061 = vmatmul.f32.gmra.mxu0 %v3984_v30 }
 0x384   : > { %v2272_v31 = vadd.f32 %v2192_v24, %v2094_v25  ;;  %2667 = vmatmul.f32.gmra.mxu3 %v2538_v26 }
 0x385   : > { %v2406_v33 = vpop.f32.mrf.mxu2 }
 0x386   : > { %v2486_v35 = vadd.f32 %v2406_v33, %v2272_v31  ;;  %2239 = vmatmul.f32.gmra.mxu1 %v4994_v37 }
 0x387   : > { %v2620_v38 = vpop.f32.mrf.mxu3 }
 0x388   : > { %v2700_v40 = vadd.f32 %v2620_v38, %v2486_v35  ;;  %v2017_v41 = vpop.f32.mrf.mxu0 }
 0x389   : > { %v2095_v42 = vadd.f32 %v4963_v34, %v2017_v41  ;;  %v3996_v41 = vld [vmem:[%s4388_s26 + $0x25] sm:$0xff] }
 0x38a   : > { %3711 = vst [vmem:[%s4474_s23 + $0x2b0] sm:$0xff] %v2700_v40  ;;  %2456 = vmatmul.f32.gmra.mxu2 %v2325_v39  ;;  %v3293_v40 = vld [vmem:[%s4388_s26 + $0x26] sm:$0xff] }
 0x38b   : > { %v2195_v44 = vpop.f32.mrf.mxu1  ;;  %2064 = vmatmul.f32.gmra.mxu0 %v3986_v45 }
 0x38c   : > { %v2273_v46 = vadd.f32 %v2195_v44, %v2095_v42  ;;  %2670 = vmatmul.f32.gmra.mxu3 %v5000_v43  ;;  %v3997_v44 = vld [vmem:[%s4388_s26 + $0x13] sm:$0xff] }
 0x38d   : > { %v2409_v47 = vpop.f32.mrf.mxu2 }
 0x38e   : > { %v2487_v48 = vadd.f32 %v2409_v47, %v2273_v46  ;;  %2242 = vmatmul.f32.gmra.mxu1 %v5006_v49 }
 0x38f   : > { %v2623_v50 = vpop.f32.mrf.mxu3 }
 0x390   : > { %v2701_v52 = vadd.f32 %v2623_v50, %v2487_v48  ;;  %v2020_v53 = vpop.f32.mrf.mxu0  ;;  %v3998_v48 = vld [vmem:[%s4388_s26 + $0x14] sm:$0xff] }
 0x391   : > { %v2096_v54 = vadd.f32 %v4963_v34, %v2020_v53 }
 0x392   : > { %3712 = vst [vmem:[%s4474_s23 + $0x2b8] sm:$0xff] %v2701_v52  ;;  %2459 = vmatmul.f32.gmra.mxu2 %v2326_v51 }
 0x393   : > { %v2198_v56 = vpop.f32.mrf.mxu1  ;;  %2067 = vmatmul.f32.gmra.mxu0 %v3988_v57 }
 0x394   : > { %v2274_v58 = vadd.f32 %v2198_v56, %v2096_v54  ;;  %2673 = vmatmul.f32.gmra.mxu3 %v5012_v55  ;;  %v3294_v54 = vld [vmem:[%s4388_s26 + $0x2e] sm:$0xff] }
 0x395   : > { %v2412_v59 = vpop.f32.mrf.mxu2  ;;  %v3999_v56 = vld [vmem:[%s4388_s26 + $0x2d] sm:$0xff] }
 0x396   : > { %v2488_v60 = vadd.f32 %v2412_v59, %v2274_v58  ;;  %2245 = vmatmul.f32.gmra.mxu1 %v5018_v61  ;;  %v4000_v58 = vld [vmem:[%s4388_s26 + $0x1b] sm:$0xff] }
 0x397   : > { %v2626_v62 = vpop.f32.mrf.mxu3 }
 0x398   : > { %v2702_v0 = vadd.f32 %v2626_v62, %v2488_v60  ;;  %v2023_v1 = vpop.f32.mrf.mxu0 }
 0x399   : > { %v2097_v2 = vadd.f32 %v4963_v34, %v2023_v1 }
 0x39a   : > { %3713 = vst [vmem:[%s4474_s23 + $0x2c0] sm:$0xff] %v2702_v0  ;;  %2462 = vmatmul.f32.gmra.mxu2 %v2327_v63  ;;  %v4001_v63 = vld [vmem:[%s4388_s26 + $0x1c] sm:$0xff] }
 0x39b   : > { %v2201_v4 = vpop.f32.mrf.mxu1  ;;  %2070 = vmatmul.f32.gmra.mxu0 %v3990_v5  ;;  %v3295_v5 = vld [vmem:[%s4388_s26 + $0x36] sm:$0xff] }
 0x39c   : > { %v2275_v6 = vadd.f32 %v2201_v4, %v2097_v2  ;;  %2676 = vmatmul.f32.gmra.mxu3 %v5024_v3 }
 0x39d   : > { %v2415_v7 = vpop.f32.mrf.mxu2 }
 0x39e   : > { %v2489_v8 = vadd.f32 %v2415_v7, %v2275_v6  ;;  %2248 = vmatmul.f32.gmra.mxu1 %v5030_v9  ;;  %v4002_v6 = vld [vmem:[%s4388_s26 + $0x35] sm:$0xff] }
 0x39f   : > { %v2629_v10 = vpop.f32.mrf.mxu3 }
 0x3a0   : > { %v2703_v12 = vadd.f32 %v2629_v10, %v2489_v8  ;;  %v2026_v13 = vpop.f32.mrf.mxu0  ;;  %v4003_v8 = vld [vmem:[%s4388_s26 + $0x23] sm:$0xff] }
 0x3a1   : > { %v2098_v36 = vadd.f32 %v4963_v34, %v2026_v13  ;;  %v4004_v13 = vld [vmem:[%s4388_s26 + $0x24] sm:$0xff] }
 0x3a2   : > { %3714 = vst [vmem:[%s4474_s23 + $0x2c8] sm:$0xff] %v2703_v12  ;;  %2465 = vmatmul.f32.gmra.mxu2 %v2328_v11 }
 0x3a3   : > { %v2204_v15 = vpop.f32.mrf.mxu1  ;;  %2073 = vmatmul.f32.gmra.mxu0 %v3992_v16 }
 0x3a4   : > { %v2276_v17 = vadd.f32 %v2204_v15, %v2098_v36  ;;  %2679 = vmatmul.f32.gmra.mxu3 %v5036_v14 }
 0x3a5   : > { %v2418_v19 = vpop.f32.mrf.mxu2 }
 0x3a6   : > { %v2490_v20 = vadd.f32 %v2418_v19, %v2276_v17  ;;  %2251 = vmatmul.f32.gmra.mxu1 %v5042_v21  ;;  %v3296_v19 = vld [vmem:[%s4388_s26 + $0x3e] sm:$0xff] }
 0x3a7   : > { %v2632_v22 = vpop.f32.mrf.mxu3 }
 0x3a8   : > { %v2704_v23 = vadd.f32 %v2632_v22, %v2490_v20  ;;  %v2029_v25 = vpop.f32.mrf.mxu0  ;;  %v4005_v20 = vld [vmem:[%s4388_s26 + $0x3d] sm:$0xff] }
 0x3a9   : > { %v2099_v26 = vadd.f32 %v4963_v34, %v2029_v25 }
 0x3aa   : > { %3715 = vst [vmem:[%s4474_s23 + $0x2d0] sm:$0xff] %v2704_v23  ;;  %2468 = vmatmul.f32.gmra.mxu2 %v2329_v18  ;;  %v4006_v18 = vld [vmem:[%s4388_s26 + $0x2b] sm:$0xff] }
 0x3ab   : > { %v2207_v28 = vpop.f32.mrf.mxu1  ;;  %2076 = vmatmul.f32.gmra.mxu0 %v3994_v29 }
 0x3ac   : > { %v2277_v24 = vadd.f32 %v2207_v28, %v2099_v26  ;;  %2682 = vmatmul.f32.gmra.mxu3 %v5048_v27  ;;  %v4007_v28 = vld [vmem:[%s4388_s26 + $0x2c] sm:$0xff] }
 0x3ad   : > { %v2421_v30 = vpop.f32.mrf.mxu2 }
 0x3ae   : > { %v2491_v31 = vadd.f32 %v2421_v30, %v2277_v24  ;;  %2254 = vmatmul.f32.gmra.mxu1 %v5054_v32 }
 0x3af   : > { %v2635_v33 = vpop.f32.mrf.mxu3 }
 0x3b0   : > { %v2705_v35 = vadd.f32 %v2635_v33, %v2491_v31  ;;  %v2032_v38 = vpop.f32.mrf.mxu0  ;;  %v3297_v33 = vld [vmem:[%s4388_s26 + $0x46] sm:$0xff] }
 0x3b1   : > { %v2100_v39 = vadd.f32 %v4963_v34, %v2032_v38 }
 0x3b2   : > { %3716 = vst [vmem:[%s4474_s23 + $0x2d8] sm:$0xff] %v2705_v35  ;;  %3148 = vmatmul.f32.vlgmr.msrb.gmra.mxu2 %v3996_v41  ;;  %v4008_v35 = vld [vmem:[%s4388_s26 + $0x45] sm:$0xff] }
 0x3b3   : > { %v2210_v42 = vpop.f32.mrf.mxu1  ;;  %2792 = vmatmul.f32.vlgmr.msrb.gmra.mxu0 %v3997_v44  ;;  %v4010_v44 = vld [vmem:[%s4388_s26 + $0x34] sm:$0xff] }
 0x3b4   : > { %v2278_v45 = vadd.f32 %v2210_v42, %v2100_v39  ;;  %3362 = vmatmul.f32.vlgmr.msrb.gmra.mxu3 %v3293_v40  ;;  %v4009_v39 = vld [vmem:[%s4388_s26 + $0x33] sm:$0xff] }
 0x3b5   : > { %v2424_v46 = vpop.f32.mrf.mxu2 }
 0x3b6   : > { %v2492_v47 = vadd.f32 %v2424_v46, %v2278_v45  ;;  %2970 = vmatmul.f32.vlgmr.msrb.gmra.mxu1 %v3998_v48 }
 0x3b7   : > { %v2638_v50 = vpop.f32.mrf.mxu3 }
 0x3b8   : > { %v2706_v51 = vadd.f32 %v2638_v50, %v2492_v47  ;;  %v2035_v52 = vpop.f32.mrf.mxu0  ;;  %v3298_v50 = vld [vmem:[%s4388_s26 + $0x4e] sm:$0xff] }
 0x3b9   : > { %v2101_v53 = vadd.f32 %v4963_v34, %v2035_v52 }
 0x3ba   : > { %3717 = vst [vmem:[%s4474_s23 + $0x2e0] sm:$0xff] %v2706_v51  ;;  %3151 = vmatmul.f32.gmra.mxu2 %v3999_v56  ;;  %v4011_v51 = vld [vmem:[%s4388_s26 + $0x4d] sm:$0xff] }
 0x3bb   : > { %v2213_v57 = vpop.f32.mrf.mxu1  ;;  %2795 = vmatmul.f32.gmra.mxu0 %v4000_v58  ;;  %v4013_v58 = vld [vmem:[%s4388_s26 + $0x3c] sm:$0xff] }
 0x3bc   : > { %v2279_v59 = vadd.f32 %v2213_v57, %v2101_v53  ;;  %3365 = vmatmul.f32.gmra.mxu3 %v3294_v54  ;;  %v4012_v53 = vld [vmem:[%s4388_s26 + $0x3b] sm:$0xff] }
 0x3bd   : > { %v2427_v60 = vpop.f32.mrf.mxu2 }
 0x3be   : > { %v2493_v62 = vadd.f32 %v2427_v60, %v2279_v59  ;;  %2973 = vmatmul.f32.gmra.mxu1 %v4001_v63 }
 0x3bf   : > { %v2641_v0 = vpop.f32.mrf.mxu3 }
 0x3c0   : > { %v2707_v1 = vadd.f32 %v2641_v0, %v2493_v62  ;;  %v2038_v2 = vpop.f32.mrf.mxu0  ;;  %v3299_v0 = vld [vmem:[%s4388_s26 + $0x56] sm:$0xff] }
 0x3c1   : > { %v2102_v4 = vadd.f32 %v4963_v34, %v2038_v2 }
 0x3c2   : > { %3718 = vst [vmem:[%s4474_s23 + $0x2e8] sm:$0xff] %v2707_v1  ;;  %3154 = vmatmul.f32.gmra.mxu2 %v4002_v6  ;;  %v4014_v1 = vld [vmem:[%s4388_s26 + $0x55] sm:$0xff] }
 0x3c3   : > { %v2216_v7 = vpop.f32.mrf.mxu1  ;;  %2798 = vmatmul.f32.gmra.mxu0 %v4003_v8  ;;  %v4016_v8 = vld [vmem:[%s4388_s26 + $0x44] sm:$0xff] }
 0x3c4   : > { %v2280_v10 = vadd.f32 %v2216_v7, %v2102_v4  ;;  %3368 = vmatmul.f32.gmra.mxu3 %v3295_v5  ;;  %v4015_v4 = vld [vmem:[%s4388_s26 + $0x43] sm:$0xff] }
 0x3c5   : > { %v2430_v11 = vpop.f32.mrf.mxu2 }
 0x3c6   : > { %v2494_v12 = vadd.f32 %v2430_v11, %v2280_v10  ;;  %2976 = vmatmul.f32.gmra.mxu1 %v4004_v13 }
 0x3c7   : > { %v2644_v36 = vpop.f32.mrf.mxu3 }
 0x3c8   : > { %v2708_v15 = vadd.f32 %v2644_v36, %v2494_v12  ;;  %v2041_v16 = vpop.f32.mrf.mxu0  ;;  %v3300_v36 = vld [vmem:[%s4388_s26 + $0x5e] sm:$0xff] }
 0x3c9   : > { %v2103_v17 = vadd.f32 %v4963_v34, %v2041_v16 }
 0x3ca   : > { %3719 = vst [vmem:[%s4474_s23 + $0x2f0] sm:$0xff] %v2708_v15  ;;  %3157 = vmatmul.f32.gmra.mxu2 %v4005_v20  ;;  %v4017_v15 = vld [vmem:[%s4388_s26 + $0x5d] sm:$0xff] }
 0x3cb   : > { %v2219_v22 = vpop.f32.mrf.mxu1  ;;  %2801 = vmatmul.f32.gmra.mxu0 %v4006_v18  ;;  %v4019_v18 = vld [vmem:[%s4388_s26 + $0x4c] sm:$0xff] }
 0x3cc   : > { %v2281_v23 = vadd.f32 %v2219_v22, %v2103_v17  ;;  %3371 = vmatmul.f32.gmra.mxu3 %v3296_v19  ;;  %v4018_v17 = vld [vmem:[%s4388_s26 + $0x4b] sm:$0xff] }
 0x3cd   : > { %v2433_v25 = vpop.f32.mrf.mxu2 }
 0x3ce   : > { %v2495_v26 = vadd.f32 %v2433_v25, %v2281_v23  ;;  %2979 = vmatmul.f32.gmra.mxu1 %v4007_v28 }
 0x3cf   : > { %v2647_v29 = vpop.f32.mrf.mxu3 }
 0x3d0   : > { %v2709_v24 = vadd.f32 %v2647_v29, %v2495_v26  ;;  %v2044_v30 = vpop.f32.mrf.mxu0  ;;  %v3301_v29 = vld [vmem:[%s4388_s26 + $0x66] sm:$0xff] }
 0x3d1   : > { %v2104_v31 = vadd.f32 %v4963_v34, %v2044_v30 }
 0x3d2   : > { %3720 = vst [vmem:[%s4474_s23 + $0x2f8] sm:$0xff] %v2709_v24  ;;  %3160 = vmatmul.f32.gmra.mxu2 %v4008_v35  ;;  %v4020_v24 = vld [vmem:[%s4388_s26 + $0x65] sm:$0xff] }
 0x3d3   : > { %v2222_v38 = vpop.f32.mrf.mxu1  ;;  %2804 = vmatmul.f32.gmra.mxu0 %v4009_v39  ;;  %v4022_v39 = vld [vmem:[%s4388_s26 + $0x54] sm:$0xff] }
 0x3d4   : > { %v2282_v40 = vadd.f32 %v2222_v38, %v2104_v31  ;;  %3374 = vmatmul.f32.gmra.mxu3 %v3297_v33  ;;  %v4021_v31 = vld [vmem:[%s4388_s26 + $0x53] sm:$0xff] }
 0x3d5   : > { %v2436_v41 = vpop.f32.mrf.mxu2 }
 0x3d6   : > { %v2496_v42 = vadd.f32 %v2436_v41, %v2282_v40  ;;  %2982 = vmatmul.f32.gmra.mxu1 %v4010_v44 }
 0x3d7   : > { %v2650_v45 = vpop.f32.mrf.mxu3 }
 0x3d8   : > { %v2710_v46 = vadd.f32 %v2650_v45, %v2496_v42  ;;  %v2047_v47 = vpop.f32.mrf.mxu0  ;;  %v3302_v45 = vld [vmem:[%s4388_s26 + $0x6e] sm:$0xff] }
 0x3d9   : > { %v2105_v48 = vadd.f32 %v4963_v34, %v2047_v47 }
 0x3da   : > { %3721 = vst [vmem:[%s4474_s23 + $0x300] sm:$0xff] %v2710_v46  ;;  %3163 = vmatmul.f32.gmra.mxu2 %v4011_v51  ;;  %v4023_v46 = vld [vmem:[%s4388_s26 + $0x6d] sm:$0xff] }
 0x3db   : > { %v2225_v52 = vpop.f32.mrf.mxu1  ;;  %2807 = vmatmul.f32.gmra.mxu0 %v4012_v53  ;;  %v4025_v53 = vld [vmem:[%s4388_s26 + $0x5c] sm:$0xff] }
 0x3dc   : > { %v2283_v54 = vadd.f32 %v2225_v52, %v2105_v48  ;;  %3377 = vmatmul.f32.gmra.mxu3 %v3298_v50  ;;  %v4024_v48 = vld [vmem:[%s4388_s26 + $0x5b] sm:$0xff] }
 0x3dd   : > { %v2439_v56 = vpop.f32.mrf.mxu2 }
 0x3de   : > { %v2497_v57 = vadd.f32 %v2439_v56, %v2283_v54  ;;  %2985 = vmatmul.f32.gmra.mxu1 %v4013_v58 }
 0x3df   : > { %v2653_v59 = vpop.f32.mrf.mxu3 }
 0x3e0   : > { %v2711_v60 = vadd.f32 %v2653_v59, %v2497_v57  ;;  %v2050_v62 = vpop.f32.mrf.mxu0  ;;  %v3303_v59 = vld [vmem:[%s4388_s26 + $0x76] sm:$0xff] }
 0x3e1   : > { %v2106_v63 = vadd.f32 %v4963_v34, %v2050_v62 }
 0x3e2   : > { %3722 = vst [vmem:[%s4474_s23 + $0x308] sm:$0xff] %v2711_v60  ;;  %3166 = vmatmul.f32.gmra.mxu2 %v4014_v1  ;;  %v4026_v60 = vld [vmem:[%s4388_s26 + $0x75] sm:$0xff] }
 0x3e3   : > { %v2228_v2 = vpop.f32.mrf.mxu1  ;;  %2810 = vmatmul.f32.gmra.mxu0 %v4015_v4  ;;  %v4028_v4 = vld [vmem:[%s4388_s26 + $0x64] sm:$0xff] }
 0x3e4   : > { %v2284_v5 = vadd.f32 %v2228_v2, %v2106_v63  ;;  %3380 = vmatmul.f32.gmra.mxu3 %v3299_v0  ;;  %v4027_v63 = vld [vmem:[%s4388_s26 + $0x63] sm:$0xff] }
 0x3e5   : > { %v2442_v6 = vpop.f32.mrf.mxu2 }
 0x3e6   : > { %v2498_v7 = vadd.f32 %v2442_v6, %v2284_v5  ;;  %2988 = vmatmul.f32.gmra.mxu1 %v4016_v8 }
 0x3e7   : > { %v2656_v10 = vpop.f32.mrf.mxu3 }
 0x3e8   : > { %v2712_v11 = vadd.f32 %v2656_v10, %v2498_v7  ;;  %v2053_v12 = vpop.f32.mrf.mxu0  ;;  %v3304_v10 = vld [vmem:[%s4388_s26 + $0x7e] sm:$0xff] }
 0x3e9   : > { %v2107_v13 = vadd.f32 %v4963_v34, %v2053_v12 }
 0x3ea   : > { %3723 = vst [vmem:[%s4474_s23 + $0x310] sm:$0xff] %v2712_v11  ;;  %3169 = vmatmul.f32.gmra.mxu2 %v4017_v15  ;;  %v4029_v11 = vld [vmem:[%s4388_s26 + $0x7d] sm:$0xff] }
 0x3eb   : > { %v2231_v16 = vpop.f32.mrf.mxu1  ;;  %2813 = vmatmul.f32.gmra.mxu0 %v4018_v17  ;;  %v4031_v17 = vld [vmem:[%s4388_s26 + $0x6c] sm:$0xff] }
 0x3ec   : > { %v2285_v19 = vadd.f32 %v2231_v16, %v2107_v13  ;;  %3383 = vmatmul.f32.gmra.mxu3 %v3300_v36  ;;  %v4030_v13 = vld [vmem:[%s4388_s26 + $0x6b] sm:$0xff] }
 0x3ed   : > { %v2445_v20 = vpop.f32.mrf.mxu2 }
 0x3ee   : > { %v2499_v22 = vadd.f32 %v2445_v20, %v2285_v19  ;;  %2991 = vmatmul.f32.gmra.mxu1 %v4019_v18 }
 0x3ef   : > { %v2659_v23 = vpop.f32.mrf.mxu3 }
 0x3f0   : > { %v2713_v25 = vadd.f32 %v2659_v23, %v2499_v22  ;;  %v2056_v26 = vpop.f32.mrf.mxu0  ;;  %v3305_v23 = vld [vmem:[%s4388_s26 + $0x86] sm:$0xff] }
 0x3f1   : > { %v2108_v28 = vadd.f32 %v4963_v34, %v2056_v26 }
 0x3f2   : > { %3724 = vst [vmem:[%s4474_s23 + $0x318] sm:$0xff] %v2713_v25  ;;  %3172 = vmatmul.f32.gmra.mxu2 %v4020_v24  ;;  %v4032_v25 = vld [vmem:[%s4388_s26 + $0x85] sm:$0xff] }
 0x3f3   : > { %v2234_v30 = vpop.f32.mrf.mxu1  ;;  %2816 = vmatmul.f32.gmra.mxu0 %v4021_v31  ;;  %v4034_v31 = vld [vmem:[%s4388_s26 + $0x74] sm:$0xff] }
 0x3f4   : > { %v2286_v33 = vadd.f32 %v2234_v30, %v2108_v28  ;;  %3386 = vmatmul.f32.gmra.mxu3 %v3301_v29  ;;  %v4033_v28 = vld [vmem:[%s4388_s26 + $0x73] sm:$0xff] }
 0x3f5   : > { %v2448_v35 = vpop.f32.mrf.mxu2 }
 0x3f6   : > { %v2500_v38 = vadd.f32 %v2448_v35, %v2286_v33  ;;  %2994 = vmatmul.f32.gmra.mxu1 %v4022_v39 }
 0x3f7   : > { %v2662_v40 = vpop.f32.mrf.mxu3 }
 0x3f8   : > { %v2714_v41 = vadd.f32 %v2662_v40, %v2500_v38  ;;  %v2059_v42 = vpop.f32.mrf.mxu0  ;;  %v3306_v40 = vld [vmem:[%s4388_s26 + $0x8e] sm:$0xff] }
 0x3f9   : > { %v2109_v44 = vadd.f32 %v4963_v34, %v2059_v42 }
 0x3fa   : > { %3725 = vst [vmem:[%s4474_s23 + $0x320] sm:$0xff] %v2714_v41  ;;  %3175 = vmatmul.f32.gmra.mxu2 %v4023_v46  ;;  %v4035_v41 = vld [vmem:[%s4388_s26 + $0x8d] sm:$0xff] }
 0x3fb   : > { %v2237_v47 = vpop.f32.mrf.mxu1  ;;  %2819 = vmatmul.f32.gmra.mxu0 %v4024_v48  ;;  %v4037_v48 = vld [vmem:[%s4388_s26 + $0x7c] sm:$0xff] }
 0x3fc   : > { %v2287_v50 = vadd.f32 %v2237_v47, %v2109_v44  ;;  %3389 = vmatmul.f32.gmra.mxu3 %v3302_v45  ;;  %v4036_v44 = vld [vmem:[%s4388_s26 + $0x7b] sm:$0xff] }
 0x3fd   : > { %v2451_v51 = vpop.f32.mrf.mxu2 }
 0x3fe   : > { %v2501_v52 = vadd.f32 %v2451_v51, %v2287_v50  ;;  %2997 = vmatmul.f32.gmra.mxu1 %v4025_v53 }
 0x3ff   : > { %v2665_v54 = vpop.f32.mrf.mxu3 }
 0x400   : > { %v2715_v56 = vadd.f32 %v2665_v54, %v2501_v52  ;;  %v2062_v57 = vpop.f32.mrf.mxu0  ;;  %v3307_v54 = vld [vmem:[%s4388_s26 + $0x96] sm:$0xff] }
 0x401   : > { %v2110_v58 = vadd.f32 %v4963_v34, %v2062_v57 }
 0x402   : > { %3726 = vst [vmem:[%s4474_s23 + $0x328] sm:$0xff] %v2715_v56  ;;  %3178 = vmatmul.f32.gmra.mxu2 %v4026_v60  ;;  %v4038_v56 = vld [vmem:[%s4388_s26 + $0x95] sm:$0xff] }
 0x403   : > { %v2240_v62 = vpop.f32.mrf.mxu1  ;;  %2822 = vmatmul.f32.gmra.mxu0 %v4027_v63  ;;  %v4040_v63 = vld [vmem:[%s4388_s26 + $0x84] sm:$0xff] }
 0x404   : > { %v2288_v0 = vadd.f32 %v2240_v62, %v2110_v58  ;;  %3392 = vmatmul.f32.gmra.mxu3 %v3303_v59  ;;  %v4039_v58 = vld [vmem:[%s4388_s26 + $0x83] sm:$0xff] }
 0x405   : > { %v2454_v1 = vpop.f32.mrf.mxu2 }
 0x406   : > { %v2502_v2 = vadd.f32 %v2454_v1, %v2288_v0  ;;  %3000 = vmatmul.f32.gmra.mxu1 %v4028_v4 }
 0x407   : > { %v2668_v5 = vpop.f32.mrf.mxu3 }
 0x408   : > { %v2716_v6 = vadd.f32 %v2668_v5, %v2502_v2  ;;  %v2065_v7 = vpop.f32.mrf.mxu0  ;;  %v3308_v5 = vld [vmem:[%s4388_s26 + $0x9e] sm:$0xff] }
 0x409   : > { %v2111_v8 = vadd.f32 %v4963_v34, %v2065_v7 }
 0x40a   : > { %3727 = vst [vmem:[%s4474_s23 + $0x330] sm:$0xff] %v2716_v6  ;;  %3181 = vmatmul.f32.gmra.mxu2 %v4029_v11  ;;  %v4041_v6 = vld [vmem:[%s4388_s26 + $0x9d] sm:$0xff] }
 0x40b   : > { %v2243_v12 = vpop.f32.mrf.mxu1  ;;  %2825 = vmatmul.f32.gmra.mxu0 %v4030_v13  ;;  %v4043_v13 = vld [vmem:[%s4388_s26 + $0x8c] sm:$0xff] }
 0x40c   : > { %v2289_v36 = vadd.f32 %v2243_v12, %v2111_v8  ;;  %3395 = vmatmul.f32.gmra.mxu3 %v3304_v10  ;;  %v4042_v8 = vld [vmem:[%s4388_s26 + $0x8b] sm:$0xff] }
 0x40d   : > { %v2457_v15 = vpop.f32.mrf.mxu2 }
 0x40e   : > { %v2503_v16 = vadd.f32 %v2457_v15, %v2289_v36  ;;  %3003 = vmatmul.f32.gmra.mxu1 %v4031_v17 }
 0x40f   : > { %v2671_v19 = vpop.f32.mrf.mxu3 }
 0x410   : > { %v2717_v20 = vadd.f32 %v2671_v19, %v2503_v16  ;;  %v2068_v22 = vpop.f32.mrf.mxu0  ;;  %v3309_v19 = vld [vmem:[%s4388_s26 + $0xa6] sm:$0xff] }
 0x411   : > { %v2112_v18 = vadd.f32 %v4963_v34, %v2068_v22 }
 0x412   : > { %3728 = vst [vmem:[%s4474_s23 + $0x338] sm:$0xff] %v2717_v20  ;;  %3184 = vmatmul.f32.gmra.mxu2 %v4032_v25  ;;  %v4044_v20 = vld [vmem:[%s4388_s26 + $0xa5] sm:$0xff] }
 0x413   : > { %v2246_v26 = vpop.f32.mrf.mxu1  ;;  %2828 = vmatmul.f32.gmra.mxu0 %v4033_v28  ;;  %v4046_v28 = vld [vmem:[%s4388_s26 + $0x94] sm:$0xff] }
 0x414   : > { %v2290_v29 = vadd.f32 %v2246_v26, %v2112_v18  ;;  %3398 = vmatmul.f32.gmra.mxu3 %v3305_v23  ;;  %v4045_v18 = vld [vmem:[%s4388_s26 + $0x93] sm:$0xff] }
 0x415   : > { %v2460_v24 = vpop.f32.mrf.mxu2 }
 0x416   : > { %v2504_v30 = vadd.f32 %v2460_v24, %v2290_v29  ;;  %3006 = vmatmul.f32.gmra.mxu1 %v4034_v31 }
 0x417   : > { %v2674_v33 = vpop.f32.mrf.mxu3 }
 0x418   : > { %v2718_v35 = vadd.f32 %v2674_v33, %v2504_v30  ;;  %v2071_v38 = vpop.f32.mrf.mxu0  ;;  %v3310_v33 = vld [vmem:[%s4388_s26 + $0xae] sm:$0xff] }
 0x419   : > { %v2113_v39 = vadd.f32 %v4963_v34, %v2071_v38 }
 0x41a   : > { %3729 = vst [vmem:[%s4474_s23 + $0x340] sm:$0xff] %v2718_v35  ;;  %3187 = vmatmul.f32.gmra.mxu2 %v4035_v41  ;;  %v4047_v35 = vld [vmem:[%s4388_s26 + $0xad] sm:$0xff] }
 0x41b   : > { %v2249_v42 = vpop.f32.mrf.mxu1  ;;  %2831 = vmatmul.f32.gmra.mxu0 %v4036_v44  ;;  %v4049_v44 = vld [vmem:[%s4388_s26 + $0x9c] sm:$0xff] }
 0x41c   : > { %v2291_v45 = vadd.f32 %v2249_v42, %v2113_v39  ;;  %3401 = vmatmul.f32.gmra.mxu3 %v3306_v40  ;;  %v4048_v39 = vld [vmem:[%s4388_s26 + $0x9b] sm:$0xff] }
 0x41d   : > { %v2463_v46 = vpop.f32.mrf.mxu2 }
 0x41e   : > { %v2505_v47 = vadd.f32 %v2463_v46, %v2291_v45  ;;  %3009 = vmatmul.f32.gmra.mxu1 %v4037_v48 }
 0x41f   : > { %v2677_v50 = vpop.f32.mrf.mxu3 }
 0x420   : > { %v2719_v51 = vadd.f32 %v2677_v50, %v2505_v47  ;;  %v2074_v52 = vpop.f32.mrf.mxu0  ;;  %v3311_v50 = vld [vmem:[%s4388_s26 + $0xb6] sm:$0xff] }
 0x421   : > { %v2114_v53 = vadd.f32 %v4963_v34, %v2074_v52 }
 0x422   : > { %3730 = vst [vmem:[%s4474_s23 + $0x348] sm:$0xff] %v2719_v51  ;;  %3190 = vmatmul.f32.gmra.mxu2 %v4038_v56  ;;  %v4050_v51 = vld [vmem:[%s4388_s26 + $0xb5] sm:$0xff] }
 0x423   : > { %v2252_v57 = vpop.f32.mrf.mxu1  ;;  %2834 = vmatmul.f32.gmra.mxu0 %v4039_v58  ;;  %v4052_v58 = vld [vmem:[%s4388_s26 + $0xa4] sm:$0xff] }
 0x424   : > { %v2292_v59 = vadd.f32 %v2252_v57, %v2114_v53  ;;  %3404 = vmatmul.f32.gmra.mxu3 %v3307_v54  ;;  %v4051_v53 = vld [vmem:[%s4388_s26 + $0xa3] sm:$0xff] }
 0x425   : > { %v2466_v60 = vpop.f32.mrf.mxu2 }
 0x426   : > { %v2506_v62 = vadd.f32 %v2466_v60, %v2292_v59  ;;  %3012 = vmatmul.f32.gmra.mxu1 %v4040_v63 }
 0x427   : > { %v2680_v0 = vpop.f32.mrf.mxu3 }
 0x428   : > { %v2720_v1 = vadd.f32 %v2680_v0, %v2506_v62  ;;  %v2077_v2 = vpop.f32.mrf.mxu0  ;;  %v3312_v0 = vld [vmem:[%s4388_s26 + $0xbe] sm:$0xff] }
 0x429   : > { %v2115_v4 = vadd.f32 %v4963_v34, %v2077_v2 }
 0x42a   : > { %3731 = vst [vmem:[%s4474_s23 + $0x350] sm:$0xff] %v2720_v1  ;;  %3193 = vmatmul.f32.gmra.mxu2 %v4041_v6  ;;  %v4053_v1 = vld [vmem:[%s4388_s26 + $0xbd] sm:$0xff] }
 0x42b   : > { %v2255_v7 = vpop.f32.mrf.mxu1  ;;  %2837 = vmatmul.f32.gmra.mxu0 %v4042_v8  ;;  %v4055_v8 = vld [vmem:[%s4388_s26 + $0xac] sm:$0xff] }
 0x42c   : > { %v2293_v10 = vadd.f32 %v2255_v7, %v2115_v4  ;;  %3407 = vmatmul.f32.gmra.mxu3 %v3308_v5  ;;  %v4054_v4 = vld [vmem:[%s4388_s26 + $0xab] sm:$0xff] }
 0x42d   : > { %v2469_v11 = vpop.f32.mrf.mxu2 }
 0x42e   : > { %v2507_v12 = vadd.f32 %v2469_v11, %v2293_v10  ;;  %3015 = vmatmul.f32.gmra.mxu1 %v4043_v13 }
 0x42f   : > { %v2683_v36 = vpop.f32.mrf.mxu3 }
 0x430   : > { %v2721_v15 = vadd.f32 %v2683_v36, %v2507_v12  ;;  %v2793_v16 = vpop.f32.mrf.mxu0  ;;  %v3313_v36 = vld [vmem:[%s4388_s26 + $0xc6] sm:$0xff] }
 0x431   : > { %v2901_v17 = vadd.f32 %v4963_v34, %v2793_v16 }
 0x432   : > { %3732 = vst [vmem:[%s4474_s23 + $0x358] sm:$0xff] %v2721_v15  ;;  %3196 = vmatmul.f32.gmra.mxu2 %v4044_v20  ;;  %v4056_v15 = vld [vmem:[%s4388_s26 + $0xc5] sm:$0xff] }
 0x433   : > { %v2971_v22 = vpop.f32.mrf.mxu1  ;;  %2840 = vmatmul.f32.gmra.mxu0 %v4045_v18  ;;  %v4058_v18 = vld [vmem:[%s4388_s26 + $0xb4] sm:$0xff] }
 0x434   : > { %v3079_v23 = vadd.f32 %v2971_v22, %v2901_v17  ;;  %3410 = vmatmul.f32.gmra.mxu3 %v3309_v19  ;;  %v4057_v17 = vld [vmem:[%s4388_s26 + $0xb3] sm:$0xff] }
 0x435   : > { %v3149_v25 = vpop.f32.mrf.mxu2 }
 0x436   : > { %v3257_v26 = vadd.f32 %v3149_v25, %v3079_v23  ;;  %3018 = vmatmul.f32.gmra.mxu1 %v4046_v28 }
 0x437   : > { %v3363_v29 = vpop.f32.mrf.mxu3 }
 0x438   : > { %v3471_v24 = vadd.f32 %v3363_v29, %v3257_v26  ;;  %v2796_v30 = vpop.f32.mrf.mxu0  ;;  %v3314_v29 = vld [vmem:[%s4388_s26 + $0xce] sm:$0xff] }
 0x439   : > { %v2902_v31 = vadd.f32 %v4963_v34, %v2796_v30 }
 0x43a   : > { %3733 = vst [vmem:[%s4474_s23 + $0x360] sm:$0xff] %v3471_v24  ;;  %3199 = vmatmul.f32.gmra.mxu2 %v4047_v35  ;;  %v4059_v24 = vld [vmem:[%s4388_s26 + $0xcd] sm:$0xff] }
 0x43b   : > { %v2974_v38 = vpop.f32.mrf.mxu1  ;;  %2843 = vmatmul.f32.gmra.mxu0 %v4048_v39  ;;  %v4061_v39 = vld [vmem:[%s4388_s26 + $0xbc] sm:$0xff] }
 0x43c   : > { %v3080_v40 = vadd.f32 %v2974_v38, %v2902_v31  ;;  %3413 = vmatmul.f32.gmra.mxu3 %v3310_v33  ;;  %v4060_v31 = vld [vmem:[%s4388_s26 + $0xbb] sm:$0xff] }
 0x43d   : > { %v3152_v41 = vpop.f32.mrf.mxu2 }
 0x43e   : > { %v3258_v42 = vadd.f32 %v3152_v41, %v3080_v40  ;;  %3021 = vmatmul.f32.gmra.mxu1 %v4049_v44 }
 0x43f   : > { %v3366_v45 = vpop.f32.mrf.mxu3 }
 0x440   : > { %v3472_v46 = vadd.f32 %v3366_v45, %v3258_v42  ;;  %v2799_v47 = vpop.f32.mrf.mxu0  ;;  %v3315_v45 = vld [vmem:[%s4388_s26 + $0xd6] sm:$0xff] }
 0x441   : > { %v2903_v48 = vadd.f32 %v4963_v34, %v2799_v47 }
 0x442   : > { %3734 = vst [vmem:[%s4474_s23 + $0x368] sm:$0xff] %v3472_v46  ;;  %3202 = vmatmul.f32.gmra.mxu2 %v4050_v51  ;;  %v4062_v46 = vld [vmem:[%s4388_s26 + $0xd5] sm:$0xff] }
 0x443   : > { %v2977_v52 = vpop.f32.mrf.mxu1  ;;  %2846 = vmatmul.f32.gmra.mxu0 %v4051_v53  ;;  %v4064_v53 = vld [vmem:[%s4388_s26 + $0xc4] sm:$0xff] }
 0x444   : > { %v3081_v54 = vadd.f32 %v2977_v52, %v2903_v48  ;;  %3416 = vmatmul.f32.gmra.mxu3 %v3311_v50  ;;  %v4063_v48 = vld [vmem:[%s4388_s26 + $0xc3] sm:$0xff] }
 0x445   : > { %v3155_v56 = vpop.f32.mrf.mxu2 }
 0x446   : > { %v3259_v57 = vadd.f32 %v3155_v56, %v3081_v54  ;;  %3024 = vmatmul.f32.gmra.mxu1 %v4052_v58 }
 0x447   : > { %v3369_v59 = vpop.f32.mrf.mxu3 }
 0x448   : > { %v3473_v60 = vadd.f32 %v3369_v59, %v3259_v57  ;;  %v2802_v62 = vpop.f32.mrf.mxu0  ;;  %v3316_v59 = vld [vmem:[%s4388_s26 + $0xde] sm:$0xff] }
 0x449   : > { %v2904_v63 = vadd.f32 %v4963_v34, %v2802_v62 }
 0x44a   : > { %3735 = vst [vmem:[%s4474_s23 + $0x370] sm:$0xff] %v3473_v60  ;;  %3205 = vmatmul.f32.gmra.mxu2 %v4053_v1  ;;  %v4065_v60 = vld [vmem:[%s4388_s26 + $0xdd] sm:$0xff] }
 0x44b   : > { %v2980_v2 = vpop.f32.mrf.mxu1  ;;  %2849 = vmatmul.f32.gmra.mxu0 %v4054_v4  ;;  %v4067_v4 = vld [vmem:[%s4388_s26 + $0xcc] sm:$0xff] }
 0x44c   : > { %v3082_v5 = vadd.f32 %v2980_v2, %v2904_v63  ;;  %3419 = vmatmul.f32.gmra.mxu3 %v3312_v0  ;;  %v4066_v63 = vld [vmem:[%s4388_s26 + $0xcb] sm:$0xff] }
 0x44d   : > { %v3158_v6 = vpop.f32.mrf.mxu2 }
 0x44e   : > { %v3260_v7 = vadd.f32 %v3158_v6, %v3082_v5  ;;  %3027 = vmatmul.f32.gmra.mxu1 %v4055_v8 }
 0x44f   : > { %v3372_v10 = vpop.f32.mrf.mxu3 }
 0x450   : > { %v3474_v11 = vadd.f32 %v3372_v10, %v3260_v7  ;;  %v2805_v12 = vpop.f32.mrf.mxu0  ;;  %v3317_v10 = vld [vmem:[%s4388_s26 + $0xe6] sm:$0xff] }
 0x451   : > { %v2905_v13 = vadd.f32 %v4963_v34, %v2805_v12 }
 0x452   : > { %3736 = vst [vmem:[%s4474_s23 + $0x378] sm:$0xff] %v3474_v11  ;;  %3208 = vmatmul.f32.gmra.mxu2 %v4056_v15  ;;  %v4068_v11 = vld [vmem:[%s4388_s26 + $0xe5] sm:$0xff] }
 0x453   : > { %v2983_v16 = vpop.f32.mrf.mxu1  ;;  %2852 = vmatmul.f32.gmra.mxu0 %v4057_v17  ;;  %v4070_v17 = vld [vmem:[%s4388_s26 + $0xd4] sm:$0xff] }
 0x454   : > { %v3083_v19 = vadd.f32 %v2983_v16, %v2905_v13  ;;  %3422 = vmatmul.f32.gmra.mxu3 %v3313_v36  ;;  %v4069_v13 = vld [vmem:[%s4388_s26 + $0xd3] sm:$0xff] }
 0x455   : > { %v3161_v20 = vpop.f32.mrf.mxu2 }
 0x456   : > { %v3261_v22 = vadd.f32 %v3161_v20, %v3083_v19  ;;  %3030 = vmatmul.f32.gmra.mxu1 %v4058_v18 }
 0x457   : > { %v3375_v23 = vpop.f32.mrf.mxu3 }
 0x458   : > { %v3475_v25 = vadd.f32 %v3375_v23, %v3261_v22  ;;  %v2808_v26 = vpop.f32.mrf.mxu0  ;;  %v5207_v22 = vld [vmem:[#allocation7] ss:$0 sm:$0xff] }
 0x459   : > { %v2906_v28 = vadd.f32 %v4963_v34, %v2808_v26  ;;  %v3318_v23 = vld [vmem:[%s4388_s26 + $0xee] sm:$0xff] }
 0x45a   : > { %3737 = vst [vmem:[%s4474_s23 + $0x380] sm:$0xff] %v3475_v25  ;;  %3211 = vmatmul.f32.gmra.mxu2 %v4059_v24  ;;  %v4072_v25 = vld [vmem:[%s4388_s26 + $0xed] sm:$0xff] }
 0x45b   : > { %v2986_v30 = vpop.f32.mrf.mxu1  ;;  %2855 = vmatmul.f32.gmra.mxu0 %v4060_v31  ;;  %v4074_v31 = vld [vmem:[%s4388_s26 + $0xdc] sm:$0xff] }
 0x45c   : > { %v3084_v33 = vadd.f32 %v2986_v30, %v2906_v28  ;;  %3425 = vmatmul.f32.gmra.mxu3 %v3314_v29  ;;  %v4073_v28 = vld [vmem:[%s4388_s26 + $0xdb] sm:$0xff] }
 0x45d   : > { %v3164_v35 = vpop.f32.mrf.mxu2 }
 0x45e   : > { %v3262_v38 = vadd.f32 %v3164_v35, %v3084_v33  ;;  %3033 = vmatmul.f32.gmra.mxu1 %v4061_v39 }
 0x45f   : > { %v3378_v40 = vpop.f32.mrf.mxu3 }
 0x460   : > { %v3476_v41 = vadd.f32 %v3378_v40, %v3262_v38  ;;  %v2811_v42 = vpop.f32.mrf.mxu0  ;;  %v3319_v40 = vld [vmem:[%s4388_s26 + $0xf6] sm:$0xff] }
 0x461   : > { %v2907_v44 = vadd.f32 %v4963_v34, %v2811_v42 }
 0x462   : > { %3738 = vst [vmem:[%s4474_s23 + $0x388] sm:$0xff] %v3476_v41  ;;  %3214 = vmatmul.f32.gmra.mxu2 %v4062_v46  ;;  %v4075_v41 = vld [vmem:[%s4388_s26 + $0xf5] sm:$0xff] }
 0x463   : > { %v2989_v47 = vpop.f32.mrf.mxu1  ;;  %2858 = vmatmul.f32.gmra.mxu0 %v4063_v48  ;;  %v4077_v48 = vld [vmem:[%s4388_s26 + $0xe4] sm:$0xff] }
 0x464   : > { %v3085_v50 = vadd.f32 %v2989_v47, %v2907_v44  ;;  %3428 = vmatmul.f32.gmra.mxu3 %v3315_v45  ;;  %v4076_v44 = vld [vmem:[%s4388_s26 + $0xe3] sm:$0xff] }
 0x465   : > { %v3167_v51 = vpop.f32.mrf.mxu2 }
 0x466   : > { %v3263_v52 = vadd.f32 %v3167_v51, %v3085_v50  ;;  %3036 = vmatmul.f32.gmra.mxu1 %v4064_v53 }
 0x467   : > { %v3381_v54 = vpop.f32.mrf.mxu3 }
 0x468   : > { %v3477_v56 = vadd.f32 %v3381_v54, %v3263_v52  ;;  %v2814_v57 = vpop.f32.mrf.mxu0  ;;  %v3320_v54 = vld [vmem:[%s4388_s26 + $0xfe] sm:$0xff] }
 0x469   : > { %v2908_v58 = vadd.f32 %v4963_v34, %v2814_v57 }
 0x46a   : > { %3739 = vst [vmem:[%s4474_s23 + $0x390] sm:$0xff] %v3477_v56  ;;  %3217 = vmatmul.f32.gmra.mxu2 %v4065_v60  ;;  %v4078_v56 = vld [vmem:[%s4388_s26 + $0xfd] sm:$0xff] }
 0x46b   : > { %v2992_v62 = vpop.f32.mrf.mxu1  ;;  %2861 = vmatmul.f32.gmra.mxu0 %v4066_v63  ;;  %v4080_v63 = vld [vmem:[%s4388_s26 + $0xec] sm:$0xff] }
 0x46c   : > { %v3086_v0 = vadd.f32 %v2992_v62, %v2908_v58  ;;  %3431 = vmatmul.f32.gmra.mxu3 %v3316_v59  ;;  %v4079_v58 = vld [vmem:[%s4388_s26 + $0xeb] sm:$0xff] }
 0x46d   : > { %v3170_v1 = vpop.f32.mrf.mxu2 }
 0x46e   : > { %v3264_v2 = vadd.f32 %v3170_v1, %v3086_v0  ;;  %3039 = vmatmul.f32.gmra.mxu1 %v4067_v4 }
 0x46f   : > { %v3384_v5 = vpop.f32.mrf.mxu3 }
 0x470   : > { %v3478_v6 = vadd.f32 %v3384_v5, %v3264_v2  ;;  %v2817_v7 = vpop.f32.mrf.mxu0  ;;  %v3321_v5 = vld [vmem:[%s4388_s26 + $0x106] sm:$0xff] }
 0x471   : > { %v2909_v8 = vadd.f32 %v4963_v34, %v2817_v7 }
 0x472   : > { %3740 = vst [vmem:[%s4474_s23 + $0x398] sm:$0xff] %v3478_v6  ;;  %3220 = vmatmul.f32.gmra.mxu2 %v4068_v11  ;;  %v4081_v6 = vld [vmem:[%s4388_s26 + $0x105] sm:$0xff] }
 0x473   : > { %v2995_v12 = vpop.f32.mrf.mxu1  ;;  %2864 = vmatmul.f32.gmra.mxu0 %v4069_v13  ;;  %v4083_v13 = vld [vmem:[%s4388_s26 + $0xf4] sm:$0xff] }
 0x474   : > { %v3087_v36 = vadd.f32 %v2995_v12, %v2909_v8  ;;  %3434 = vmatmul.f32.gmra.mxu3 %v3317_v10  ;;  %v4082_v8 = vld [vmem:[%s4388_s26 + $0xf3] sm:$0xff] }
 0x475   : > { %v3173_v15 = vpop.f32.mrf.mxu2 }
 0x476   : > { %v3265_v16 = vadd.f32 %v3173_v15, %v3087_v36  ;;  %3042 = vmatmul.f32.gmra.mxu1 %v4070_v17 }
 0x477   : > { %v3387_v19 = vpop.f32.mrf.mxu3 }
 0x478   : > { %v3479_v34 = vadd.f32 %v3387_v19, %v3265_v16  ;;  %v2820_v20 = vpop.f32.mrf.mxu0  ;;  %v3322_v19 = vld [vmem:[%s4388_s26 + $0x10e] sm:$0xff] }
 0x479   : > { %v2910_v18 = vadd.f32 %v5207_v22, %v2820_v20 }
 0x47a   : > { %3741 = vst [vmem:[%s4474_s23 + $0x3a0] sm:$0xff] %v3479_v34  ;;  %3223 = vmatmul.f32.gmra.mxu2 %v4072_v25  ;;  %v4084_v34 = vld [vmem:[%s4388_s26 + $0x10d] sm:$0xff] }
 0x47b   : > { %v2998_v26 = vpop.f32.mrf.mxu1  ;;  %2867 = vmatmul.f32.gmra.mxu0 %v4073_v28  ;;  %v4086_v28 = vld [vmem:[%s4388_s26 + $0xfc] sm:$0xff] }
 0x47c   : > { %v3088_v29 = vadd.f32 %v2998_v26, %v2910_v18  ;;  %3437 = vmatmul.f32.gmra.mxu3 %v3318_v23  ;;  %v4085_v18 = vld [vmem:[%s4388_s26 + $0xfb] sm:$0xff] }
 0x47d   : > { %v3176_v24 = vpop.f32.mrf.mxu2 }
 0x47e   : > { %v3266_v30 = vadd.f32 %v3176_v24, %v3088_v29  ;;  %3045 = vmatmul.f32.gmra.mxu1 %v4074_v31 }
 0x47f   : > { %v3390_v33 = vpop.f32.mrf.mxu3 }
 0x480   : > { %v3480_v35 = vadd.f32 %v3390_v33, %v3266_v30  ;;  %v2823_v38 = vpop.f32.mrf.mxu0  ;;  %v3323_v33 = vld [vmem:[%s4388_s26 + $0x116] sm:$0xff] }
 0x481   : > { %v2911_v39 = vadd.f32 %v5207_v22, %v2823_v38 }
 0x482   : > { %3742 = vst [vmem:[%s4474_s23 + $0x3a8] sm:$0xff] %v3480_v35  ;;  %3226 = vmatmul.f32.gmra.mxu2 %v4075_v41  ;;  %v4087_v35 = vld [vmem:[%s4388_s26 + $0x115] sm:$0xff] }
 0x483   : > { %v3001_v42 = vpop.f32.mrf.mxu1  ;;  %2870 = vmatmul.f32.gmra.mxu0 %v4076_v44 }
 0x484   : > { %v3089_v45 = vadd.f32 %v3001_v42, %v2911_v39  ;;  %3440 = vmatmul.f32.gmra.mxu3 %v3319_v40  ;;  %v4088_v42 = vld [vmem:[%s4388_s26 + $0x104] sm:$0xff] }
 0x485   : > { %v3179_v46 = vpop.f32.mrf.mxu2 }
 0x486   : > { %v3267_v47 = vadd.f32 %v3179_v46, %v3089_v45  ;;  %3048 = vmatmul.f32.gmra.mxu1 %v4077_v48  ;;  %v3324_v48 = vld [vmem:[%s4388_s26 + $0x11e] sm:$0xff] }
 0x487   : > { %v3393_v50 = vpop.f32.mrf.mxu3 }
 0x488   : > { %v3481_v51 = vadd.f32 %v3393_v50, %v3267_v47  ;;  %v2826_v52 = vpop.f32.mrf.mxu0 }
 0x489   : > { %v2912_v53 = vadd.f32 %v5207_v22, %v2826_v52 }
 0x48a   : > { %3743 = vst [vmem:[%s4474_s23 + $0x3b0] sm:$0xff] %v3481_v51  ;;  %3229 = vmatmul.f32.gmra.mxu2 %v4078_v56 }
 0x48b   : > { %v3004_v57 = vpop.f32.mrf.mxu1  ;;  %2873 = vmatmul.f32.gmra.mxu0 %v4079_v58 }
 0x48c   : > { %v3090_v59 = vadd.f32 %v3004_v57, %v2912_v53  ;;  %3443 = vmatmul.f32.gmra.mxu3 %v3320_v54  ;;  %v4089_v53 = vld [vmem:[%s4388_s26 + $0x10c] sm:$0xff] }
 0x48d   : > { %v3182_v60 = vpop.f32.mrf.mxu2 }
 0x48e   : > { %v3268_v62 = vadd.f32 %v3182_v60, %v3090_v59  ;;  %3051 = vmatmul.f32.gmra.mxu1 %v4080_v63  ;;  %v3325_v59 = vld [vmem:[%s4388_s26 + $0x126] sm:$0xff]  ;;  %v4090_v63 = vld [vmem:[%s4388_s26 + $0x114] sm:$0xff] }
 0x48f   : > { %v3396_v0 = vpop.f32.mrf.mxu3 }
 0x490   : > { %v3482_v1 = vadd.f32 %v3396_v0, %v3268_v62  ;;  %v2829_v2 = vpop.f32.mrf.mxu0 }
 0x491   : > { %v2913_v4 = vadd.f32 %v5207_v22, %v2829_v2 }
 0x492   : > { %3744 = vst [vmem:[%s4474_s23 + $0x3b8] sm:$0xff] %v3482_v1  ;;  %3232 = vmatmul.f32.gmra.mxu2 %v4081_v6 }
 0x493   : > { %v3007_v7 = vpop.f32.mrf.mxu1  ;;  %2876 = vmatmul.f32.gmra.mxu0 %v4082_v8  ;;  %v4091_v8 = vld [vmem:[%s4388_s26 + $0x11c] sm:$0xff] }
 0x494   : > { %v3091_v10 = vadd.f32 %v3007_v7, %v2913_v4  ;;  %3446 = vmatmul.f32.gmra.mxu3 %v3321_v5  ;;  %v3326_v5 = vld [vmem:[%s4388_s26 + $0x12e] sm:$0xff] }
 0x495   : > { %v3185_v11 = vpop.f32.mrf.mxu2 }
 0x496   : > { %v3269_v12 = vadd.f32 %v3185_v11, %v3091_v10  ;;  %3054 = vmatmul.f32.gmra.mxu1 %v4083_v13 }
 0x497   : > { %v3399_v36 = vpop.f32.mrf.mxu3 }
 0x498   : > { %v3483_v15 = vadd.f32 %v3399_v36, %v3269_v12  ;;  %v2832_v16 = vpop.f32.mrf.mxu0  ;;  %v3327_v36 = vld [vmem:[%s4388_s26 + $0x136] sm:$0xff] }
 0x499   : > { %v2914_v17 = vadd.f32 %v5207_v22, %v2832_v16 }
 0x49a   : > { %3745 = vst [vmem:[%s4474_s23 + $0x3c0] sm:$0xff] %v3483_v15  ;;  %3235 = vmatmul.f32.gmra.mxu2 %v4084_v34 }
 0x49b   : > { %v3010_v20 = vpop.f32.mrf.mxu1  ;;  %2879 = vmatmul.f32.gmra.mxu0 %v4085_v18 }
 0x49c   : > { %v3092_v23 = vadd.f32 %v3010_v20, %v2914_v17  ;;  %3449 = vmatmul.f32.gmra.mxu3 %v3322_v19  ;;  %v4092_v17 = vld [vmem:[%s4388_s26 + $0x124] sm:$0xff] }
 0x49d   : > { %v3188_v25 = vpop.f32.mrf.mxu2 }
 0x49e   : > { %v3270_v26 = vadd.f32 %v3188_v25, %v3092_v23  ;;  %3057 = vmatmul.f32.gmra.mxu1 %v4086_v28  ;;  %v3328_v23 = vld [vmem:[%s4388_s26 + $0x13e] sm:$0xff]  ;;  %v4093_v28 = vld [vmem:[%s4388_s26 + $0x12c] sm:$0xff] }
 0x49f   : > { %v3402_v29 = vpop.f32.mrf.mxu3 }
 0x4a0   : > { %v3484_v24 = vadd.f32 %v3402_v29, %v3270_v26  ;;  %v2835_v30 = vpop.f32.mrf.mxu0 }
 0x4a1   : > { %v2915_v31 = vadd.f32 %v5207_v22, %v2835_v30 }
 0x4a2   : > { %3746 = vst [vmem:[%s4474_s23 + $0x3c8] sm:$0xff] %v3484_v24  ;;  %3238 = vmatmul.f32.gmra.mxu2 %v4087_v35 }
 0x4a3   : > { %v3013_v38 = vpop.f32.mrf.mxu1  ;;  %2882 = vmatmul.f32.gmra.mxu0 %v4994_v37 }
 0x4a4   : > { %v3093_v39 = vadd.f32 %v3013_v38, %v2915_v31  ;;  %3452 = vmatmul.f32.gmra.mxu3 %v3323_v33 }
 0x4a5   : > { %v3191_v40 = vpop.f32.mrf.mxu2 }
 0x4a6   : > { %v3271_v41 = vadd.f32 %v3191_v40, %v3093_v39  ;;  %3060 = vmatmul.f32.gmra.mxu1 %v4088_v42 }
 0x4a7   : > { %v3405_v44 = vpop.f32.mrf.mxu3 }
 0x4a8   : > { %v3485_v45 = vadd.f32 %v3405_v44, %v3271_v41  ;;  %v2838_v46 = vpop.f32.mrf.mxu0 }
 0x4a9   : > { %v2916_v47 = vadd.f32 %v5207_v22, %v2838_v46 }
 0x4aa   : > { %3747 = vst [vmem:[%s4474_s23 + $0x3d0] sm:$0xff] %v3485_v45  ;;  %3241 = vmatmul.f32.gmra.mxu2 %v5000_v43 }
 0x4ab   : > { %v3016_v50 = vpop.f32.mrf.mxu1  ;;  %2885 = vmatmul.f32.gmra.mxu0 %v5006_v49 }
 0x4ac   : > { %v3094_v37 = vadd.f32 %v3016_v50, %v2916_v47  ;;  %3455 = vmatmul.f32.gmra.mxu3 %v3324_v48 }
 0x4ad   : > { %v3194_v51 = vpop.f32.mrf.mxu2 }
 0x4ae   : > { %v3272_v52 = vadd.f32 %v3194_v51, %v3094_v37  ;;  %3063 = vmatmul.f32.gmra.mxu1 %v4089_v53 }
 0x4af   : > { %v3408_v54 = vpop.f32.mrf.mxu3 }
 0x4b0   : > { %v3486_v56 = vadd.f32 %v3408_v54, %v3272_v52  ;;  %v2841_v57 = vpop.f32.mrf.mxu0 }
 0x4b1   : > { %v2917_v58 = vadd.f32 %v5207_v22, %v2841_v57 }
 0x4b2   : > { %3748 = vst [vmem:[%s4474_s23 + $0x3d8] sm:$0xff] %v3486_v56  ;;  %3244 = vmatmul.f32.gmra.mxu2 %v5012_v55 }
 0x4b3   : > { %v3019_v43 = vpop.f32.mrf.mxu1  ;;  %2888 = vmatmul.f32.gmra.mxu0 %v5018_v61 }
 0x4b4   : > { %v3095_v49 = vadd.f32 %v3019_v43, %v2917_v58  ;;  %3458 = vmatmul.f32.gmra.mxu3 %v3325_v59 }
 0x4b5   : > { %v3197_v60 = vpop.f32.mrf.mxu2 }
 0x4b6   : > { %v3273_v62 = vadd.f32 %v3197_v60, %v3095_v49  ;;  %3066 = vmatmul.f32.gmra.mxu1 %v4090_v63 }
 0x4b7   : > { %v3411_v0 = vpop.f32.mrf.mxu3 }
 0x4b8   : > { %v3487_v1 = vadd.f32 %v3411_v0, %v3273_v62  ;;  %v2844_v2 = vpop.f32.mrf.mxu0 }
 0x4b9   : > { %v2918_v4 = vadd.f32 %v5207_v22, %v2844_v2 }
 0x4ba   : > { %3749 = vst [vmem:[%s4474_s23 + $0x3e0] sm:$0xff] %v3487_v1  ;;  %3247 = vmatmul.f32.gmra.mxu2 %v5024_v3 }
 0x4bb   : > { %v3022_v55 = vpop.f32.mrf.mxu1  ;;  %2891 = vmatmul.f32.gmra.mxu0 %v5030_v9 }
 0x4bc   : > { %v3096_v61 = vadd.f32 %v3022_v55, %v2918_v4  ;;  %3461 = vmatmul.f32.gmra.mxu3 %v3326_v5 }
 0x4bd   : > { %v3200_v6 = vpop.f32.mrf.mxu2 }
 0x4be   : > { %v3274_v7 = vadd.f32 %v3200_v6, %v3096_v61  ;;  %3069 = vmatmul.f32.gmra.mxu1 %v4091_v8 }
 0x4bf   : > { %v3414_v10 = vpop.f32.mrf.mxu3 }
 0x4c0   : > { %v3488_v11 = vadd.f32 %v3414_v10, %v3274_v7  ;;  %v2847_v12 = vpop.f32.mrf.mxu0 }
 0x4c1   : > { %v2919_v13 = vadd.f32 %v5207_v22, %v2847_v12 }
 0x4c2   : > { %3750 = vst [vmem:[%s4474_s23 + $0x3e8] sm:$0xff] %v3488_v11  ;;  %3250 = vmatmul.f32.gmra.mxu2 %v5036_v14 }
 0x4c3   : > { %v3025_v3 = vpop.f32.mrf.mxu1  ;;  %2894 = vmatmul.f32.gmra.mxu0 %v5042_v21 }
 0x4c4   : > { %v3097_v9 = vadd.f32 %v3025_v3, %v2919_v13  ;;  %3464 = vmatmul.f32.gmra.mxu3 %v3327_v36 }
 0x4c5   : > { %v3203_v15 = vpop.f32.mrf.mxu2 }
 0x4c6   : > { %v3275_v16 = vadd.f32 %v3203_v15, %v3097_v9  ;;  %3072 = vmatmul.f32.gmra.mxu1 %v4092_v17 }
 0x4c7   : > { %v3417_v19 = vpop.f32.mrf.mxu3 }
 0x4c8   : > { %v3489_v34 = vadd.f32 %v3417_v19, %v3275_v16  ;;  %v2850_v20 = vpop.f32.mrf.mxu0 }
 0x4c9   : > { %v2920_v18 = vadd.f32 %v5207_v22, %v2850_v20 }
 0x4ca   : > { %3751 = vst [vmem:[%s4474_s23 + $0x3f0] sm:$0xff] %v3489_v34  ;;  %3253 = vmatmul.f32.gmra.mxu2 %v5048_v27 }
 0x4cb   : > { %v3028_v14 = vpop.f32.mrf.mxu1  ;;  %2897 = vmatmul.f32.gmra.mxu0 %v5054_v32 }
 0x4cc   : > { %v3098_v21 = vadd.f32 %v3028_v14, %v2920_v18  ;;  %3467 = vmatmul.f32.gmra.mxu3 %v3328_v23 }
 0x4cd   : > { %v3206_v25 = vpop.f32.mrf.mxu2 }
 0x4ce   : > { %v3276_v26 = vadd.f32 %v3206_v25, %v3098_v21  ;;  %3075 = vmatmul.f32.gmra.mxu1 %v4093_v28 }
 0x4cf   : > { %v3420_v29 = vpop.f32.mrf.mxu3 }
 0x4d0   : > { %v3490_v24 = vadd.f32 %v3420_v29, %v3276_v26  ;;  %v2853_v30 = vpop.f32.mrf.mxu0 }
 0x4d1   : > { %v2921_v31 = vadd.f32 %v5207_v22, %v2853_v30 }
 0x4d2   : > { %3752 = vst [vmem:[%s4474_s23 + $0x3f8] sm:$0xff] %v3490_v24 }
 0x4d3   : > { %v3031_v33 = vpop.f32.mrf.mxu1 }
 0x4d4   : > { %v3099_v35 = vadd.f32 %v3031_v33, %v2921_v31 }
 0x4d5   : > { %v3209_v27 = vpop.f32.mrf.mxu2 }
 0x4d6   : > { %v3277_v38 = vadd.f32 %v3209_v27, %v3099_v35 }
 0x4d7   : > { %v3423_v39 = vpop.f32.mrf.mxu3 }
 0x4d8   : > { %v3491_v32 = vadd.f32 %v3423_v39, %v3277_v38  ;;  %v2856_v40 = vpop.f32.mrf.mxu0 }
 0x4d9   : > { %v2922_v41 = vadd.f32 %v5207_v22, %v2856_v40 }
 0x4da   : > { %3753 = vst [vmem:[%s4474_s23 + $0x400] sm:$0xff] %v3491_v32 }
 0x4db   : > { %v3034_v42 = vpop.f32.mrf.mxu1 }
 0x4dc   : > { %v3100_v44 = vadd.f32 %v3034_v42, %v2922_v41 }
 0x4dd   : > { %v3212_v45 = vpop.f32.mrf.mxu2 }
 0x4de   : > { %v3278_v46 = vadd.f32 %v3212_v45, %v3100_v44 }
 0x4df   : > { %v3426_v47 = vpop.f32.mrf.mxu3 }
 0x4e0   : > { %v3492_v48 = vadd.f32 %v3426_v47, %v3278_v46  ;;  %v2859_v50 = vpop.f32.mrf.mxu0 }
 0x4e1   : > { %v2923_v37 = vadd.f32 %v5207_v22, %v2859_v50 }
 0x4e2   : > { %3754 = vst [vmem:[%s4474_s23 + $0x408] sm:$0xff] %v3492_v48 }
 0x4e3   : > { %v3037_v51 = vpop.f32.mrf.mxu1 }
 0x4e4   : > { %v3101_v52 = vadd.f32 %v3037_v51, %v2923_v37 }
 0x4e5   : > { %v3215_v53 = vpop.f32.mrf.mxu2 }
 0x4e6   : > { %v3279_v54 = vadd.f32 %v3215_v53, %v3101_v52 }
 0x4e7   : > { %v3429_v56 = vpop.f32.mrf.mxu3 }
 0x4e8   : > { %v3493_v57 = vadd.f32 %v3429_v56, %v3279_v54  ;;  %v2862_v58 = vpop.f32.mrf.mxu0 }
 0x4e9   : > { %v2924_v59 = vadd.f32 %v5207_v22, %v2862_v58 }
 0x4ea   : > { %3755 = vst [vmem:[%s4474_s23 + $0x410] sm:$0xff] %v3493_v57 }
 0x4eb   : > { %v3040_v43 = vpop.f32.mrf.mxu1 }
 0x4ec   : > { %v3102_v49 = vadd.f32 %v3040_v43, %v2924_v59 }
 0x4ed   : > { %v3218_v60 = vpop.f32.mrf.mxu2 }
 0x4ee   : > { %v3280_v62 = vadd.f32 %v3218_v60, %v3102_v49 }
 0x4ef   : > { %v3432_v63 = vpop.f32.mrf.mxu3 }
 0x4f0   : > { %v3494_v0 = vadd.f32 %v3432_v63, %v3280_v62  ;;  %v2865_v1 = vpop.f32.mrf.mxu0 }
 0x4f1   : > { %v2925_v2 = vadd.f32 %v5207_v22, %v2865_v1 }
 0x4f2   : > { %3756 = vst [vmem:[%s4474_s23 + $0x418] sm:$0xff] %v3494_v0 }
 0x4f3   : > { %v3043_v4 = vpop.f32.mrf.mxu1 }
 0x4f4   : > { %v3103_v5 = vadd.f32 %v3043_v4, %v2925_v2 }
 0x4f5   : > { %v3221_v55 = vpop.f32.mrf.mxu2 }
 0x4f6   : > { %v3281_v61 = vadd.f32 %v3221_v55, %v3103_v5 }
 0x4f7   : > { %v3435_v6 = vpop.f32.mrf.mxu3 }
 0x4f8   : > { %v3495_v7 = vadd.f32 %v3435_v6, %v3281_v61  ;;  %v2868_v8 = vpop.f32.mrf.mxu0 }
 0x4f9   : > { %v2926_v10 = vadd.f32 %v5207_v22, %v2868_v8 }
 0x4fa   : > { %3757 = vst [vmem:[%s4474_s23 + $0x420] sm:$0xff] %v3495_v7 }
 0x4fb   : > { %v3046_v11 = vpop.f32.mrf.mxu1 }
 0x4fc   : > { %v3104_v12 = vadd.f32 %v3046_v11, %v2926_v10 }
 0x4fd   : > { %v3224_v13 = vpop.f32.mrf.mxu2 }
 0x4fe   : > { %v3282_v36 = vadd.f32 %v3224_v13, %v3104_v12 }
 0x4ff   : > { %v3438_v3 = vpop.f32.mrf.mxu3 }
 0x500   : > { %v3496_v9 = vadd.f32 %v3438_v3, %v3282_v36  ;;  %v2871_v15 = vpop.f32.mrf.mxu0 }
 0x501   : > { %v2927_v16 = vadd.f32 %v5207_v22, %v2871_v15 }
 0x502   : > { %3758 = vst [vmem:[%s4474_s23 + $0x428] sm:$0xff] %v3496_v9 }
 0x503   : > { %v3049_v17 = vpop.f32.mrf.mxu1 }
 0x504   : > { %v3105_v19 = vadd.f32 %v3049_v17, %v2927_v16 }
 0x505   : > { %v3227_v34 = vpop.f32.mrf.mxu2 }
 0x506   : > { %v3283_v20 = vadd.f32 %v3227_v34, %v3105_v19 }
 0x507   : > { %v3441_v18 = vpop.f32.mrf.mxu3 }
 0x508   : > { %v3497_v23 = vadd.f32 %v3441_v18, %v3283_v20  ;;  %v2874_v14 = vpop.f32.mrf.mxu0 }
 0x509   : > { %v2928_v21 = vadd.f32 %v5207_v22, %v2874_v14 }
 0x50a   : > { %3759 = vst [vmem:[%s4474_s23 + $0x430] sm:$0xff] %v3497_v23 }
 0x50b   : > { %v3052_v25 = vpop.f32.mrf.mxu1 }
 0x50c   : > { %v3106_v26 = vadd.f32 %v3052_v25, %v2928_v21 }
 0x50d   : > { %v3230_v28 = vpop.f32.mrf.mxu2 }
 0x50e   : > { %v3284_v29 = vadd.f32 %v3230_v28, %v3106_v26 }
 0x50f   : > { %v3444_v24 = vpop.f32.mrf.mxu3 }
 0x510   : > { %v3498_v30 = vadd.f32 %v3444_v24, %v3284_v29  ;;  %v2877_v31 = vpop.f32.mrf.mxu0 }
 0x511   : > { %v2929_v33 = vadd.f32 %v5207_v22, %v2877_v31 }
 0x512   : > { %3760 = vst [vmem:[%s4474_s23 + $0x438] sm:$0xff] %v3498_v30 }
 0x513   : > { %v3055_v35 = vpop.f32.mrf.mxu1 }
 0x514   : > { %v3107_v27 = vadd.f32 %v3055_v35, %v2929_v33 }
 0x515   : > { %v3233_v38 = vpop.f32.mrf.mxu2 }
 0x516   : > { %v3285_v39 = vadd.f32 %v3233_v38, %v3107_v27 }
 0x517   : > { %v3447_v32 = vpop.f32.mrf.mxu3 }
 0x518   : > { %v3499_v40 = vadd.f32 %v3447_v32, %v3285_v39  ;;  %v2880_v41 = vpop.f32.mrf.mxu0 }
 0x519   : > { %v2930_v42 = vadd.f32 %v5207_v22, %v2880_v41 }
 0x51a   : > { %3761 = vst [vmem:[%s4474_s23 + $0x440] sm:$0xff] %v3499_v40 }
 0x51b   : > { %v3058_v44 = vpop.f32.mrf.mxu1 }
 0x51c   : > { %v3108_v45 = vadd.f32 %v3058_v44, %v2930_v42 }
 0x51d   : > { %v3236_v46 = vpop.f32.mrf.mxu2 }
 0x51e   : > { %v3286_v47 = vadd.f32 %v3236_v46, %v3108_v45 }
 0x51f   : > { %v3450_v48 = vpop.f32.mrf.mxu3 }
 0x520   : > { %v3500_v50 = vadd.f32 %v3450_v48, %v3286_v47  ;;  %v2883_v37 = vpop.f32.mrf.mxu0 }
 0x521   : > { %v2931_v51 = vadd.f32 %v5207_v22, %v2883_v37 }
 0x522   : > { %3762 = vst [vmem:[%s4474_s23 + $0x448] sm:$0xff] %v3500_v50 }
 0x523   : > { %v3061_v52 = vpop.f32.mrf.mxu1 }
 0x524   : > { %v3109_v53 = vadd.f32 %v3061_v52, %v2931_v51 }
 0x525   : > { %v3239_v54 = vpop.f32.mrf.mxu2 }
 0x526   : > { %v3287_v56 = vadd.f32 %v3239_v54, %v3109_v53 }
 0x527   : > { %v3453_v57 = vpop.f32.mrf.mxu3 }
 0x528   : > { %v3501_v58 = vadd.f32 %v3453_v57, %v3287_v56  ;;  %v2886_v59 = vpop.f32.mrf.mxu0 }
 0x529   : > { %v2932_v43 = vadd.f32 %v5207_v22, %v2886_v59 }
 0x52a   : > { %3763 = vst [vmem:[%s4474_s23 + $0x450] sm:$0xff] %v3501_v58 }
 0x52b   : > { %v3064_v49 = vpop.f32.mrf.mxu1 }
 0x52c   : > { %v3110_v60 = vadd.f32 %v3064_v49, %v2932_v43 }
 0x52d   : > { %v3242_v62 = vpop.f32.mrf.mxu2 }
 0x52e   : > { %v3288_v63 = vadd.f32 %v3242_v62, %v3110_v60 }
 0x52f   : > { %v3456_v0 = vpop.f32.mrf.mxu3 }
 0x530   : > { %v3502_v1 = vadd.f32 %v3456_v0, %v3288_v63  ;;  %v2889_v2 = vpop.f32.mrf.mxu0 }
 0x531   : > { %v2933_v4 = vadd.f32 %v5207_v22, %v2889_v2 }
 0x532   : > { %3764 = vst [vmem:[%s4474_s23 + $0x458] sm:$0xff] %v3502_v1 }
 0x533   : > { %v3067_v5 = vpop.f32.mrf.mxu1 }
 0x534   : > { %v3111_v55 = vadd.f32 %v3067_v5, %v2933_v4 }
 0x535   : > { %v3245_v61 = vpop.f32.mrf.mxu2 }
 0x536   : > { %v3289_v6 = vadd.f32 %v3245_v61, %v3111_v55 }
 0x537   : > { %v3459_v7 = vpop.f32.mrf.mxu3 }
 0x538   : > { %v3503_v8 = vadd.f32 %v3459_v7, %v3289_v6  ;;  %v2892_v10 = vpop.f32.mrf.mxu0 }
 0x539   : > { %v2934_v11 = vadd.f32 %v5207_v22, %v2892_v10 }
 0x53a   : > { %3765 = vst [vmem:[%s4474_s23 + $0x460] sm:$0xff] %v3503_v8 }
 0x53b   : > { %v3070_v12 = vpop.f32.mrf.mxu1 }
 0x53c   : > { %v3112_v13 = vadd.f32 %v3070_v12, %v2934_v11 }
 0x53d   : > { %v3248_v36 = vpop.f32.mrf.mxu2 }
 0x53e   : > { %v3290_v3 = vadd.f32 %v3248_v36, %v3112_v13 }
 0x53f   : > { %v3462_v9 = vpop.f32.mrf.mxu3 }
 0x540   : > { %v3504_v15 = vadd.f32 %v3462_v9, %v3290_v3  ;;  %v2895_v16 = vpop.f32.mrf.mxu0 }
 0x541   : > { %v2935_v17 = vadd.f32 %v5207_v22, %v2895_v16 }
 0x542   : > { %3766 = vst [vmem:[%s4474_s23 + $0x468] sm:$0xff] %v3504_v15 }
 0x543   : > { %v3073_v19 = vpop.f32.mrf.mxu1 }
 0x544   : > { %v3113_v34 = vadd.f32 %v3073_v19, %v2935_v17 }
 0x545   : > { %v3251_v20 = vpop.f32.mrf.mxu2 }
 0x546   : > { %v3291_v18 = vadd.f32 %v3251_v20, %v3113_v34 }
 0x547   : > { %v3465_v23 = vpop.f32.mrf.mxu3 }
 0x548   : > { %v3505_v14 = vadd.f32 %v3465_v23, %v3291_v18  ;;  %v2898_v21 = vpop.f32.mrf.mxu0 }
 0x549   : > { %v2936_v25 = vadd.f32 %v5207_v22, %v2898_v21 }
 0x54a   : > { %3767 = vst [vmem:[%s4474_s23 + $0x470] sm:$0xff] %v3505_v14 }
 0x54b   : > { %v3076_v26 = vpop.f32.mrf.mxu1 }
 0x54c   : > { %v3114_v28 = vadd.f32 %v3076_v26, %v2936_v25 }
 0x54d   : > { %v3254_v29 = vpop.f32.mrf.mxu2 }
 0x54e   : > { %v3292_v24 = vadd.f32 %v3254_v29, %v3114_v28 }
 0x54f   : > { %v3468_v30 = vpop.f32.mrf.mxu3 }
 0x550   : > { %v3506_v31 = vadd.f32 %v3468_v30, %v3292_v24 }
 0x552   : > { %3768 = vst [vmem:[%s4474_s23 + $0x478] sm:$0xff] %v3506_v31 }
 0x553   : > { %4211 = shalt.err (!%p4208_p10)
}
 0x554   : > { %s4260_s29 = smov 128   ;;  %s4261_s25 = smov 8  }
 0x555   : > { %3787 = dma.vmem_to_hbm [thread:$0]  (%p4351_p3), %s3558_s4, 18432, %s3560_s5, %s3545_s16, %s4260_s29, %s4260_s29, %s4261_s25  }
 0x556 PF: > { %s3574_s26 = sand.u32 1, %s4242_s12   ;;  %p5353_p12 = scmp.ge.s32.totalorder %s4254_s15, 2 }
 0x557   : > { %s3575_s18 = scalar_lea.sflag [#allocation4], %s3574_s26 }
 0x558   : > { %p3801_p13 = pnand %p5353_p12, %p4317_p6 }
 0x55a   : > { %p3802_p0 = pneg %p3801_p13 }
 0x55c   : > { %4237 = dma.done.wait (%p3802_p0), %s3575_s18, 18432  }
 0x55d   : > { %4239 = vsyncadd (%p3802_p0), %s3575_s18, 4294948864  ;;  %p17_p5 = scmp.ge.s32.totalorder %s4341_s6, 4   ;;  %s5354_s12 = smov %s4246_s13 }
 0x55e   : > { %s5355_s13 = smov %s4250_s14  ;;  %s5356_s14 = smov %s4357_s10 }
 0x55f   : > { %s5357_s15 = smov %s4341_s6  ;;  %19 = sbr.rel (!%p17_p5) target bundleno = 6 (0x6), region = 103 }
 0x564   :  { %3581 = vsyncpa [#allocation3], 1 }
 0x565   :  { %3583 = vsyncpa [#allocation3 + $0x1], 1 }
 0x566   :  { %3584 = vsyncpa [#allocation6], 1 }
 0x567   :  { %3585 = vsyncpa [#allocation4], 1 }
 0x568   :  { %3587 = vsyncpa [#allocation4 + $0x1], 1 }

</bundles_post_ra>
